<compile_context>
chip_gen: v7x
topology: tpu7x:2x2x1
jax: 0.10.0
libtpu: 0.0.40
codegen_flags: <defaults>
</compile_context>

<pallas_src>
import functools

import jax
import jax.numpy as jnp
from jax.experimental import pallas as pl
from jax.experimental.pallas import tpu as pltpu


# ----------------------------- fused Pallas kernel -------------------------- #

def _inn_kernel(x_ref, wxi_ref, wchain_ref, bcomb_ref, wfused_ref,
                wout_ref, bout_ref, out_ref, *, batch, seq_len, hidden):
    """Entire INN forward in one kernel.

    x_ref      : (F, T*B, 1)   per-feature inputs, time-major rows (row = t*B + b)
    wxi_ref    : (F, 1, 8H)    spread layer-0 weights acting on the raw feature
    wchain_ref : (F, H, 8H)    wf_prev @ w_nn_spread  (chain fold; row 0 unused)
    bcomb_ref  : (F, 1, 8H)    spread(b0)+spread1(b1) + bf_prev*w_nn_spread
    wfused_ref : (F, 2H, 8H)   block [[Whh0|Wih1],[0|Whh1]] in spread gate layout
    wout_ref   : (F*H, F)      block-diagonal final Linear weights
    bout_ref   : (1, F)        final Linear biases
    out_ref    : (T*B, F)      all feature outputs, one column per feature

    Spread gate layout along the 8H axis: [i0 i1 f0 f1 g0 g1 o0 o1] (each H wide),
    layer-0 gates in even slots, layer-1 gates in odd slots.
    """
    F = x_ref.shape[0]
    B, T, H = batch, seq_len, hidden

    prev_hseq = None
    hseq_list = []
    for i in range(F):                              # strictly sequential feature chain
        xi = x_ref[i]                               # (T*B, 1)
        wxi = wxi_ref[i]                            # (1, 8H)
        bcomb = bcomb_ref[i]                        # (1, 8H)
        wfused = wfused_ref[i]                      # (2H, 8H)

        # Hoisted layer-0 input projection for the whole sequence, with the
        # previous feature's Linear folded in (one (T*B,H)@(H,8H) matmul).
        if i == 0:
            xp0 = xi * wxi + bcomb                                    # (T*B, 8H)
        else:
            xp0 = (jnp.dot(prev_hseq, wchain_ref[i],
                           preferred_element_type=jnp.float32)
                   + xi * wxi + bcomb)

        # ---- prologue: layer-0 step 0 (h0_{-1}=c0_{-1}=0 -> gates = xp0[0]) ----
        g0 = xp0[0:B, :]
        sg0 = jax.nn.sigmoid(g0)
        c0 = sg0[:, 0:H] * jnp.tanh(g0[:, 4 * H:5 * H])               # i0 * g0
        h0 = sg0[:, 6 * H:7 * H] * jnp.tanh(c0)                       # o0 * tanh(c0)
        zb = jnp.zeros((B, H), jnp.float32)
        h_pk = jnp.concatenate([h0, zb], axis=-1)                     # [h0_0 | h1_{-1}]
        c_pk = jnp.concatenate([c0, zb], axis=-1)                     # [c0_0 | c1_{-1}]

        # ---- skewed fused recurrence: iteration s computes layer-0 step s (s<T)
        # and layer-1 step s-1 with ONE matmul + ONE sigmoid + ONE tanh pass. ----
        h1_steps = []
        for s in range(1, T + 1):                   # static unroll
            # s == T: epilogue (layer-1 step T-1 only); layer-0 columns are unused.
            addend = xp0[s * B:(s + 1) * B, :] if s < T else bcomb
            g = jnp.dot(h_pk, wfused, preferred_element_type=jnp.float32) + addend
            sg = jax.nn.sigmoid(g)                  # (B, 8H)
            gg = jnp.tanh(g[:, 4 * H:6 * H])        # (B, 2H) cell candidates [g0|g1]
            c_pk = sg[:, 2 * H:4 * H] * c_pk + sg[:, 0:2 * H] * gg
            h_pk = sg[:, 6 * H:8 * H] * jnp.tanh(c_pk)
            h1_steps.append(h_pk[:, H:2 * H])       # h1_{s-1}

        prev_hseq = jnp.concatenate(h1_steps, axis=0)   # (T*B, H), vreg-resident
        hseq_list.append(prev_hseq)

    # ---- batched output epilogue: one (T*B, F*H)@(F*H, F) matmul + ONE store ----
    all_h = jnp.concatenate(hseq_list, axis=-1)          # (T*B, F*H)
    out_ref[...] = (jnp.dot(all_h, wout_ref[...],
                            preferred_element_type=jnp.float32) + bout_ref[...])


# ------------------------------ Pallas wrapper ------------------------------ #

def _inn_pallas(x_f, packed, *, seq_len, batch, hidden):
    F, TB, _ = x_f.shape
    kernel = functools.partial(_inn_kernel, batch=batch, seq_len=seq_len,
                               hidden=hidden)
    vmem = pl.BlockSpec(memory_space=pltpu.MemorySpace.VMEM)
    return pl.pallas_call(
        kernel,
        out_shape=jax.ShapeDtypeStruct((TB, F), jnp.float32),
        in_specs=[vmem] * (1 + len(packed)),
        out_specs=vmem,
    )(x_f, *packed)


# --------------------------- parameters & packing --------------------------- #

def init_inn_params(key, input_size, hidden_size, num_layers, output_size, state):
    """Raw per-feature params, PyTorch-default-like init U(-1/sqrt(H), 1/sqrt(H)).

    Returns stacked:
      wih0 (F,2,4H) [row 0 acts on chained nn_out (zero for state==0), row 1 on xi],
      whh0 (F,H,4H), b0 (F,1,4H), wih1 (F,H,4H), whh1 (F,H,4H), b1 (F,1,4H),
      wf (F,H,1), bf (F,1,1).   Gate order matches PyTorch: i, f, g, o.
    """
    assert num_layers == 2, "fused kernel implements exactly 2 stacked LSTM layers"
    assert output_size == 1, "type == 2 -> output_size == 1"
    H = hidden_size
    bound = H ** -0.5

    def u(k, shape):
        return jax.random.uniform(k, shape, jnp.float32, -bound, bound)

    lists = [[] for _ in range(8)]
    for i in range(input_size):
        in_size = 1 if state[i] == 0 else 1 + output_size
        key, k1, k2, k3, k4, k5, k6, k7, k8, k9, k10 = jax.random.split(key, 11)
        w_ih0 = u(k1, (in_size, 4 * H))                    # transposed PyTorch layout
        if in_size < 2:                                    # zero row for the nn_out slot
            w_ih0 = jnp.concatenate(
                [jnp.zeros((2 - in_size, 4 * H), jnp.float32), w_ih0], axis=0)
        feats = (
            w_ih0,                                         # wih0 (2, 4H)
            u(k2, (H, 4 * H)),                             # whh0
            u(k3, (1, 4 * H)) + u(k4, (1, 4 * H)),         # b0 = b_ih + b_hh
            u(k5, (H, 4 * H)),                             # wih1
            u(k6, (H, 4 * H)),                             # whh1
            u(k7, (1, 4 * H)) + u(k8, (1, 4 * H)),         # b1
            u(k9, (H, output_size)),                       # wf
            u(k10, (1, output_size)),                      # bf
        )
        for lst, p in zip(lists, feats):
            lst.append(p)
    return tuple(jnp.stack(lst, axis=0) for lst in lists)


def pack_inn_params(raw, hidden_size):
    """Host-side packing into the skew-fused / spread kernel layout."""
    wih0, whh0, b0, wih1, whh1, b1, wf, bf = raw
    F = wih0.shape[0]
    H = hidden_size

    def spread(m, slot):
        """(..., 4H) gate-major [i,f,g,o] -> (..., 8H) interleaved
        [i0 i1 f0 f1 g0 g1 o0 o1] with this tensor's gates in `slot` (0 or 1)."""
        zeros = jnp.zeros(m.shape[:-1] + (H,), m.dtype)
        parts = []
        for k in range(4):
            gk = m[..., k * H:(k + 1) * H]
            parts += ([gk, zeros] if slot == 0 else [zeros, gk])
        return jnp.concatenate(parts, axis=-1)

    w_nn = spread(wih0[:, 0:1, :], 0)                      # (F,1,8H) acts on chained nn_out
    w_xi = spread(wih0[:, 1:2, :], 0)                      # (F,1,8H) acts on raw feature
    b_all = spread(b0, 0) + spread(b1, 1)                  # (F,1,8H)

    # Skew-fused recurrent block weight: rows 0..H-1 driven by h0, rows H..2H-1 by h1.
    w_fused = jnp.concatenate(
        [spread(whh0, 0) + spread(wih1, 1),
         spread(whh1, 1)], axis=1)                         # (F, 2H, 8H)

    # Fold the previous feature's Linear into this feature's input projection.
    wf_prev = jnp.concatenate([jnp.zeros((1, H, 1), jnp.float32), wf[:-1]], axis=0)
    bf_prev = jnp.concatenate([jnp.zeros((1, 1, 1), jnp.float32), bf[:-1]], axis=0)
    w_chain = jnp.einsum('fho,fog->fhg', wf_prev, w_nn)    # (F, H, 8H)
    b_comb = b_all + bf_prev * w_nn                        # (F, 1, 8H)

    # Block-diagonal batched output projection (all features, one matmul + one store).
    cols = []
    for i in range(F):
        col = jnp.zeros((F * H, 1), jnp.float32).at[i * H:(i + 1) * H, :].set(wf[i])
        cols.append(col)
    w_out = jnp.concatenate(cols, axis=-1)                 # (F*H, F)
    b_out = bf.reshape(1, F)                               # (1, F)

    return (w_xi, w_chain, b_comb, w_fused, w_out, b_out)


# --------------------------------- forward ----------------------------------- #

def inn_forward(x_btf, packed, state):
    """x_btf: (B, T, F) batch-first, like the PyTorch module. Returns (outputs, nn_out)."""
    del state  # chain structure (zero-padded nn_out row, chain fold) is baked into packing
    B, T, F = x_btf.shape
    H = packed[3].shape[1] // 2                            # w_fused is (F, 2H, 8H)
    # (B,T,F) -> (F,T,B) -> (F, T*B, 1), rows time-major (row = t*B + b)
    x_f = jnp.transpose(x_btf.astype(jnp.float32), (2, 1, 0)).reshape(F, T * B, 1)
    out_flat = _inn_pallas(x_f, packed, seq_len=T, batch=B, hidden=H)   # (T*B, F)
    out_btf = jnp.transpose(out_flat.reshape(T, B, F), (1, 0, 2))       # (B, T, F)
    outputs = [out_btf[:, :, i:i + 1] for i in range(F)]
    return outputs, outputs[-1]


# ------------------------- pure-JAX reference (check) ------------------------ #

def _inn_reference(x_btf, raw_params, state):
    wih0, whh0, b0, wih1, whh1, b1, wf, bf = raw_params
    B, T, F = x_btf.shape
    H = whh0.shape[1]

    def lstm_layer(seq, w_ih, w_hh, b):                    # seq: (B, T, IN)
        def step(carry, x_t):
            h, c = carry
            g = x_t @ w_ih + h @ w_hh + b
            ig = jax.nn.sigmoid(g[:, 0:H])
            fg = jax.nn.sigmoid(g[:, H:2 * H])
            gg = jnp.tanh(g[:, 2 * H:3 * H])
            og = jax.nn.sigmoid(g[:, 3 * H:4 * H])
            c = fg * c + ig * gg
            h = og * jnp.tanh(c)
            return (h, c), h
        h0 = jnp.zeros((B, H), jnp.float32)
        c0 = jnp.zeros((B, H), jnp.float32)
        _, hs = jax.lax.scan(step, (h0, c0), jnp.swapaxes(seq, 0, 1))
        return jnp.swapaxes(hs, 0, 1)                      # (B, T, H)

    outs, nn_out = [], None
    for i in range(F):
        xi = x_btf[:, :, i:i + 1].astype(jnp.float32)
        prev = jnp.zeros_like(xi) if state[i] == 0 else nn_out
        inp = jnp.concatenate([prev, xi], axis=2)          # zero weight row makes this exact
        h = lstm_layer(inp, wih0[i], whh0[i], b0[i])
        h = lstm_layer(h, wih1[i], whh1[i], b1[i])
        nn_out = h @ wf[i] + bf[i]
        outs.append(nn_out)
    return outs, nn_out


# ----------------------------------- main ----------------------------------- #

if __name__ == "__main__":
    B, T = 2, 8
    input_size, hidden_size, num_layers = 4, 32, 2
    output_size = 1                      # type == 2
    state = (0, 4, 3, 4)                 # synthetic data['state'][0]

    key = jax.random.PRNGKey(0)
    kx, kp = jax.random.split(key)
    x = jax.random.normal(kx, (B, T, input_size), jnp.float32)
    raw = init_inn_params(kp, input_size, hidden_size, num_layers,
                          output_size, state)
    packed = pack_inn_params(raw, hidden_size)

    outputs, nn_out = inn_forward(x, packed, state)
    nn_out = jax.block_until_ready(nn_out)
    outputs = [jax.block_until_ready(o) for o in outputs]

    assert nn_out.shape == (B, T, output_size), nn_out.shape
    assert len(outputs) == input_size
    assert all(o.shape == (B, T, output_size) for o in outputs)
    assert bool(jnp.all(jnp.isfinite(nn_out)))

    ref_outs, ref_nn = _inn_reference(x, raw, state)
    for o, r in zip(outputs, ref_outs):
        assert bool(jnp.allclose(o, r, atol=5e-3, rtol=5e-3)), (
            "mismatch vs reference: max abs err "
            f"{float(jnp.max(jnp.abs(o - r)))}")
    assert bool(jnp.allclose(nn_out, ref_nn, atol=5e-3, rtol=5e-3))
    print("KERNEL_OK")
</pallas_src>

<mosaic_0001>
module attributes {stable_mosaic.version = 11 : i64} {
  func.func @_inn_kernel(%arg0: memref<4x16x1xf32, #tpu.memory_space<vmem>>, %arg1: memref<4x1x256xf32, #tpu.memory_space<vmem>>, %arg2: memref<4x32x256xf32, #tpu.memory_space<vmem>>, %arg3: memref<4x1x256xf32, #tpu.memory_space<vmem>>, %arg4: memref<4x64x256xf32, #tpu.memory_space<vmem>>, %arg5: memref<128x4xf32, #tpu.memory_space<vmem>>, %arg6: memref<1x4xf32, #tpu.memory_space<vmem>>, %arg7: memref<16x4xf32, #tpu.memory_space<vmem>>) attributes {dimension_semantics = [], scalar_prefetch = 0 : i64, scratch_operands = 0 : i64, tpu.core_type = #tpu.core_type<tc>} {
    %c0 = arith.constant 0 : index
    %c0_0 = arith.constant 0 : index
    %c0_1 = arith.constant 0 : index
    %0 = vector.load %arg0[%c0, %c0_0, %c0_1] : memref<4x16x1xf32, #tpu.memory_space<vmem>>, vector<1x16x1xf32>
    %1 = vector.shape_cast %0 : vector<1x16x1xf32> to vector<16x1xf32>
    %c0_2 = arith.constant 0 : index
    %c0_3 = arith.constant 0 : index
    %c0_4 = arith.constant 0 : index
    %2 = vector.load %arg1[%c0_2, %c0_3, %c0_4] : memref<4x1x256xf32, #tpu.memory_space<vmem>>, vector<1x1x256xf32>
    %3 = vector.shape_cast %2 : vector<1x1x256xf32> to vector<1x256xf32>
    %c0_5 = arith.constant 0 : index
    %c0_6 = arith.constant 0 : index
    %c0_7 = arith.constant 0 : index
    %4 = vector.load %arg3[%c0_5, %c0_6, %c0_7] : memref<4x1x256xf32, #tpu.memory_space<vmem>>, vector<1x1x256xf32>
    %5 = vector.shape_cast %4 : vector<1x1x256xf32> to vector<1x256xf32>
    %c0_8 = arith.constant 0 : index
    %c0_9 = arith.constant 0 : index
    %c0_10 = arith.constant 0 : index
    %6 = vector.load %arg4[%c0_8, %c0_9, %c0_10] : memref<4x64x256xf32, #tpu.memory_space<vmem>>, vector<1x64x256xf32>
    %7 = vector.shape_cast %6 : vector<1x64x256xf32> to vector<64x256xf32>
    %8 = vector.broadcast %1 : vector<16x1xf32> to vector<16x256xf32>
    %9 = vector.broadcast %3 : vector<1x256xf32> to vector<16x256xf32>
    %10 = arith.mulf %8, %9 : vector<16x256xf32>
    %11 = vector.broadcast %5 : vector<1x256xf32> to vector<16x256xf32>
    %12 = arith.addf %10, %11 : vector<16x256xf32>
    %13 = vector.extract_strided_slice %12 {offsets = [0, 0], sizes = [2, 256], strides = [1, 1]} : vector<16x256xf32> to vector<2x256xf32>
    %14 = arith.negf %13 : vector<2x256xf32>
    %15 = math.exp %14 : vector<2x256xf32>
    %cst = arith.constant 1.000000e+00 : f32
    %16 = vector.broadcast %cst : f32 to vector<2x256xf32>
    %17 = arith.addf %16, %15 : vector<2x256xf32>
    %18 = arith.divf %16, %17 : vector<2x256xf32>
    %19 = vector.extract_strided_slice %18 {offsets = [0, 0], sizes = [2, 32], strides = [1, 1]} : vector<2x256xf32> to vector<2x32xf32>
    %20 = vector.extract_strided_slice %13 {offsets = [0, 128], sizes = [2, 32], strides = [1, 1]} : vector<2x256xf32> to vector<2x32xf32>
    %21 = math.tanh %20 : vector<2x32xf32>
    %22 = arith.mulf %19, %21 : vector<2x32xf32>
    %23 = vector.extract_strided_slice %18 {offsets = [0, 192], sizes = [2, 32], strides = [1, 1]} : vector<2x256xf32> to vector<2x32xf32>
    %24 = math.tanh %22 : vector<2x32xf32>
    %25 = arith.mulf %23, %24 : vector<2x32xf32>
    %cst_11 = arith.constant 0.000000e+00 : f32
    %26 = vector.broadcast %cst_11 : f32 to vector<2x32xf32>
    %27 = tpu.concatenate %25, %26 in 1 : vector<2x32xf32>, vector<2x32xf32> -> vector<2x64xf32>
    %28 = tpu.concatenate %22, %26 in 1 : vector<2x32xf32>, vector<2x32xf32> -> vector<2x64xf32>
    %29 = vector.extract_strided_slice %12 {offsets = [2, 0], sizes = [2, 256], strides = [1, 1]} : vector<16x256xf32> to vector<2x256xf32>
    %cst_12 = arith.constant dense<0.000000e+00> : vector<2x256xf32>
    %30 = tpu.matmul %27, %7, %cst_12 {dimension_numbers = #tpu.dot_dimension_numbers<[1], [0], [0], [1], [0, 0, 1, 1], [], []>} : vector<2x64xf32>, vector<64x256xf32>, vector<2x256xf32> -> vector<2x256xf32>
    %31 = arith.addf %30, %29 : vector<2x256xf32>
    %32 = arith.negf %31 : vector<2x256xf32>
    %33 = math.exp %32 : vector<2x256xf32>
    %cst_13 = arith.constant 1.000000e+00 : f32
    %34 = vector.broadcast %cst_13 : f32 to vector<2x256xf32>
    %35 = arith.addf %34, %33 : vector<2x256xf32>
    %36 = arith.divf %34, %35 : vector<2x256xf32>
    %37 = vector.extract_strided_slice %31 {offsets = [0, 128], sizes = [2, 64], strides = [1, 1]} : vector<2x256xf32> to vector<2x64xf32>
    %38 = math.tanh %37 : vector<2x64xf32>
    %39 = vector.extract_strided_slice %36 {offsets = [0, 64], sizes = [2, 64], strides = [1, 1]} : vector<2x256xf32> to vector<2x64xf32>
    %40 = arith.mulf %39, %28 : vector<2x64xf32>
    %41 = vector.extract_strided_slice %36 {offsets = [0, 0], sizes = [2, 64], strides = [1, 1]} : vector<2x256xf32> to vector<2x64xf32>
    %42 = arith.mulf %41, %38 : vector<2x64xf32>
    %43 = arith.addf %40, %42 : vector<2x64xf32>
    %44 = vector.extract_strided_slice %36 {offsets = [0, 192], sizes = [2, 64], strides = [1, 1]} : vector<2x256xf32> to vector<2x64xf32>
    %45 = math.tanh %43 : vector<2x64xf32>
    %46 = arith.mulf %44, %45 : vector<2x64xf32>
    %47 = vector.extract_strided_slice %46 {offsets = [0, 32], sizes = [2, 32], strides = [1, 1]} : vector<2x64xf32> to vector<2x32xf32>
    %48 = vector.extract_strided_slice %12 {offsets = [4, 0], sizes = [2, 256], strides = [1, 1]} : vector<16x256xf32> to vector<2x256xf32>
    %cst_14 = arith.constant dense<0.000000e+00> : vector<2x256xf32>
    %49 = tpu.matmul %46, %7, %cst_14 {dimension_numbers = #tpu.dot_dimension_numbers<[1], [0], [0], [1], [0, 0, 1, 1], [], []>} : vector<2x64xf32>, vector<64x256xf32>, vector<2x256xf32> -> vector<2x256xf32>
    %50 = arith.addf %49, %48 : vector<2x256xf32>
    %51 = arith.negf %50 : vector<2x256xf32>
    %52 = math.exp %51 : vector<2x256xf32>
    %cst_15 = arith.constant 1.000000e+00 : f32
    %53 = vector.broadcast %cst_15 : f32 to vector<2x256xf32>
    %54 = arith.addf %53, %52 : vector<2x256xf32>
    %55 = arith.divf %53, %54 : vector<2x256xf32>
    %56 = vector.extract_strided_slice %50 {offsets = [0, 128], sizes = [2, 64], strides = [1, 1]} : vector<2x256xf32> to vector<2x64xf32>
    %57 = math.tanh %56 : vector<2x64xf32>
    %58 = vector.extract_strided_slice %55 {offsets = [0, 64], sizes = [2, 64], strides = [1, 1]} : vector<2x256xf32> to vector<2x64xf32>
    %59 = arith.mulf %58, %43 : vector<2x64xf32>
    %60 = vector.extract_strided_slice %55 {offsets = [0, 0], sizes = [2, 64], strides = [1, 1]} : vector<2x256xf32> to vector<2x64xf32>
    %61 = arith.mulf %60, %57 : vector<2x64xf32>
    %62 = arith.addf %59, %61 : vector<2x64xf32>
    %63 = vector.extract_strided_slice %55 {offsets = [0, 192], sizes = [2, 64], strides = [1, 1]} : vector<2x256xf32> to vector<2x64xf32>
    %64 = math.tanh %62 : vector<2x64xf32>
    %65 = arith.mulf %63, %64 : vector<2x64xf32>
    %66 = vector.extract_strided_slice %65 {offsets = [0, 32], sizes = [2, 32], strides = [1, 1]} : vector<2x64xf32> to vector<2x32xf32>
    %67 = vector.extract_strided_slice %12 {offsets = [6, 0], sizes = [2, 256], strides = [1, 1]} : vector<16x256xf32> to vector<2x256xf32>
    %cst_16 = arith.constant dense<0.000000e+00> : vector<2x256xf32>
    %68 = tpu.matmul %65, %7, %cst_16 {dimension_numbers = #tpu.dot_dimension_numbers<[1], [0], [0], [1], [0, 0, 1, 1], [], []>} : vector<2x64xf32>, vector<64x256xf32>, vector<2x256xf32> -> vector<2x256xf32>
    %69 = arith.addf %68, %67 : vector<2x256xf32>
    %70 = arith.negf %69 : vector<2x256xf32>
    %71 = math.exp %70 : vector<2x256xf32>
    %cst_17 = arith.constant 1.000000e+00 : f32
    %72 = vector.broadcast %cst_17 : f32 to vector<2x256xf32>
    %73 = arith.addf %72, %71 : vector<2x256xf32>
    %74 = arith.divf %72, %73 : vector<2x256xf32>
    %75 = vector.extract_strided_slice %69 {offsets = [0, 128], sizes = [2, 64], strides = [1, 1]} : vector<2x256xf32> to vector<2x64xf32>
    %76 = math.tanh %75 : vector<2x64xf32>
    %77 = vector.extract_strided_slice %74 {offsets = [0, 64], sizes = [2, 64], strides = [1, 1]} : vector<2x256xf32> to vector<2x64xf32>
    %78 = arith.mulf %77, %62 : vector<2x64xf32>
    %79 = vector.extract_strided_slice %74 {offsets = [0, 0], sizes = [2, 64], strides = [1, 1]} : vector<2x256xf32> to vector<2x64xf32>
    %80 = arith.mulf %79, %76 : vector<2x64xf32>
    %81 = arith.addf %78, %80 : vector<2x64xf32>
    %82 = vector.extract_strided_slice %74 {offsets = [0, 192], sizes = [2, 64], strides = [1, 1]} : vector<2x256xf32> to vector<2x64xf32>
    %83 = math.tanh %81 : vector<2x64xf32>
    %84 = arith.mulf %82, %83 : vector<2x64xf32>
    %85 = vector.extract_strided_slice %84 {offsets = [0, 32], sizes = [2, 32], strides = [1, 1]} : vector<2x64xf32> to vector<2x32xf32>
    %86 = vector.extract_strided_slice %12 {offsets = [8, 0], sizes = [2, 256], strides = [1, 1]} : vector<16x256xf32> to vector<2x256xf32>
    %cst_18 = arith.constant dense<0.000000e+00> : vector<2x256xf32>
    %87 = tpu.matmul %84, %7, %cst_18 {dimension_numbers = #tpu.dot_dimension_numbers<[1], [0], [0], [1], [0, 0, 1, 1], [], []>} : vector<2x64xf32>, vector<64x256xf32>, vector<2x256xf32> -> vector<2x256xf32>
    %88 = arith.addf %87, %86 : vector<2x256xf32>
    %89 = arith.negf %88 : vector<2x256xf32>
    %90 = math.exp %89 : vector<2x256xf32>
    %cst_19 = arith.constant 1.000000e+00 : f32
    %91 = vector.broadcast %cst_19 : f32 to vector<2x256xf32>
    %92 = arith.addf %91, %90 : vector<2x256xf32>
    %93 = arith.divf %91, %92 : vector<2x256xf32>
    %94 = vector.extract_strided_slice %88 {offsets = [0, 128], sizes = [2, 64], strides = [1, 1]} : vector<2x256xf32> to vector<2x64xf32>
    %95 = math.tanh %94 : vector<2x64xf32>
    %96 = vector.extract_strided_slice %93 {offsets = [0, 64], sizes = [2, 64], strides = [1, 1]} : vector<2x256xf32> to vector<2x64xf32>
    %97 = arith.mulf %96, %81 : vector<2x64xf32>
    %98 = vector.extract_strided_slice %93 {offsets = [0, 0], sizes = [2, 64], strides = [1, 1]} : vector<2x256xf32> to vector<2x64xf32>
    %99 = arith.mulf %98, %95 : vector<2x64xf32>
    %100 = arith.addf %97, %99 : vector<2x64xf32>
    %101 = vector.extract_strided_slice %93 {offsets = [0, 192], sizes = [2, 64], strides = [1, 1]} : vector<2x256xf32> to vector<2x64xf32>
    %102 = math.tanh %100 : vector<2x64xf32>
    %103 = arith.mulf %101, %102 : vector<2x64xf32>
    %104 = vector.extract_strided_slice %103 {offsets = [0, 32], sizes = [2, 32], strides = [1, 1]} : vector<2x64xf32> to vector<2x32xf32>
    %105 = vector.extract_strided_slice %12 {offsets = [10, 0], sizes = [2, 256], strides = [1, 1]} : vector<16x256xf32> to vector<2x256xf32>
    %cst_20 = arith.constant dense<0.000000e+00> : vector<2x256xf32>
    %106 = tpu.matmul %103, %7, %cst_20 {dimension_numbers = #tpu.dot_dimension_numbers<[1], [0], [0], [1], [0, 0, 1, 1], [], []>} : vector<2x64xf32>, vector<64x256xf32>, vector<2x256xf32> -> vector<2x256xf32>
    %107 = arith.addf %106, %105 : vector<2x256xf32>
    %108 = arith.negf %107 : vector<2x256xf32>
    %109 = math.exp %108 : vector<2x256xf32>
    %cst_21 = arith.constant 1.000000e+00 : f32
    %110 = vector.broadcast %cst_21 : f32 to vector<2x256xf32>
    %111 = arith.addf %110, %109 : vector<2x256xf32>
    %112 = arith.divf %110, %111 : vector<2x256xf32>
    %113 = vector.extract_strided_slice %107 {offsets = [0, 128], sizes = [2, 64], strides = [1, 1]} : vector<2x256xf32> to vector<2x64xf32>
    %114 = math.tanh %113 : vector<2x64xf32>
    %115 = vector.extract_strided_slice %112 {offsets = [0, 64], sizes = [2, 64], strides = [1, 1]} : vector<2x256xf32> to vector<2x64xf32>
    %116 = arith.mulf %115, %100 : vector<2x64xf32>
    %117 = vector.extract_strided_slice %112 {offsets = [0, 0], sizes = [2, 64], strides = [1, 1]} : vector<2x256xf32> to vector<2x64xf32>
    %118 = arith.mulf %117, %114 : vector<2x64xf32>
    %119 = arith.addf %116, %118 : vector<2x64xf32>
    %120 = vector.extract_strided_slice %112 {offsets = [0, 192], sizes = [2, 64], strides = [1, 1]} : vector<2x256xf32> to vector<2x64xf32>
    %121 = math.tanh %119 : vector<2x64xf32>
    %122 = arith.mulf %120, %121 : vector<2x64xf32>
    %123 = vector.extract_strided_slice %122 {offsets = [0, 32], sizes = [2, 32], strides = [1, 1]} : vector<2x64xf32> to vector<2x32xf32>
    %124 = vector.extract_strided_slice %12 {offsets = [12, 0], sizes = [2, 256], strides = [1, 1]} : vector<16x256xf32> to vector<2x256xf32>
    %cst_22 = arith.constant dense<0.000000e+00> : vector<2x256xf32>
    %125 = tpu.matmul %122, %7, %cst_22 {dimension_numbers = #tpu.dot_dimension_numbers<[1], [0], [0], [1], [0, 0, 1, 1], [], []>} : vector<2x64xf32>, vector<64x256xf32>, vector<2x256xf32> -> vector<2x256xf32>
    %126 = arith.addf %125, %124 : vector<2x256xf32>
    %127 = arith.negf %126 : vector<2x256xf32>
    %128 = math.exp %127 : vector<2x256xf32>
    %cst_23 = arith.constant 1.000000e+00 : f32
    %129 = vector.broadcast %cst_23 : f32 to vector<2x256xf32>
    %130 = arith.addf %129, %128 : vector<2x256xf32>
    %131 = arith.divf %129, %130 : vector<2x256xf32>
    %132 = vector.extract_strided_slice %126 {offsets = [0, 128], sizes = [2, 64], strides = [1, 1]} : vector<2x256xf32> to vector<2x64xf32>
    %133 = math.tanh %132 : vector<2x64xf32>
    %134 = vector.extract_strided_slice %131 {offsets = [0, 64], sizes = [2, 64], strides = [1, 1]} : vector<2x256xf32> to vector<2x64xf32>
    %135 = arith.mulf %134, %119 : vector<2x64xf32>
    %136 = vector.extract_strided_slice %131 {offsets = [0, 0], sizes = [2, 64], strides = [1, 1]} : vector<2x256xf32> to vector<2x64xf32>
    %137 = arith.mulf %136, %133 : vector<2x64xf32>
    %138 = arith.addf %135, %137 : vector<2x64xf32>
    %139 = vector.extract_strided_slice %131 {offsets = [0, 192], sizes = [2, 64], strides = [1, 1]} : vector<2x256xf32> to vector<2x64xf32>
    %140 = math.tanh %138 : vector<2x64xf32>
    %141 = arith.mulf %139, %140 : vector<2x64xf32>
    %142 = vector.extract_strided_slice %141 {offsets = [0, 32], sizes = [2, 32], strides = [1, 1]} : vector<2x64xf32> to vector<2x32xf32>
    %143 = vector.extract_strided_slice %12 {offsets = [14, 0], sizes = [2, 256], strides = [1, 1]} : vector<16x256xf32> to vector<2x256xf32>
    %cst_24 = arith.constant dense<0.000000e+00> : vector<2x256xf32>
    %144 = tpu.matmul %141, %7, %cst_24 {dimension_numbers = #tpu.dot_dimension_numbers<[1], [0], [0], [1], [0, 0, 1, 1], [], []>} : vector<2x64xf32>, vector<64x256xf32>, vector<2x256xf32> -> vector<2x256xf32>
    %145 = arith.addf %144, %143 : vector<2x256xf32>
    %146 = arith.negf %145 : vector<2x256xf32>
    %147 = math.exp %146 : vector<2x256xf32>
    %cst_25 = arith.constant 1.000000e+00 : f32
    %148 = vector.broadcast %cst_25 : f32 to vector<2x256xf32>
    %149 = arith.addf %148, %147 : vector<2x256xf32>
    %150 = arith.divf %148, %149 : vector<2x256xf32>
    %151 = vector.extract_strided_slice %145 {offsets = [0, 128], sizes = [2, 64], strides = [1, 1]} : vector<2x256xf32> to vector<2x64xf32>
    %152 = math.tanh %151 : vector<2x64xf32>
    %153 = vector.extract_strided_slice %150 {offsets = [0, 64], sizes = [2, 64], strides = [1, 1]} : vector<2x256xf32> to vector<2x64xf32>
    %154 = arith.mulf %153, %138 : vector<2x64xf32>
    %155 = vector.extract_strided_slice %150 {offsets = [0, 0], sizes = [2, 64], strides = [1, 1]} : vector<2x256xf32> to vector<2x64xf32>
    %156 = arith.mulf %155, %152 : vector<2x64xf32>
    %157 = arith.addf %154, %156 : vector<2x64xf32>
    %158 = vector.extract_strided_slice %150 {offsets = [0, 192], sizes = [2, 64], strides = [1, 1]} : vector<2x256xf32> to vector<2x64xf32>
    %159 = math.tanh %157 : vector<2x64xf32>
    %160 = arith.mulf %158, %159 : vector<2x64xf32>
    %161 = vector.extract_strided_slice %160 {offsets = [0, 32], sizes = [2, 32], strides = [1, 1]} : vector<2x64xf32> to vector<2x32xf32>
    %cst_26 = arith.constant dense<0.000000e+00> : vector<2x256xf32>
    %162 = tpu.matmul %160, %7, %cst_26 {dimension_numbers = #tpu.dot_dimension_numbers<[1], [0], [0], [1], [0, 0, 1, 1], [], []>} : vector<2x64xf32>, vector<64x256xf32>, vector<2x256xf32> -> vector<2x256xf32>
    %163 = vector.broadcast %5 : vector<1x256xf32> to vector<2x256xf32>
    %164 = arith.addf %162, %163 : vector<2x256xf32>
    %165 = arith.negf %164 : vector<2x256xf32>
    %166 = math.exp %165 : vector<2x256xf32>
    %cst_27 = arith.constant 1.000000e+00 : f32
    %167 = vector.broadcast %cst_27 : f32 to vector<2x256xf32>
    %168 = arith.addf %167, %166 : vector<2x256xf32>
    %169 = arith.divf %167, %168 : vector<2x256xf32>
    %170 = vector.extract_strided_slice %164 {offsets = [0, 128], sizes = [2, 64], strides = [1, 1]} : vector<2x256xf32> to vector<2x64xf32>
    %171 = math.tanh %170 : vector<2x64xf32>
    %172 = vector.extract_strided_slice %169 {offsets = [0, 64], sizes = [2, 64], strides = [1, 1]} : vector<2x256xf32> to vector<2x64xf32>
    %173 = arith.mulf %172, %157 : vector<2x64xf32>
    %174 = vector.extract_strided_slice %169 {offsets = [0, 0], sizes = [2, 64], strides = [1, 1]} : vector<2x256xf32> to vector<2x64xf32>
    %175 = arith.mulf %174, %171 : vector<2x64xf32>
    %176 = arith.addf %173, %175 : vector<2x64xf32>
    %177 = vector.extract_strided_slice %169 {offsets = [0, 192], sizes = [2, 64], strides = [1, 1]} : vector<2x256xf32> to vector<2x64xf32>
    %178 = math.tanh %176 : vector<2x64xf32>
    %179 = arith.mulf %177, %178 : vector<2x64xf32>
    %180 = vector.extract_strided_slice %179 {offsets = [0, 32], sizes = [2, 32], strides = [1, 1]} : vector<2x64xf32> to vector<2x32xf32>
    %181 = tpu.concatenate %47, %66, %85, %104, %123, %142, %161, %180 in 0 : vector<2x32xf32>, vector<2x32xf32>, vector<2x32xf32>, vector<2x32xf32>, vector<2x32xf32>, vector<2x32xf32>, vector<2x32xf32>, vector<2x32xf32> -> vector<16x32xf32>
    %c1 = arith.constant 1 : index
    %c0_28 = arith.constant 0 : index
    %c0_29 = arith.constant 0 : index
    %182 = vector.load %arg0[%c1, %c0_28, %c0_29] : memref<4x16x1xf32, #tpu.memory_space<vmem>>, vector<1x16x1xf32>
    %183 = vector.shape_cast %182 : vector<1x16x1xf32> to vector<16x1xf32>
    %c1_30 = arith.constant 1 : index
    %c0_31 = arith.constant 0 : index
    %c0_32 = arith.constant 0 : index
    %184 = vector.load %arg1[%c1_30, %c0_31, %c0_32] : memref<4x1x256xf32, #tpu.memory_space<vmem>>, vector<1x1x256xf32>
    %185 = vector.shape_cast %184 : vector<1x1x256xf32> to vector<1x256xf32>
    %c1_33 = arith.constant 1 : index
    %c0_34 = arith.constant 0 : index
    %c0_35 = arith.constant 0 : index
    %186 = vector.load %arg3[%c1_33, %c0_34, %c0_35] : memref<4x1x256xf32, #tpu.memory_space<vmem>>, vector<1x1x256xf32>
    %187 = vector.shape_cast %186 : vector<1x1x256xf32> to vector<1x256xf32>
    %c1_36 = arith.constant 1 : index
    %c0_37 = arith.constant 0 : index
    %c0_38 = arith.constant 0 : index
    %188 = vector.load %arg4[%c1_36, %c0_37, %c0_38] : memref<4x64x256xf32, #tpu.memory_space<vmem>>, vector<1x64x256xf32>
    %189 = vector.shape_cast %188 : vector<1x64x256xf32> to vector<64x256xf32>
    %c1_39 = arith.constant 1 : index
    %c0_40 = arith.constant 0 : index
    %c0_41 = arith.constant 0 : index
    %190 = vector.load %arg2[%c1_39, %c0_40, %c0_41] : memref<4x32x256xf32, #tpu.memory_space<vmem>>, vector<1x32x256xf32>
    %191 = vector.shape_cast %190 : vector<1x32x256xf32> to vector<32x256xf32>
    %cst_42 = arith.constant dense<0.000000e+00> : vector<16x256xf32>
    %192 = tpu.matmul %181, %191, %cst_42 {dimension_numbers = #tpu.dot_dimension_numbers<[1], [0], [0], [1], [0, 0, 1, 1], [], []>} : vector<16x32xf32>, vector<32x256xf32>, vector<16x256xf32> -> vector<16x256xf32>
    %193 = vector.broadcast %183 : vector<16x1xf32> to vector<16x256xf32>
    %194 = vector.broadcast %185 : vector<1x256xf32> to vector<16x256xf32>
    %195 = arith.mulf %193, %194 : vector<16x256xf32>
    %196 = arith.addf %192, %195 : vector<16x256xf32>
    %197 = vector.broadcast %187 : vector<1x256xf32> to vector<16x256xf32>
    %198 = arith.addf %196, %197 : vector<16x256xf32>
    %199 = vector.extract_strided_slice %198 {offsets = [0, 0], sizes = [2, 256], strides = [1, 1]} : vector<16x256xf32> to vector<2x256xf32>
    %200 = arith.negf %199 : vector<2x256xf32>
    %201 = math.exp %200 : vector<2x256xf32>
    %cst_43 = arith.constant 1.000000e+00 : f32
    %202 = vector.broadcast %cst_43 : f32 to vector<2x256xf32>
    %203 = arith.addf %202, %201 : vector<2x256xf32>
    %204 = arith.divf %202, %203 : vector<2x256xf32>
    %205 = vector.extract_strided_slice %204 {offsets = [0, 0], sizes = [2, 32], strides = [1, 1]} : vector<2x256xf32> to vector<2x32xf32>
    %206 = vector.extract_strided_slice %199 {offsets = [0, 128], sizes = [2, 32], strides = [1, 1]} : vector<2x256xf32> to vector<2x32xf32>
    %207 = math.tanh %206 : vector<2x32xf32>
    %208 = arith.mulf %205, %207 : vector<2x32xf32>
    %209 = vector.extract_strided_slice %204 {offsets = [0, 192], sizes = [2, 32], strides = [1, 1]} : vector<2x256xf32> to vector<2x32xf32>
    %210 = math.tanh %208 : vector<2x32xf32>
    %211 = arith.mulf %209, %210 : vector<2x32xf32>
    %cst_44 = arith.constant 0.000000e+00 : f32
    %212 = vector.broadcast %cst_44 : f32 to vector<2x32xf32>
    %213 = tpu.concatenate %211, %212 in 1 : vector<2x32xf32>, vector<2x32xf32> -> vector<2x64xf32>
    %214 = tpu.concatenate %208, %212 in 1 : vector<2x32xf32>, vector<2x32xf32> -> vector<2x64xf32>
    %215 = vector.extract_strided_slice %198 {offsets = [2, 0], sizes = [2, 256], strides = [1, 1]} : vector<16x256xf32> to vector<2x256xf32>
    %cst_45 = arith.constant dense<0.000000e+00> : vector<2x256xf32>
    %216 = tpu.matmul %213, %189, %cst_45 {dimension_numbers = #tpu.dot_dimension_numbers<[1], [0], [0], [1], [0, 0, 1, 1], [], []>} : vector<2x64xf32>, vector<64x256xf32>, vector<2x256xf32> -> vector<2x256xf32>
    %217 = arith.addf %216, %215 : vector<2x256xf32>
    %218 = arith.negf %217 : vector<2x256xf32>
    %219 = math.exp %218 : vector<2x256xf32>
    %cst_46 = arith.constant 1.000000e+00 : f32
    %220 = vector.broadcast %cst_46 : f32 to vector<2x256xf32>
    %221 = arith.addf %220, %219 : vector<2x256xf32>
    %222 = arith.divf %220, %221 : vector<2x256xf32>
    %223 = vector.extract_strided_slice %217 {offsets = [0, 128], sizes = [2, 64], strides = [1, 1]} : vector<2x256xf32> to vector<2x64xf32>
    %224 = math.tanh %223 : vector<2x64xf32>
    %225 = vector.extract_strided_slice %222 {offsets = [0, 64], sizes = [2, 64], strides = [1, 1]} : vector<2x256xf32> to vector<2x64xf32>
    %226 = arith.mulf %225, %214 : vector<2x64xf32>
    %227 = vector.extract_strided_slice %222 {offsets = [0, 0], sizes = [2, 64], strides = [1, 1]} : vector<2x256xf32> to vector<2x64xf32>
    %228 = arith.mulf %227, %224 : vector<2x64xf32>
    %229 = arith.addf %226, %228 : vector<2x64xf32>
    %230 = vector.extract_strided_slice %222 {offsets = [0, 192], sizes = [2, 64], strides = [1, 1]} : vector<2x256xf32> to vector<2x64xf32>
    %231 = math.tanh %229 : vector<2x64xf32>
    %232 = arith.mulf %230, %231 : vector<2x64xf32>
    %233 = vector.extract_strided_slice %232 {offsets = [0, 32], sizes = [2, 32], strides = [1, 1]} : vector<2x64xf32> to vector<2x32xf32>
    %234 = vector.extract_strided_slice %198 {offsets = [4, 0], sizes = [2, 256], strides = [1, 1]} : vector<16x256xf32> to vector<2x256xf32>
    %cst_47 = arith.constant dense<0.000000e+00> : vector<2x256xf32>
    %235 = tpu.matmul %232, %189, %cst_47 {dimension_numbers = #tpu.dot_dimension_numbers<[1], [0], [0], [1], [0, 0, 1, 1], [], []>} : vector<2x64xf32>, vector<64x256xf32>, vector<2x256xf32> -> vector<2x256xf32>
    %236 = arith.addf %235, %234 : vector<2x256xf32>
    %237 = arith.negf %236 : vector<2x256xf32>
    %238 = math.exp %237 : vector<2x256xf32>
    %cst_48 = arith.constant 1.000000e+00 : f32
    %239 = vector.broadcast %cst_48 : f32 to vector<2x256xf32>
    %240 = arith.addf %239, %238 : vector<2x256xf32>
    %241 = arith.divf %239, %240 : vector<2x256xf32>
    %242 = vector.extract_strided_slice %236 {offsets = [0, 128], sizes = [2, 64], strides = [1, 1]} : vector<2x256xf32> to vector<2x64xf32>
    %243 = math.tanh %242 : vector<2x64xf32>
    %244 = vector.extract_strided_slice %241 {offsets = [0, 64], sizes = [2, 64], strides = [1, 1]} : vector<2x256xf32> to vector<2x64xf32>
    %245 = arith.mulf %244, %229 : vector<2x64xf32>
    %246 = vector.extract_strided_slice %241 {offsets = [0, 0], sizes = [2, 64], strides = [1, 1]} : vector<2x256xf32> to vector<2x64xf32>
    %247 = arith.mulf %246, %243 : vector<2x64xf32>
    %248 = arith.addf %245, %247 : vector<2x64xf32>
    %249 = vector.extract_strided_slice %241 {offsets = [0, 192], sizes = [2, 64], strides = [1, 1]} : vector<2x256xf32> to vector<2x64xf32>
    %250 = math.tanh %248 : vector<2x64xf32>
    %251 = arith.mulf %249, %250 : vector<2x64xf32>
    %252 = vector.extract_strided_slice %251 {offsets = [0, 32], sizes = [2, 32], strides = [1, 1]} : vector<2x64xf32> to vector<2x32xf32>
    %253 = vector.extract_strided_slice %198 {offsets = [6, 0], sizes = [2, 256], strides = [1, 1]} : vector<16x256xf32> to vector<2x256xf32>
    %cst_49 = arith.constant dense<0.000000e+00> : vector<2x256xf32>
    %254 = tpu.matmul %251, %189, %cst_49 {dimension_numbers = #tpu.dot_dimension_numbers<[1], [0], [0], [1], [0, 0, 1, 1], [], []>} : vector<2x64xf32>, vector<64x256xf32>, vector<2x256xf32> -> vector<2x256xf32>
    %255 = arith.addf %254, %253 : vector<2x256xf32>
    %256 = arith.negf %255 : vector<2x256xf32>
    %257 = math.exp %256 : vector<2x256xf32>
    %cst_50 = arith.constant 1.000000e+00 : f32
    %258 = vector.broadcast %cst_50 : f32 to vector<2x256xf32>
    %259 = arith.addf %258, %257 : vector<2x256xf32>
    %260 = arith.divf %258, %259 : vector<2x256xf32>
    %261 = vector.extract_strided_slice %255 {offsets = [0, 128], sizes = [2, 64], strides = [1, 1]} : vector<2x256xf32> to vector<2x64xf32>
    %262 = math.tanh %261 : vector<2x64xf32>
    %263 = vector.extract_strided_slice %260 {offsets = [0, 64], sizes = [2, 64], strides = [1, 1]} : vector<2x256xf32> to vector<2x64xf32>
    %264 = arith.mulf %263, %248 : vector<2x64xf32>
    %265 = vector.extract_strided_slice %260 {offsets = [0, 0], sizes = [2, 64], strides = [1, 1]} : vector<2x256xf32> to vector<2x64xf32>
    %266 = arith.mulf %265, %262 : vector<2x64xf32>
    %267 = arith.addf %264, %266 : vector<2x64xf32>
    %268 = vector.extract_strided_slice %260 {offsets = [0, 192], sizes = [2, 64], strides = [1, 1]} : vector<2x256xf32> to vector<2x64xf32>
    %269 = math.tanh %267 : vector<2x64xf32>
    %270 = arith.mulf %268, %269 : vector<2x64xf32>
    %271 = vector.extract_strided_slice %270 {offsets = [0, 32], sizes = [2, 32], strides = [1, 1]} : vector<2x64xf32> to vector<2x32xf32>
    %272 = vector.extract_strided_slice %198 {offsets = [8, 0], sizes = [2, 256], strides = [1, 1]} : vector<16x256xf32> to vector<2x256xf32>
    %cst_51 = arith.constant dense<0.000000e+00> : vector<2x256xf32>
    %273 = tpu.matmul %270, %189, %cst_51 {dimension_numbers = #tpu.dot_dimension_numbers<[1], [0], [0], [1], [0, 0, 1, 1], [], []>} : vector<2x64xf32>, vector<64x256xf32>, vector<2x256xf32> -> vector<2x256xf32>
    %274 = arith.addf %273, %272 : vector<2x256xf32>
    %275 = arith.negf %274 : vector<2x256xf32>
    %276 = math.exp %275 : vector<2x256xf32>
    %cst_52 = arith.constant 1.000000e+00 : f32
    %277 = vector.broadcast %cst_52 : f32 to vector<2x256xf32>
    %278 = arith.addf %277, %276 : vector<2x256xf32>
    %279 = arith.divf %277, %278 : vector<2x256xf32>
    %280 = vector.extract_strided_slice %274 {offsets = [0, 128], sizes = [2, 64], strides = [1, 1]} : vector<2x256xf32> to vector<2x64xf32>
    %281 = math.tanh %280 : vector<2x64xf32>
    %282 = vector.extract_strided_slice %279 {offsets = [0, 64], sizes = [2, 64], strides = [1, 1]} : vector<2x256xf32> to vector<2x64xf32>
    %283 = arith.mulf %282, %267 : vector<2x64xf32>
    %284 = vector.extract_strided_slice %279 {offsets = [0, 0], sizes = [2, 64], strides = [1, 1]} : vector<2x256xf32> to vector<2x64xf32>
    %285 = arith.mulf %284, %281 : vector<2x64xf32>
    %286 = arith.addf %283, %285 : vector<2x64xf32>
    %287 = vector.extract_strided_slice %279 {offsets = [0, 192], sizes = [2, 64], strides = [1, 1]} : vector<2x256xf32> to vector<2x64xf32>
    %288 = math.tanh %286 : vector<2x64xf32>
    %289 = arith.mulf %287, %288 : vector<2x64xf32>
    %290 = vector.extract_strided_slice %289 {offsets = [0, 32], sizes = [2, 32], strides = [1, 1]} : vector<2x64xf32> to vector<2x32xf32>
    %291 = vector.extract_strided_slice %198 {offsets = [10, 0], sizes = [2, 256], strides = [1, 1]} : vector<16x256xf32> to vector<2x256xf32>
    %cst_53 = arith.constant dense<0.000000e+00> : vector<2x256xf32>
    %292 = tpu.matmul %289, %189, %cst_53 {dimension_numbers = #tpu.dot_dimension_numbers<[1], [0], [0], [1], [0, 0, 1, 1], [], []>} : vector<2x64xf32>, vector<64x256xf32>, vector<2x256xf32> -> vector<2x256xf32>
    %293 = arith.addf %292, %291 : vector<2x256xf32>
    %294 = arith.negf %293 : vector<2x256xf32>
    %295 = math.exp %294 : vector<2x256xf32>
    %cst_54 = arith.constant 1.000000e+00 : f32
    %296 = vector.broadcast %cst_54 : f32 to vector<2x256xf32>
    %297 = arith.addf %296, %295 : vector<2x256xf32>
    %298 = arith.divf %296, %297 : vector<2x256xf32>
    %299 = vector.extract_strided_slice %293 {offsets = [0, 128], sizes = [2, 64], strides = [1, 1]} : vector<2x256xf32> to vector<2x64xf32>
    %300 = math.tanh %299 : vector<2x64xf32>
    %301 = vector.extract_strided_slice %298 {offsets = [0, 64], sizes = [2, 64], strides = [1, 1]} : vector<2x256xf32> to vector<2x64xf32>
    %302 = arith.mulf %301, %286 : vector<2x64xf32>
    %303 = vector.extract_strided_slice %298 {offsets = [0, 0], sizes = [2, 64], strides = [1, 1]} : vector<2x256xf32> to vector<2x64xf32>
    %304 = arith.mulf %303, %300 : vector<2x64xf32>
    %305 = arith.addf %302, %304 : vector<2x64xf32>
    %306 = vector.extract_strided_slice %298 {offsets = [0, 192], sizes = [2, 64], strides = [1, 1]} : vector<2x256xf32> to vector<2x64xf32>
    %307 = math.tanh %305 : vector<2x64xf32>
    %308 = arith.mulf %306, %307 : vector<2x64xf32>
    %309 = vector.extract_strided_slice %308 {offsets = [0, 32], sizes = [2, 32], strides = [1, 1]} : vector<2x64xf32> to vector<2x32xf32>
    %310 = vector.extract_strided_slice %198 {offsets = [12, 0], sizes = [2, 256], strides = [1, 1]} : vector<16x256xf32> to vector<2x256xf32>
    %cst_55 = arith.constant dense<0.000000e+00> : vector<2x256xf32>
    %311 = tpu.matmul %308, %189, %cst_55 {dimension_numbers = #tpu.dot_dimension_numbers<[1], [0], [0], [1], [0, 0, 1, 1], [], []>} : vector<2x64xf32>, vector<64x256xf32>, vector<2x256xf32> -> vector<2x256xf32>
    %312 = arith.addf %311, %310 : vector<2x256xf32>
    %313 = arith.negf %312 : vector<2x256xf32>
    %314 = math.exp %313 : vector<2x256xf32>
    %cst_56 = arith.constant 1.000000e+00 : f32
    %315 = vector.broadcast %cst_56 : f32 to vector<2x256xf32>
    %316 = arith.addf %315, %314 : vector<2x256xf32>
    %317 = arith.divf %315, %316 : vector<2x256xf32>
    %318 = vector.extract_strided_slice %312 {offsets = [0, 128], sizes = [2, 64], strides = [1, 1]} : vector<2x256xf32> to vector<2x64xf32>
    %319 = math.tanh %318 : vector<2x64xf32>
    %320 = vector.extract_strided_slice %317 {offsets = [0, 64], sizes = [2, 64], strides = [1, 1]} : vector<2x256xf32> to vector<2x64xf32>
    %321 = arith.mulf %320, %305 : vector<2x64xf32>
    %322 = vector.extract_strided_slice %317 {offsets = [0, 0], sizes = [2, 64], strides = [1, 1]} : vector<2x256xf32> to vector<2x64xf32>
    %323 = arith.mulf %322, %319 : vector<2x64xf32>
    %324 = arith.addf %321, %323 : vector<2x64xf32>
    %325 = vector.extract_strided_slice %317 {offsets = [0, 192], sizes = [2, 64], strides = [1, 1]} : vector<2x256xf32> to vector<2x64xf32>
    %326 = math.tanh %324 : vector<2x64xf32>
    %327 = arith.mulf %325, %326 : vector<2x64xf32>
    %328 = vector.extract_strided_slice %327 {offsets = [0, 32], sizes = [2, 32], strides = [1, 1]} : vector<2x64xf32> to vector<2x32xf32>
    %329 = vector.extract_strided_slice %198 {offsets = [14, 0], sizes = [2, 256], strides = [1, 1]} : vector<16x256xf32> to vector<2x256xf32>
    %cst_57 = arith.constant dense<0.000000e+00> : vector<2x256xf32>
    %330 = tpu.matmul %327, %189, %cst_57 {dimension_numbers = #tpu.dot_dimension_numbers<[1], [0], [0], [1], [0, 0, 1, 1], [], []>} : vector<2x64xf32>, vector<64x256xf32>, vector<2x256xf32> -> vector<2x256xf32>
    %331 = arith.addf %330, %329 : vector<2x256xf32>
    %332 = arith.negf %331 : vector<2x256xf32>
    %333 = math.exp %332 : vector<2x256xf32>
    %cst_58 = arith.constant 1.000000e+00 : f32
    %334 = vector.broadcast %cst_58 : f32 to vector<2x256xf32>
    %335 = arith.addf %334, %333 : vector<2x256xf32>
    %336 = arith.divf %334, %335 : vector<2x256xf32>
    %337 = vector.extract_strided_slice %331 {offsets = [0, 128], sizes = [2, 64], strides = [1, 1]} : vector<2x256xf32> to vector<2x64xf32>
    %338 = math.tanh %337 : vector<2x64xf32>
    %339 = vector.extract_strided_slice %336 {offsets = [0, 64], sizes = [2, 64], strides = [1, 1]} : vector<2x256xf32> to vector<2x64xf32>
    %340 = arith.mulf %339, %324 : vector<2x64xf32>
    %341 = vector.extract_strided_slice %336 {offsets = [0, 0], sizes = [2, 64], strides = [1, 1]} : vector<2x256xf32> to vector<2x64xf32>
    %342 = arith.mulf %341, %338 : vector<2x64xf32>
    %343 = arith.addf %340, %342 : vector<2x64xf32>
    %344 = vector.extract_strided_slice %336 {offsets = [0, 192], sizes = [2, 64], strides = [1, 1]} : vector<2x256xf32> to vector<2x64xf32>
    %345 = math.tanh %343 : vector<2x64xf32>
    %346 = arith.mulf %344, %345 : vector<2x64xf32>
    %347 = vector.extract_strided_slice %346 {offsets = [0, 32], sizes = [2, 32], strides = [1, 1]} : vector<2x64xf32> to vector<2x32xf32>
    %cst_59 = arith.constant dense<0.000000e+00> : vector<2x256xf32>
    %348 = tpu.matmul %346, %189, %cst_59 {dimension_numbers = #tpu.dot_dimension_numbers<[1], [0], [0], [1], [0, 0, 1, 1], [], []>} : vector<2x64xf32>, vector<64x256xf32>, vector<2x256xf32> -> vector<2x256xf32>
    %349 = vector.broadcast %187 : vector<1x256xf32> to vector<2x256xf32>
    %350 = arith.addf %348, %349 : vector<2x256xf32>
    %351 = arith.negf %350 : vector<2x256xf32>
    %352 = math.exp %351 : vector<2x256xf32>
    %cst_60 = arith.constant 1.000000e+00 : f32
    %353 = vector.broadcast %cst_60 : f32 to vector<2x256xf32>
    %354 = arith.addf %353, %352 : vector<2x256xf32>
    %355 = arith.divf %353, %354 : vector<2x256xf32>
    %356 = vector.extract_strided_slice %350 {offsets = [0, 128], sizes = [2, 64], strides = [1, 1]} : vector<2x256xf32> to vector<2x64xf32>
    %357 = math.tanh %356 : vector<2x64xf32>
    %358 = vector.extract_strided_slice %355 {offsets = [0, 64], sizes = [2, 64], strides = [1, 1]} : vector<2x256xf32> to vector<2x64xf32>
    %359 = arith.mulf %358, %343 : vector<2x64xf32>
    %360 = vector.extract_strided_slice %355 {offsets = [0, 0], sizes = [2, 64], strides = [1, 1]} : vector<2x256xf32> to vector<2x64xf32>
    %361 = arith.mulf %360, %357 : vector<2x64xf32>
    %362 = arith.addf %359, %361 : vector<2x64xf32>
    %363 = vector.extract_strided_slice %355 {offsets = [0, 192], sizes = [2, 64], strides = [1, 1]} : vector<2x256xf32> to vector<2x64xf32>
    %364 = math.tanh %362 : vector<2x64xf32>
    %365 = arith.mulf %363, %364 : vector<2x64xf32>
    %366 = vector.extract_strided_slice %365 {offsets = [0, 32], sizes = [2, 32], strides = [1, 1]} : vector<2x64xf32> to vector<2x32xf32>
    %367 = tpu.concatenate %233, %252, %271, %290, %309, %328, %347, %366 in 0 : vector<2x32xf32>, vector<2x32xf32>, vector<2x32xf32>, vector<2x32xf32>, vector<2x32xf32>, vector<2x32xf32>, vector<2x32xf32>, vector<2x32xf32> -> vector<16x32xf32>
    %c2 = arith.constant 2 : index
    %c0_61 = arith.constant 0 : index
    %c0_62 = arith.constant 0 : index
    %368 = vector.load %arg0[%c2, %c0_61, %c0_62] : memref<4x16x1xf32, #tpu.memory_space<vmem>>, vector<1x16x1xf32>
    %369 = vector.shape_cast %368 : vector<1x16x1xf32> to vector<16x1xf32>
    %c2_63 = arith.constant 2 : index
    %c0_64 = arith.constant 0 : index
    %c0_65 = arith.constant 0 : index
    %370 = vector.load %arg1[%c2_63, %c0_64, %c0_65] : memref<4x1x256xf32, #tpu.memory_space<vmem>>, vector<1x1x256xf32>
    %371 = vector.shape_cast %370 : vector<1x1x256xf32> to vector<1x256xf32>
    %c2_66 = arith.constant 2 : index
    %c0_67 = arith.constant 0 : index
    %c0_68 = arith.constant 0 : index
    %372 = vector.load %arg3[%c2_66, %c0_67, %c0_68] : memref<4x1x256xf32, #tpu.memory_space<vmem>>, vector<1x1x256xf32>
    %373 = vector.shape_cast %372 : vector<1x1x256xf32> to vector<1x256xf32>
    %c2_69 = arith.constant 2 : index
    %c0_70 = arith.constant 0 : index
    %c0_71 = arith.constant 0 : index
    %374 = vector.load %arg4[%c2_69, %c0_70, %c0_71] : memref<4x64x256xf32, #tpu.memory_space<vmem>>, vector<1x64x256xf32>
    %375 = vector.shape_cast %374 : vector<1x64x256xf32> to vector<64x256xf32>
    %c2_72 = arith.constant 2 : index
    %c0_73 = arith.constant 0 : index
    %c0_74 = arith.constant 0 : index
    %376 = vector.load %arg2[%c2_72, %c0_73, %c0_74] : memref<4x32x256xf32, #tpu.memory_space<vmem>>, vector<1x32x256xf32>
    %377 = vector.shape_cast %376 : vector<1x32x256xf32> to vector<32x256xf32>
    %cst_75 = arith.constant dense<0.000000e+00> : vector<16x256xf32>
    %378 = tpu.matmul %367, %377, %cst_75 {dimension_numbers = #tpu.dot_dimension_numbers<[1], [0], [0], [1], [0, 0, 1, 1], [], []>} : vector<16x32xf32>, vector<32x256xf32>, vector<16x256xf32> -> vector<16x256xf32>
    %379 = vector.broadcast %369 : vector<16x1xf32> to vector<16x256xf32>
    %380 = vector.broadcast %371 : vector<1x256xf32> to vector<16x256xf32>
    %381 = arith.mulf %379, %380 : vector<16x256xf32>
    %382 = arith.addf %378, %381 : vector<16x256xf32>
    %383 = vector.broadcast %373 : vector<1x256xf32> to vector<16x256xf32>
    %384 = arith.addf %382, %383 : vector<16x256xf32>
    %385 = vector.extract_strided_slice %384 {offsets = [0, 0], sizes = [2, 256], strides = [1, 1]} : vector<16x256xf32> to vector<2x256xf32>
    %386 = arith.negf %385 : vector<2x256xf32>
    %387 = math.exp %386 : vector<2x256xf32>
    %cst_76 = arith.constant 1.000000e+00 : f32
    %388 = vector.broadcast %cst_76 : f32 to vector<2x256xf32>
    %389 = arith.addf %388, %387 : vector<2x256xf32>
    %390 = arith.divf %388, %389 : vector<2x256xf32>
    %391 = vector.extract_strided_slice %390 {offsets = [0, 0], sizes = [2, 32], strides = [1, 1]} : vector<2x256xf32> to vector<2x32xf32>
    %392 = vector.extract_strided_slice %385 {offsets = [0, 128], sizes = [2, 32], strides = [1, 1]} : vector<2x256xf32> to vector<2x32xf32>
    %393 = math.tanh %392 : vector<2x32xf32>
    %394 = arith.mulf %391, %393 : vector<2x32xf32>
    %395 = vector.extract_strided_slice %390 {offsets = [0, 192], sizes = [2, 32], strides = [1, 1]} : vector<2x256xf32> to vector<2x32xf32>
    %396 = math.tanh %394 : vector<2x32xf32>
    %397 = arith.mulf %395, %396 : vector<2x32xf32>
    %cst_77 = arith.constant 0.000000e+00 : f32
    %398 = vector.broadcast %cst_77 : f32 to vector<2x32xf32>
    %399 = tpu.concatenate %397, %398 in 1 : vector<2x32xf32>, vector<2x32xf32> -> vector<2x64xf32>
    %400 = tpu.concatenate %394, %398 in 1 : vector<2x32xf32>, vector<2x32xf32> -> vector<2x64xf32>
    %401 = vector.extract_strided_slice %384 {offsets = [2, 0], sizes = [2, 256], strides = [1, 1]} : vector<16x256xf32> to vector<2x256xf32>
    %cst_78 = arith.constant dense<0.000000e+00> : vector<2x256xf32>
    %402 = tpu.matmul %399, %375, %cst_78 {dimension_numbers = #tpu.dot_dimension_numbers<[1], [0], [0], [1], [0, 0, 1, 1], [], []>} : vector<2x64xf32>, vector<64x256xf32>, vector<2x256xf32> -> vector<2x256xf32>
    %403 = arith.addf %402, %401 : vector<2x256xf32>
    %404 = arith.negf %403 : vector<2x256xf32>
    %405 = math.exp %404 : vector<2x256xf32>
    %cst_79 = arith.constant 1.000000e+00 : f32
    %406 = vector.broadcast %cst_79 : f32 to vector<2x256xf32>
    %407 = arith.addf %406, %405 : vector<2x256xf32>
    %408 = arith.divf %406, %407 : vector<2x256xf32>
    %409 = vector.extract_strided_slice %403 {offsets = [0, 128], sizes = [2, 64], strides = [1, 1]} : vector<2x256xf32> to vector<2x64xf32>
    %410 = math.tanh %409 : vector<2x64xf32>
    %411 = vector.extract_strided_slice %408 {offsets = [0, 64], sizes = [2, 64], strides = [1, 1]} : vector<2x256xf32> to vector<2x64xf32>
    %412 = arith.mulf %411, %400 : vector<2x64xf32>
    %413 = vector.extract_strided_slice %408 {offsets = [0, 0], sizes = [2, 64], strides = [1, 1]} : vector<2x256xf32> to vector<2x64xf32>
    %414 = arith.mulf %413, %410 : vector<2x64xf32>
    %415 = arith.addf %412, %414 : vector<2x64xf32>
    %416 = vector.extract_strided_slice %408 {offsets = [0, 192], sizes = [2, 64], strides = [1, 1]} : vector<2x256xf32> to vector<2x64xf32>
    %417 = math.tanh %415 : vector<2x64xf32>
    %418 = arith.mulf %416, %417 : vector<2x64xf32>
    %419 = vector.extract_strided_slice %418 {offsets = [0, 32], sizes = [2, 32], strides = [1, 1]} : vector<2x64xf32> to vector<2x32xf32>
    %420 = vector.extract_strided_slice %384 {offsets = [4, 0], sizes = [2, 256], strides = [1, 1]} : vector<16x256xf32> to vector<2x256xf32>
    %cst_80 = arith.constant dense<0.000000e+00> : vector<2x256xf32>
    %421 = tpu.matmul %418, %375, %cst_80 {dimension_numbers = #tpu.dot_dimension_numbers<[1], [0], [0], [1], [0, 0, 1, 1], [], []>} : vector<2x64xf32>, vector<64x256xf32>, vector<2x256xf32> -> vector<2x256xf32>
    %422 = arith.addf %421, %420 : vector<2x256xf32>
    %423 = arith.negf %422 : vector<2x256xf32>
    %424 = math.exp %423 : vector<2x256xf32>
    %cst_81 = arith.constant 1.000000e+00 : f32
    %425 = vector.broadcast %cst_81 : f32 to vector<2x256xf32>
    %426 = arith.addf %425, %424 : vector<2x256xf32>
    %427 = arith.divf %425, %426 : vector<2x256xf32>
    %428 = vector.extract_strided_slice %422 {offsets = [0, 128], sizes = [2, 64], strides = [1, 1]} : vector<2x256xf32> to vector<2x64xf32>
    %429 = math.tanh %428 : vector<2x64xf32>
    %430 = vector.extract_strided_slice %427 {offsets = [0, 64], sizes = [2, 64], strides = [1, 1]} : vector<2x256xf32> to vector<2x64xf32>
    %431 = arith.mulf %430, %415 : vector<2x64xf32>
    %432 = vector.extract_strided_slice %427 {offsets = [0, 0], sizes = [2, 64], strides = [1, 1]} : vector<2x256xf32> to vector<2x64xf32>
    %433 = arith.mulf %432, %429 : vector<2x64xf32>
    %434 = arith.addf %431, %433 : vector<2x64xf32>
    %435 = vector.extract_strided_slice %427 {offsets = [0, 192], sizes = [2, 64], strides = [1, 1]} : vector<2x256xf32> to vector<2x64xf32>
    %436 = math.tanh %434 : vector<2x64xf32>
    %437 = arith.mulf %435, %436 : vector<2x64xf32>
    %438 = vector.extract_strided_slice %437 {offsets = [0, 32], sizes = [2, 32], strides = [1, 1]} : vector<2x64xf32> to vector<2x32xf32>
    %439 = vector.extract_strided_slice %384 {offsets = [6, 0], sizes = [2, 256], strides = [1, 1]} : vector<16x256xf32> to vector<2x256xf32>
    %cst_82 = arith.constant dense<0.000000e+00> : vector<2x256xf32>
    %440 = tpu.matmul %437, %375, %cst_82 {dimension_numbers = #tpu.dot_dimension_numbers<[1], [0], [0], [1], [0, 0, 1, 1], [], []>} : vector<2x64xf32>, vector<64x256xf32>, vector<2x256xf32> -> vector<2x256xf32>
    %441 = arith.addf %440, %439 : vector<2x256xf32>
    %442 = arith.negf %441 : vector<2x256xf32>
    %443 = math.exp %442 : vector<2x256xf32>
    %cst_83 = arith.constant 1.000000e+00 : f32
    %444 = vector.broadcast %cst_83 : f32 to vector<2x256xf32>
    %445 = arith.addf %444, %443 : vector<2x256xf32>
    %446 = arith.divf %444, %445 : vector<2x256xf32>
    %447 = vector.extract_strided_slice %441 {offsets = [0, 128], sizes = [2, 64], strides = [1, 1]} : vector<2x256xf32> to vector<2x64xf32>
    %448 = math.tanh %447 : vector<2x64xf32>
    %449 = vector.extract_strided_slice %446 {offsets = [0, 64], sizes = [2, 64], strides = [1, 1]} : vector<2x256xf32> to vector<2x64xf32>
    %450 = arith.mulf %449, %434 : vector<2x64xf32>
    %451 = vector.extract_strided_slice %446 {offsets = [0, 0], sizes = [2, 64], strides = [1, 1]} : vector<2x256xf32> to vector<2x64xf32>
    %452 = arith.mulf %451, %448 : vector<2x64xf32>
    %453 = arith.addf %450, %452 : vector<2x64xf32>
    %454 = vector.extract_strided_slice %446 {offsets = [0, 192], sizes = [2, 64], strides = [1, 1]} : vector<2x256xf32> to vector<2x64xf32>
    %455 = math.tanh %453 : vector<2x64xf32>
    %456 = arith.mulf %454, %455 : vector<2x64xf32>
    %457 = vector.extract_strided_slice %456 {offsets = [0, 32], sizes = [2, 32], strides = [1, 1]} : vector<2x64xf32> to vector<2x32xf32>
    %458 = vector.extract_strided_slice %384 {offsets = [8, 0], sizes = [2, 256], strides = [1, 1]} : vector<16x256xf32> to vector<2x256xf32>
    %cst_84 = arith.constant dense<0.000000e+00> : vector<2x256xf32>
    %459 = tpu.matmul %456, %375, %cst_84 {dimension_numbers = #tpu.dot_dimension_numbers<[1], [0], [0], [1], [0, 0, 1, 1], [], []>} : vector<2x64xf32>, vector<64x256xf32>, vector<2x256xf32> -> vector<2x256xf32>
    %460 = arith.addf %459, %458 : vector<2x256xf32>
    %461 = arith.negf %460 : vector<2x256xf32>
    %462 = math.exp %461 : vector<2x256xf32>
    %cst_85 = arith.constant 1.000000e+00 : f32
    %463 = vector.broadcast %cst_85 : f32 to vector<2x256xf32>
    %464 = arith.addf %463, %462 : vector<2x256xf32>
    %465 = arith.divf %463, %464 : vector<2x256xf32>
    %466 = vector.extract_strided_slice %460 {offsets = [0, 128], sizes = [2, 64], strides = [1, 1]} : vector<2x256xf32> to vector<2x64xf32>
    %467 = math.tanh %466 : vector<2x64xf32>
    %468 = vector.extract_strided_slice %465 {offsets = [0, 64], sizes = [2, 64], strides = [1, 1]} : vector<2x256xf32> to vector<2x64xf32>
    %469 = arith.mulf %468, %453 : vector<2x64xf32>
    %470 = vector.extract_strided_slice %465 {offsets = [0, 0], sizes = [2, 64], strides = [1, 1]} : vector<2x256xf32> to vector<2x64xf32>
    %471 = arith.mulf %470, %467 : vector<2x64xf32>
    %472 = arith.addf %469, %471 : vector<2x64xf32>
    %473 = vector.extract_strided_slice %465 {offsets = [0, 192], sizes = [2, 64], strides = [1, 1]} : vector<2x256xf32> to vector<2x64xf32>
    %474 = math.tanh %472 : vector<2x64xf32>
    %475 = arith.mulf %473, %474 : vector<2x64xf32>
    %476 = vector.extract_strided_slice %475 {offsets = [0, 32], sizes = [2, 32], strides = [1, 1]} : vector<2x64xf32> to vector<2x32xf32>
    %477 = vector.extract_strided_slice %384 {offsets = [10, 0], sizes = [2, 256], strides = [1, 1]} : vector<16x256xf32> to vector<2x256xf32>
    %cst_86 = arith.constant dense<0.000000e+00> : vector<2x256xf32>
    %478 = tpu.matmul %475, %375, %cst_86 {dimension_numbers = #tpu.dot_dimension_numbers<[1], [0], [0], [1], [0, 0, 1, 1], [], []>} : vector<2x64xf32>, vector<64x256xf32>, vector<2x256xf32> -> vector<2x256xf32>
    %479 = arith.addf %478, %477 : vector<2x256xf32>
    %480 = arith.negf %479 : vector<2x256xf32>
    %481 = math.exp %480 : vector<2x256xf32>
    %cst_87 = arith.constant 1.000000e+00 : f32
    %482 = vector.broadcast %cst_87 : f32 to vector<2x256xf32>
    %483 = arith.addf %482, %481 : vector<2x256xf32>
    %484 = arith.divf %482, %483 : vector<2x256xf32>
    %485 = vector.extract_strided_slice %479 {offsets = [0, 128], sizes = [2, 64], strides = [1, 1]} : vector<2x256xf32> to vector<2x64xf32>
    %486 = math.tanh %485 : vector<2x64xf32>
    %487 = vector.extract_strided_slice %484 {offsets = [0, 64], sizes = [2, 64], strides = [1, 1]} : vector<2x256xf32> to vector<2x64xf32>
    %488 = arith.mulf %487, %472 : vector<2x64xf32>
    %489 = vector.extract_strided_slice %484 {offsets = [0, 0], sizes = [2, 64], strides = [1, 1]} : vector<2x256xf32> to vector<2x64xf32>
    %490 = arith.mulf %489, %486 : vector<2x64xf32>
    %491 = arith.addf %488, %490 : vector<2x64xf32>
    %492 = vector.extract_strided_slice %484 {offsets = [0, 192], sizes = [2, 64], strides = [1, 1]} : vector<2x256xf32> to vector<2x64xf32>
    %493 = math.tanh %491 : vector<2x64xf32>
    %494 = arith.mulf %492, %493 : vector<2x64xf32>
    %495 = vector.extract_strided_slice %494 {offsets = [0, 32], sizes = [2, 32], strides = [1, 1]} : vector<2x64xf32> to vector<2x32xf32>
    %496 = vector.extract_strided_slice %384 {offsets = [12, 0], sizes = [2, 256], strides = [1, 1]} : vector<16x256xf32> to vector<2x256xf32>
    %cst_88 = arith.constant dense<0.000000e+00> : vector<2x256xf32>
    %497 = tpu.matmul %494, %375, %cst_88 {dimension_numbers = #tpu.dot_dimension_numbers<[1], [0], [0], [1], [0, 0, 1, 1], [], []>} : vector<2x64xf32>, vector<64x256xf32>, vector<2x256xf32> -> vector<2x256xf32>
    %498 = arith.addf %497, %496 : vector<2x256xf32>
    %499 = arith.negf %498 : vector<2x256xf32>
    %500 = math.exp %499 : vector<2x256xf32>
    %cst_89 = arith.constant 1.000000e+00 : f32
    %501 = vector.broadcast %cst_89 : f32 to vector<2x256xf32>
    %502 = arith.addf %501, %500 : vector<2x256xf32>
    %503 = arith.divf %501, %502 : vector<2x256xf32>
    %504 = vector.extract_strided_slice %498 {offsets = [0, 128], sizes = [2, 64], strides = [1, 1]} : vector<2x256xf32> to vector<2x64xf32>
    %505 = math.tanh %504 : vector<2x64xf32>
    %506 = vector.extract_strided_slice %503 {offsets = [0, 64], sizes = [2, 64], strides = [1, 1]} : vector<2x256xf32> to vector<2x64xf32>
    %507 = arith.mulf %506, %491 : vector<2x64xf32>
    %508 = vector.extract_strided_slice %503 {offsets = [0, 0], sizes = [2, 64], strides = [1, 1]} : vector<2x256xf32> to vector<2x64xf32>
    %509 = arith.mulf %508, %505 : vector<2x64xf32>
    %510 = arith.addf %507, %509 : vector<2x64xf32>
    %511 = vector.extract_strided_slice %503 {offsets = [0, 192], sizes = [2, 64], strides = [1, 1]} : vector<2x256xf32> to vector<2x64xf32>
    %512 = math.tanh %510 : vector<2x64xf32>
    %513 = arith.mulf %511, %512 : vector<2x64xf32>
    %514 = vector.extract_strided_slice %513 {offsets = [0, 32], sizes = [2, 32], strides = [1, 1]} : vector<2x64xf32> to vector<2x32xf32>
    %515 = vector.extract_strided_slice %384 {offsets = [14, 0], sizes = [2, 256], strides = [1, 1]} : vector<16x256xf32> to vector<2x256xf32>
    %cst_90 = arith.constant dense<0.000000e+00> : vector<2x256xf32>
    %516 = tpu.matmul %513, %375, %cst_90 {dimension_numbers = #tpu.dot_dimension_numbers<[1], [0], [0], [1], [0, 0, 1, 1], [], []>} : vector<2x64xf32>, vector<64x256xf32>, vector<2x256xf32> -> vector<2x256xf32>
    %517 = arith.addf %516, %515 : vector<2x256xf32>
    %518 = arith.negf %517 : vector<2x256xf32>
    %519 = math.exp %518 : vector<2x256xf32>
    %cst_91 = arith.constant 1.000000e+00 : f32
    %520 = vector.broadcast %cst_91 : f32 to vector<2x256xf32>
    %521 = arith.addf %520, %519 : vector<2x256xf32>
    %522 = arith.divf %520, %521 : vector<2x256xf32>
    %523 = vector.extract_strided_slice %517 {offsets = [0, 128], sizes = [2, 64], strides = [1, 1]} : vector<2x256xf32> to vector<2x64xf32>
    %524 = math.tanh %523 : vector<2x64xf32>
    %525 = vector.extract_strided_slice %522 {offsets = [0, 64], sizes = [2, 64], strides = [1, 1]} : vector<2x256xf32> to vector<2x64xf32>
    %526 = arith.mulf %525, %510 : vector<2x64xf32>
    %527 = vector.extract_strided_slice %522 {offsets = [0, 0], sizes = [2, 64], strides = [1, 1]} : vector<2x256xf32> to vector<2x64xf32>
    %528 = arith.mulf %527, %524 : vector<2x64xf32>
    %529 = arith.addf %526, %528 : vector<2x64xf32>
    %530 = vector.extract_strided_slice %522 {offsets = [0, 192], sizes = [2, 64], strides = [1, 1]} : vector<2x256xf32> to vector<2x64xf32>
    %531 = math.tanh %529 : vector<2x64xf32>
    %532 = arith.mulf %530, %531 : vector<2x64xf32>
    %533 = vector.extract_strided_slice %532 {offsets = [0, 32], sizes = [2, 32], strides = [1, 1]} : vector<2x64xf32> to vector<2x32xf32>
    %cst_92 = arith.constant dense<0.000000e+00> : vector<2x256xf32>
    %534 = tpu.matmul %532, %375, %cst_92 {dimension_numbers = #tpu.dot_dimension_numbers<[1], [0], [0], [1], [0, 0, 1, 1], [], []>} : vector<2x64xf32>, vector<64x256xf32>, vector<2x256xf32> -> vector<2x256xf32>
    %535 = vector.broadcast %373 : vector<1x256xf32> to vector<2x256xf32>
    %536 = arith.addf %534, %535 : vector<2x256xf32>
    %537 = arith.negf %536 : vector<2x256xf32>
    %538 = math.exp %537 : vector<2x256xf32>
    %cst_93 = arith.constant 1.000000e+00 : f32
    %539 = vector.broadcast %cst_93 : f32 to vector<2x256xf32>
    %540 = arith.addf %539, %538 : vector<2x256xf32>
    %541 = arith.divf %539, %540 : vector<2x256xf32>
    %542 = vector.extract_strided_slice %536 {offsets = [0, 128], sizes = [2, 64], strides = [1, 1]} : vector<2x256xf32> to vector<2x64xf32>
    %543 = math.tanh %542 : vector<2x64xf32>
    %544 = vector.extract_strided_slice %541 {offsets = [0, 64], sizes = [2, 64], strides = [1, 1]} : vector<2x256xf32> to vector<2x64xf32>
    %545 = arith.mulf %544, %529 : vector<2x64xf32>
    %546 = vector.extract_strided_slice %541 {offsets = [0, 0], sizes = [2, 64], strides = [1, 1]} : vector<2x256xf32> to vector<2x64xf32>
    %547 = arith.mulf %546, %543 : vector<2x64xf32>
    %548 = arith.addf %545, %547 : vector<2x64xf32>
    %549 = vector.extract_strided_slice %541 {offsets = [0, 192], sizes = [2, 64], strides = [1, 1]} : vector<2x256xf32> to vector<2x64xf32>
    %550 = math.tanh %548 : vector<2x64xf32>
    %551 = arith.mulf %549, %550 : vector<2x64xf32>
    %552 = vector.extract_strided_slice %551 {offsets = [0, 32], sizes = [2, 32], strides = [1, 1]} : vector<2x64xf32> to vector<2x32xf32>
    %553 = tpu.concatenate %419, %438, %457, %476, %495, %514, %533, %552 in 0 : vector<2x32xf32>, vector<2x32xf32>, vector<2x32xf32>, vector<2x32xf32>, vector<2x32xf32>, vector<2x32xf32>, vector<2x32xf32>, vector<2x32xf32> -> vector<16x32xf32>
    %c3 = arith.constant 3 : index
    %c0_94 = arith.constant 0 : index
    %c0_95 = arith.constant 0 : index
    %554 = vector.load %arg0[%c3, %c0_94, %c0_95] : memref<4x16x1xf32, #tpu.memory_space<vmem>>, vector<1x16x1xf32>
    %555 = vector.shape_cast %554 : vector<1x16x1xf32> to vector<16x1xf32>
    %c3_96 = arith.constant 3 : index
    %c0_97 = arith.constant 0 : index
    %c0_98 = arith.constant 0 : index
    %556 = vector.load %arg1[%c3_96, %c0_97, %c0_98] : memref<4x1x256xf32, #tpu.memory_space<vmem>>, vector<1x1x256xf32>
    %557 = vector.shape_cast %556 : vector<1x1x256xf32> to vector<1x256xf32>
    %c3_99 = arith.constant 3 : index
    %c0_100 = arith.constant 0 : index
    %c0_101 = arith.constant 0 : index
    %558 = vector.load %arg3[%c3_99, %c0_100, %c0_101] : memref<4x1x256xf32, #tpu.memory_space<vmem>>, vector<1x1x256xf32>
    %559 = vector.shape_cast %558 : vector<1x1x256xf32> to vector<1x256xf32>
    %c3_102 = arith.constant 3 : index
    %c0_103 = arith.constant 0 : index
    %c0_104 = arith.constant 0 : index
    %560 = vector.load %arg4[%c3_102, %c0_103, %c0_104] : memref<4x64x256xf32, #tpu.memory_space<vmem>>, vector<1x64x256xf32>
    %561 = vector.shape_cast %560 : vector<1x64x256xf32> to vector<64x256xf32>
    %c3_105 = arith.constant 3 : index
    %c0_106 = arith.constant 0 : index
    %c0_107 = arith.constant 0 : index
    %562 = vector.load %arg2[%c3_105, %c0_106, %c0_107] : memref<4x32x256xf32, #tpu.memory_space<vmem>>, vector<1x32x256xf32>
    %563 = vector.shape_cast %562 : vector<1x32x256xf32> to vector<32x256xf32>
    %cst_108 = arith.constant dense<0.000000e+00> : vector<16x256xf32>
    %564 = tpu.matmul %553, %563, %cst_108 {dimension_numbers = #tpu.dot_dimension_numbers<[1], [0], [0], [1], [0, 0, 1, 1], [], []>} : vector<16x32xf32>, vector<32x256xf32>, vector<16x256xf32> -> vector<16x256xf32>
    %565 = vector.broadcast %555 : vector<16x1xf32> to vector<16x256xf32>
    %566 = vector.broadcast %557 : vector<1x256xf32> to vector<16x256xf32>
    %567 = arith.mulf %565, %566 : vector<16x256xf32>
    %568 = arith.addf %564, %567 : vector<16x256xf32>
    %569 = vector.broadcast %559 : vector<1x256xf32> to vector<16x256xf32>
    %570 = arith.addf %568, %569 : vector<16x256xf32>
    %571 = vector.extract_strided_slice %570 {offsets = [0, 0], sizes = [2, 256], strides = [1, 1]} : vector<16x256xf32> to vector<2x256xf32>
    %572 = arith.negf %571 : vector<2x256xf32>
    %573 = math.exp %572 : vector<2x256xf32>
    %cst_109 = arith.constant 1.000000e+00 : f32
    %574 = vector.broadcast %cst_109 : f32 to vector<2x256xf32>
    %575 = arith.addf %574, %573 : vector<2x256xf32>
    %576 = arith.divf %574, %575 : vector<2x256xf32>
    %577 = vector.extract_strided_slice %576 {offsets = [0, 0], sizes = [2, 32], strides = [1, 1]} : vector<2x256xf32> to vector<2x32xf32>
    %578 = vector.extract_strided_slice %571 {offsets = [0, 128], sizes = [2, 32], strides = [1, 1]} : vector<2x256xf32> to vector<2x32xf32>
    %579 = math.tanh %578 : vector<2x32xf32>
    %580 = arith.mulf %577, %579 : vector<2x32xf32>
    %581 = vector.extract_strided_slice %576 {offsets = [0, 192], sizes = [2, 32], strides = [1, 1]} : vector<2x256xf32> to vector<2x32xf32>
    %582 = math.tanh %580 : vector<2x32xf32>
    %583 = arith.mulf %581, %582 : vector<2x32xf32>
    %cst_110 = arith.constant 0.000000e+00 : f32
    %584 = vector.broadcast %cst_110 : f32 to vector<2x32xf32>
    %585 = tpu.concatenate %583, %584 in 1 : vector<2x32xf32>, vector<2x32xf32> -> vector<2x64xf32>
    %586 = tpu.concatenate %580, %584 in 1 : vector<2x32xf32>, vector<2x32xf32> -> vector<2x64xf32>
    %587 = vector.extract_strided_slice %570 {offsets = [2, 0], sizes = [2, 256], strides = [1, 1]} : vector<16x256xf32> to vector<2x256xf32>
    %cst_111 = arith.constant dense<0.000000e+00> : vector<2x256xf32>
    %588 = tpu.matmul %585, %561, %cst_111 {dimension_numbers = #tpu.dot_dimension_numbers<[1], [0], [0], [1], [0, 0, 1, 1], [], []>} : vector<2x64xf32>, vector<64x256xf32>, vector<2x256xf32> -> vector<2x256xf32>
    %589 = arith.addf %588, %587 : vector<2x256xf32>
    %590 = arith.negf %589 : vector<2x256xf32>
    %591 = math.exp %590 : vector<2x256xf32>
    %cst_112 = arith.constant 1.000000e+00 : f32
    %592 = vector.broadcast %cst_112 : f32 to vector<2x256xf32>
    %593 = arith.addf %592, %591 : vector<2x256xf32>
    %594 = arith.divf %592, %593 : vector<2x256xf32>
    %595 = vector.extract_strided_slice %589 {offsets = [0, 128], sizes = [2, 64], strides = [1, 1]} : vector<2x256xf32> to vector<2x64xf32>
    %596 = math.tanh %595 : vector<2x64xf32>
    %597 = vector.extract_strided_slice %594 {offsets = [0, 64], sizes = [2, 64], strides = [1, 1]} : vector<2x256xf32> to vector<2x64xf32>
    %598 = arith.mulf %597, %586 : vector<2x64xf32>
    %599 = vector.extract_strided_slice %594 {offsets = [0, 0], sizes = [2, 64], strides = [1, 1]} : vector<2x256xf32> to vector<2x64xf32>
    %600 = arith.mulf %599, %596 : vector<2x64xf32>
    %601 = arith.addf %598, %600 : vector<2x64xf32>
    %602 = vector.extract_strided_slice %594 {offsets = [0, 192], sizes = [2, 64], strides = [1, 1]} : vector<2x256xf32> to vector<2x64xf32>
    %603 = math.tanh %601 : vector<2x64xf32>
    %604 = arith.mulf %602, %603 : vector<2x64xf32>
    %605 = vector.extract_strided_slice %604 {offsets = [0, 32], sizes = [2, 32], strides = [1, 1]} : vector<2x64xf32> to vector<2x32xf32>
    %606 = vector.extract_strided_slice %570 {offsets = [4, 0], sizes = [2, 256], strides = [1, 1]} : vector<16x256xf32> to vector<2x256xf32>
    %cst_113 = arith.constant dense<0.000000e+00> : vector<2x256xf32>
    %607 = tpu.matmul %604, %561, %cst_113 {dimension_numbers = #tpu.dot_dimension_numbers<[1], [0], [0], [1], [0, 0, 1, 1], [], []>} : vector<2x64xf32>, vector<64x256xf32>, vector<2x256xf32> -> vector<2x256xf32>
    %608 = arith.addf %607, %606 : vector<2x256xf32>
    %609 = arith.negf %608 : vector<2x256xf32>
    %610 = math.exp %609 : vector<2x256xf32>
    %cst_114 = arith.constant 1.000000e+00 : f32
    %611 = vector.broadcast %cst_114 : f32 to vector<2x256xf32>
    %612 = arith.addf %611, %610 : vector<2x256xf32>
    %613 = arith.divf %611, %612 : vector<2x256xf32>
    %614 = vector.extract_strided_slice %608 {offsets = [0, 128], sizes = [2, 64], strides = [1, 1]} : vector<2x256xf32> to vector<2x64xf32>
    %615 = math.tanh %614 : vector<2x64xf32>
    %616 = vector.extract_strided_slice %613 {offsets = [0, 64], sizes = [2, 64], strides = [1, 1]} : vector<2x256xf32> to vector<2x64xf32>
    %617 = arith.mulf %616, %601 : vector<2x64xf32>
    %618 = vector.extract_strided_slice %613 {offsets = [0, 0], sizes = [2, 64], strides = [1, 1]} : vector<2x256xf32> to vector<2x64xf32>
    %619 = arith.mulf %618, %615 : vector<2x64xf32>
    %620 = arith.addf %617, %619 : vector<2x64xf32>
    %621 = vector.extract_strided_slice %613 {offsets = [0, 192], sizes = [2, 64], strides = [1, 1]} : vector<2x256xf32> to vector<2x64xf32>
    %622 = math.tanh %620 : vector<2x64xf32>
    %623 = arith.mulf %621, %622 : vector<2x64xf32>
    %624 = vector.extract_strided_slice %623 {offsets = [0, 32], sizes = [2, 32], strides = [1, 1]} : vector<2x64xf32> to vector<2x32xf32>
    %625 = vector.extract_strided_slice %570 {offsets = [6, 0], sizes = [2, 256], strides = [1, 1]} : vector<16x256xf32> to vector<2x256xf32>
    %cst_115 = arith.constant dense<0.000000e+00> : vector<2x256xf32>
    %626 = tpu.matmul %623, %561, %cst_115 {dimension_numbers = #tpu.dot_dimension_numbers<[1], [0], [0], [1], [0, 0, 1, 1], [], []>} : vector<2x64xf32>, vector<64x256xf32>, vector<2x256xf32> -> vector<2x256xf32>
    %627 = arith.addf %626, %625 : vector<2x256xf32>
    %628 = arith.negf %627 : vector<2x256xf32>
    %629 = math.exp %628 : vector<2x256xf32>
    %cst_116 = arith.constant 1.000000e+00 : f32
    %630 = vector.broadcast %cst_116 : f32 to vector<2x256xf32>
    %631 = arith.addf %630, %629 : vector<2x256xf32>
    %632 = arith.divf %630, %631 : vector<2x256xf32>
    %633 = vector.extract_strided_slice %627 {offsets = [0, 128], sizes = [2, 64], strides = [1, 1]} : vector<2x256xf32> to vector<2x64xf32>
    %634 = math.tanh %633 : vector<2x64xf32>
    %635 = vector.extract_strided_slice %632 {offsets = [0, 64], sizes = [2, 64], strides = [1, 1]} : vector<2x256xf32> to vector<2x64xf32>
    %636 = arith.mulf %635, %620 : vector<2x64xf32>
    %637 = vector.extract_strided_slice %632 {offsets = [0, 0], sizes = [2, 64], strides = [1, 1]} : vector<2x256xf32> to vector<2x64xf32>
    %638 = arith.mulf %637, %634 : vector<2x64xf32>
    %639 = arith.addf %636, %638 : vector<2x64xf32>
    %640 = vector.extract_strided_slice %632 {offsets = [0, 192], sizes = [2, 64], strides = [1, 1]} : vector<2x256xf32> to vector<2x64xf32>
    %641 = math.tanh %639 : vector<2x64xf32>
    %642 = arith.mulf %640, %641 : vector<2x64xf32>
    %643 = vector.extract_strided_slice %642 {offsets = [0, 32], sizes = [2, 32], strides = [1, 1]} : vector<2x64xf32> to vector<2x32xf32>
    %644 = vector.extract_strided_slice %570 {offsets = [8, 0], sizes = [2, 256], strides = [1, 1]} : vector<16x256xf32> to vector<2x256xf32>
    %cst_117 = arith.constant dense<0.000000e+00> : vector<2x256xf32>
    %645 = tpu.matmul %642, %561, %cst_117 {dimension_numbers = #tpu.dot_dimension_numbers<[1], [0], [0], [1], [0, 0, 1, 1], [], []>} : vector<2x64xf32>, vector<64x256xf32>, vector<2x256xf32> -> vector<2x256xf32>
    %646 = arith.addf %645, %644 : vector<2x256xf32>
    %647 = arith.negf %646 : vector<2x256xf32>
    %648 = math.exp %647 : vector<2x256xf32>
    %cst_118 = arith.constant 1.000000e+00 : f32
    %649 = vector.broadcast %cst_118 : f32 to vector<2x256xf32>
    %650 = arith.addf %649, %648 : vector<2x256xf32>
    %651 = arith.divf %649, %650 : vector<2x256xf32>
    %652 = vector.extract_strided_slice %646 {offsets = [0, 128], sizes = [2, 64], strides = [1, 1]} : vector<2x256xf32> to vector<2x64xf32>
    %653 = math.tanh %652 : vector<2x64xf32>
    %654 = vector.extract_strided_slice %651 {offsets = [0, 64], sizes = [2, 64], strides = [1, 1]} : vector<2x256xf32> to vector<2x64xf32>
    %655 = arith.mulf %654, %639 : vector<2x64xf32>
    %656 = vector.extract_strided_slice %651 {offsets = [0, 0], sizes = [2, 64], strides = [1, 1]} : vector<2x256xf32> to vector<2x64xf32>
    %657 = arith.mulf %656, %653 : vector<2x64xf32>
    %658 = arith.addf %655, %657 : vector<2x64xf32>
    %659 = vector.extract_strided_slice %651 {offsets = [0, 192], sizes = [2, 64], strides = [1, 1]} : vector<2x256xf32> to vector<2x64xf32>
    %660 = math.tanh %658 : vector<2x64xf32>
    %661 = arith.mulf %659, %660 : vector<2x64xf32>
    %662 = vector.extract_strided_slice %661 {offsets = [0, 32], sizes = [2, 32], strides = [1, 1]} : vector<2x64xf32> to vector<2x32xf32>
    %663 = vector.extract_strided_slice %570 {offsets = [10, 0], sizes = [2, 256], strides = [1, 1]} : vector<16x256xf32> to vector<2x256xf32>
    %cst_119 = arith.constant dense<0.000000e+00> : vector<2x256xf32>
    %664 = tpu.matmul %661, %561, %cst_119 {dimension_numbers = #tpu.dot_dimension_numbers<[1], [0], [0], [1], [0, 0, 1, 1], [], []>} : vector<2x64xf32>, vector<64x256xf32>, vector<2x256xf32> -> vector<2x256xf32>
    %665 = arith.addf %664, %663 : vector<2x256xf32>
    %666 = arith.negf %665 : vector<2x256xf32>
    %667 = math.exp %666 : vector<2x256xf32>
    %cst_120 = arith.constant 1.000000e+00 : f32
    %668 = vector.broadcast %cst_120 : f32 to vector<2x256xf32>
    %669 = arith.addf %668, %667 : vector<2x256xf32>
    %670 = arith.divf %668, %669 : vector<2x256xf32>
    %671 = vector.extract_strided_slice %665 {offsets = [0, 128], sizes = [2, 64], strides = [1, 1]} : vector<2x256xf32> to vector<2x64xf32>
    %672 = math.tanh %671 : vector<2x64xf32>
    %673 = vector.extract_strided_slice %670 {offsets = [0, 64], sizes = [2, 64], strides = [1, 1]} : vector<2x256xf32> to vector<2x64xf32>
    %674 = arith.mulf %673, %658 : vector<2x64xf32>
    %675 = vector.extract_strided_slice %670 {offsets = [0, 0], sizes = [2, 64], strides = [1, 1]} : vector<2x256xf32> to vector<2x64xf32>
    %676 = arith.mulf %675, %672 : vector<2x64xf32>
    %677 = arith.addf %674, %676 : vector<2x64xf32>
    %678 = vector.extract_strided_slice %670 {offsets = [0, 192], sizes = [2, 64], strides = [1, 1]} : vector<2x256xf32> to vector<2x64xf32>
    %679 = math.tanh %677 : vector<2x64xf32>
    %680 = arith.mulf %678, %679 : vector<2x64xf32>
    %681 = vector.extract_strided_slice %680 {offsets = [0, 32], sizes = [2, 32], strides = [1, 1]} : vector<2x64xf32> to vector<2x32xf32>
    %682 = vector.extract_strided_slice %570 {offsets = [12, 0], sizes = [2, 256], strides = [1, 1]} : vector<16x256xf32> to vector<2x256xf32>
    %cst_121 = arith.constant dense<0.000000e+00> : vector<2x256xf32>
    %683 = tpu.matmul %680, %561, %cst_121 {dimension_numbers = #tpu.dot_dimension_numbers<[1], [0], [0], [1], [0, 0, 1, 1], [], []>} : vector<2x64xf32>, vector<64x256xf32>, vector<2x256xf32> -> vector<2x256xf32>
    %684 = arith.addf %683, %682 : vector<2x256xf32>
    %685 = arith.negf %684 : vector<2x256xf32>
    %686 = math.exp %685 : vector<2x256xf32>
    %cst_122 = arith.constant 1.000000e+00 : f32
    %687 = vector.broadcast %cst_122 : f32 to vector<2x256xf32>
    %688 = arith.addf %687, %686 : vector<2x256xf32>
    %689 = arith.divf %687, %688 : vector<2x256xf32>
    %690 = vector.extract_strided_slice %684 {offsets = [0, 128], sizes = [2, 64], strides = [1, 1]} : vector<2x256xf32> to vector<2x64xf32>
    %691 = math.tanh %690 : vector<2x64xf32>
    %692 = vector.extract_strided_slice %689 {offsets = [0, 64], sizes = [2, 64], strides = [1, 1]} : vector<2x256xf32> to vector<2x64xf32>
    %693 = arith.mulf %692, %677 : vector<2x64xf32>
    %694 = vector.extract_strided_slice %689 {offsets = [0, 0], sizes = [2, 64], strides = [1, 1]} : vector<2x256xf32> to vector<2x64xf32>
    %695 = arith.mulf %694, %691 : vector<2x64xf32>
    %696 = arith.addf %693, %695 : vector<2x64xf32>
    %697 = vector.extract_strided_slice %689 {offsets = [0, 192], sizes = [2, 64], strides = [1, 1]} : vector<2x256xf32> to vector<2x64xf32>
    %698 = math.tanh %696 : vector<2x64xf32>
    %699 = arith.mulf %697, %698 : vector<2x64xf32>
    %700 = vector.extract_strided_slice %699 {offsets = [0, 32], sizes = [2, 32], strides = [1, 1]} : vector<2x64xf32> to vector<2x32xf32>
    %701 = vector.extract_strided_slice %570 {offsets = [14, 0], sizes = [2, 256], strides = [1, 1]} : vector<16x256xf32> to vector<2x256xf32>
    %cst_123 = arith.constant dense<0.000000e+00> : vector<2x256xf32>
    %702 = tpu.matmul %699, %561, %cst_123 {dimension_numbers = #tpu.dot_dimension_numbers<[1], [0], [0], [1], [0, 0, 1, 1], [], []>} : vector<2x64xf32>, vector<64x256xf32>, vector<2x256xf32> -> vector<2x256xf32>
    %703 = arith.addf %702, %701 : vector<2x256xf32>
    %704 = arith.negf %703 : vector<2x256xf32>
    %705 = math.exp %704 : vector<2x256xf32>
    %cst_124 = arith.constant 1.000000e+00 : f32
    %706 = vector.broadcast %cst_124 : f32 to vector<2x256xf32>
    %707 = arith.addf %706, %705 : vector<2x256xf32>
    %708 = arith.divf %706, %707 : vector<2x256xf32>
    %709 = vector.extract_strided_slice %703 {offsets = [0, 128], sizes = [2, 64], strides = [1, 1]} : vector<2x256xf32> to vector<2x64xf32>
    %710 = math.tanh %709 : vector<2x64xf32>
    %711 = vector.extract_strided_slice %708 {offsets = [0, 64], sizes = [2, 64], strides = [1, 1]} : vector<2x256xf32> to vector<2x64xf32>
    %712 = arith.mulf %711, %696 : vector<2x64xf32>
    %713 = vector.extract_strided_slice %708 {offsets = [0, 0], sizes = [2, 64], strides = [1, 1]} : vector<2x256xf32> to vector<2x64xf32>
    %714 = arith.mulf %713, %710 : vector<2x64xf32>
    %715 = arith.addf %712, %714 : vector<2x64xf32>
    %716 = vector.extract_strided_slice %708 {offsets = [0, 192], sizes = [2, 64], strides = [1, 1]} : vector<2x256xf32> to vector<2x64xf32>
    %717 = math.tanh %715 : vector<2x64xf32>
    %718 = arith.mulf %716, %717 : vector<2x64xf32>
    %719 = vector.extract_strided_slice %718 {offsets = [0, 32], sizes = [2, 32], strides = [1, 1]} : vector<2x64xf32> to vector<2x32xf32>
    %cst_125 = arith.constant dense<0.000000e+00> : vector<2x256xf32>
    %720 = tpu.matmul %718, %561, %cst_125 {dimension_numbers = #tpu.dot_dimension_numbers<[1], [0], [0], [1], [0, 0, 1, 1], [], []>} : vector<2x64xf32>, vector<64x256xf32>, vector<2x256xf32> -> vector<2x256xf32>
    %721 = vector.broadcast %559 : vector<1x256xf32> to vector<2x256xf32>
    %722 = arith.addf %720, %721 : vector<2x256xf32>
    %723 = arith.negf %722 : vector<2x256xf32>
    %724 = math.exp %723 : vector<2x256xf32>
    %cst_126 = arith.constant 1.000000e+00 : f32
    %725 = vector.broadcast %cst_126 : f32 to vector<2x256xf32>
    %726 = arith.addf %725, %724 : vector<2x256xf32>
    %727 = arith.divf %725, %726 : vector<2x256xf32>
    %728 = vector.extract_strided_slice %722 {offsets = [0, 128], sizes = [2, 64], strides = [1, 1]} : vector<2x256xf32> to vector<2x64xf32>
    %729 = math.tanh %728 : vector<2x64xf32>
    %730 = vector.extract_strided_slice %727 {offsets = [0, 64], sizes = [2, 64], strides = [1, 1]} : vector<2x256xf32> to vector<2x64xf32>
    %731 = arith.mulf %730, %715 : vector<2x64xf32>
    %732 = vector.extract_strided_slice %727 {offsets = [0, 0], sizes = [2, 64], strides = [1, 1]} : vector<2x256xf32> to vector<2x64xf32>
    %733 = arith.mulf %732, %729 : vector<2x64xf32>
    %734 = arith.addf %731, %733 : vector<2x64xf32>
    %735 = vector.extract_strided_slice %727 {offsets = [0, 192], sizes = [2, 64], strides = [1, 1]} : vector<2x256xf32> to vector<2x64xf32>
    %736 = math.tanh %734 : vector<2x64xf32>
    %737 = arith.mulf %735, %736 : vector<2x64xf32>
    %738 = vector.extract_strided_slice %737 {offsets = [0, 32], sizes = [2, 32], strides = [1, 1]} : vector<2x64xf32> to vector<2x32xf32>
    %739 = tpu.concatenate %605, %624, %643, %662, %681, %700, %719, %738 in 0 : vector<2x32xf32>, vector<2x32xf32>, vector<2x32xf32>, vector<2x32xf32>, vector<2x32xf32>, vector<2x32xf32>, vector<2x32xf32>, vector<2x32xf32> -> vector<16x32xf32>
    %740 = tpu.concatenate %181, %367, %553, %739 in 1 : vector<16x32xf32>, vector<16x32xf32>, vector<16x32xf32>, vector<16x32xf32> -> vector<16x128xf32>
    %c0_127 = arith.constant 0 : index
    %c0_128 = arith.constant 0 : index
    %741 = vector.load %arg5[%c0_127, %c0_128] : memref<128x4xf32, #tpu.memory_space<vmem>>, vector<128x4xf32>
    %cst_129 = arith.constant dense<0.000000e+00> : vector<16x4xf32>
    %742 = tpu.matmul %740, %741, %cst_129 {dimension_numbers = #tpu.dot_dimension_numbers<[1], [0], [0], [1], [0, 0, 1, 1], [], []>} : vector<16x128xf32>, vector<128x4xf32>, vector<16x4xf32> -> vector<16x4xf32>
    %c0_130 = arith.constant 0 : index
    %c0_131 = arith.constant 0 : index
    %743 = vector.load %arg6[%c0_130, %c0_131] : memref<1x4xf32, #tpu.memory_space<vmem>>, vector<1x4xf32>
    %744 = vector.broadcast %743 : vector<1x4xf32> to vector<16x4xf32>
    %745 = arith.addf %742, %744 : vector<16x4xf32>
    %c0_132 = arith.constant 0 : index
    %c0_133 = arith.constant 0 : index
    %746 = vector.load %arg7[%c0_132, %c0_133] : memref<16x4xf32, #tpu.memory_space<vmem>>, vector<16x4xf32>
    tpu.vector_store %arg7[%c0_132, %c0_133], %745 {strides = array<i32>} : memref<16x4xf32, #tpu.memory_space<vmem>>, vector<16x4xf32>,
    return
  }
}

</mosaic_0001>

<bundles_post_ra>
// kernel: tpu_custom_call.1
= control target key start
LH: loop header
LB: loop body
LE: loop exit
PB: predicated region body
PF: predicated region fallthrough
CT: control target
= control target key end

     0   :  { %12 = vsyncpa [#allocation3], 0  ;;  %s6432_s0 = inlined_call_operand.vmem [shape: f32[4,16,1], index: 0, kind: input, shape index: {}]   ;;  %s6433_s1 = inlined_call_operand.vmem [shape: f32[4,1,256], index: 1, kind: input, shape index: {}]   ;;  %s6434_s2 = inlined_call_operand.hbm [shape: f32[4,32,256], index: 2, kind: input, shape index: {}]   ;;  %s6435_s3 = inlined_call_operand.vmem [shape: f32[4,1,256], index: 3, kind: input, shape index: {}]   ;;  %s6436_s4 = inlined_call_operand.hbm [shape: f32[4,64,256], index: 4, kind: input, shape index: {}]   ;;  %s6437_s5 = inlined_call_operand.vmem [shape: f32[128,4], index: 5, kind: input, shape index: {}]   ;;  %s6438_s6 = inlined_call_operand.vmem [shape: f32[1,4], index: 6, kind: input, shape index: {}]   ;;  %s6439_s7 = inlined_call_operand.vmem [shape: f32[16,4], index: 7, kind: output, shape index: {}]  }
   0x1   :  { %13 = vsyncpa [#allocation5], 0  ;;  %s5407_s24 = smov [#allocation2]   ;;  %s5359_s28 = scalar_lea.hbm %s6434_s2, 4096 }
   0x2   :  { %s23_s25 = sshll.u32 %s5407_s24, 4  ;;  %p5360_p0 = scmp.ne.s32.totalorder %s6434_s2, %s5359_s28  ;;  %s24_s25 = int_to_ptr.vmem [resolvable:$true] %s23_s25 }
   0x3   :  { %p5363_p1 = scmp.lt.u32.totalorder %s5359_s28, %s6434_s2 }
   0x5   :  { %p5365_p2 = pnand %p5363_p1, %p5360_p0 }
   0x7   :  { %5368 = shalt.err (!%p5365_p2)
}
   0x8   :  { %s5369_s10 = scalar_lea.vmem %s24_s25, 4096  ;;  %p5374_p4 = scmp.lt.s32.totalorder %s24_s25, %s24_s25 }
   0x9   :  { %p5370_p3 = scmp.ne.s32.totalorder %s24_s25, %s5369_s10  ;;  %p5375_p5 = scmp.lt.s32.totalorder %s5369_s10, %s5369_s10 }
   0xb   :  { %p5376_p6 = por %p5375_p5, %p5374_p4 }
   0xd   :  { %p5377_p7 = pnand %p5376_p6, %p5370_p3 }
   0xf   :  { %5380 = shalt.err (!%p5377_p7)
}
  0x10   :  { %s5408_s11 = smov 256   ;;  %s5409_s12 = smov 16  }
  0x11   :  { %29 = dma.hbm_to_vmem [thread:$0]  %s6434_s2, 4096, %s24_s25, [#allocation3], %s5408_s11, %s5408_s11, %s5409_s12  }
  0x12   :  { %s5410_s15 = smov [#allocation4]   ;;  %s5381_s19 = scalar_lea.hbm %s6436_s4, 8192 }
  0x13   :  { %s37_s16 = sshll.u32 %s5410_s15, 4  ;;  %p5382_p8 = scmp.ne.s32.totalorder %s6436_s4, %s5381_s19  ;;  %s38_s16 = int_to_ptr.vmem [resolvable:$true] %s37_s16 }
  0x14   :  { %p5385_p9 = scmp.lt.u32.totalorder %s5381_s19, %s6436_s4 }
  0x16   :  { %p5387_p10 = pnand %p5385_p9, %p5382_p8 }
  0x18   :  { %5390 = shalt.err (!%p5387_p10)
}
  0x19   :  { %s5391_s24 = scalar_lea.vmem %s38_s16, 8192  ;;  %p5396_p12 = scmp.lt.s32.totalorder %s38_s16, %s38_s16 }
  0x1a   :  { %p5392_p11 = scmp.ne.s32.totalorder %s38_s16, %s5391_s24  ;;  %p5397_p13 = scmp.lt.s32.totalorder %s5391_s24, %s5391_s24 }
  0x1c   :  { %p5398_p0 = por %p5397_p13, %p5396_p12 }
  0x1e   :  { %p5399_p1 = pnand %p5398_p0, %p5392_p11 }
  0x20   :  { %5402 = shalt.err (!%p5399_p1)
}
  0x21   :  { %43 = dma.hbm_to_vmem [thread:$0]  %s6436_s4, 8192, %s38_s16, [#allocation5], %s5408_s11, %s5408_s11, %s5409_s12  }
  0x22   :  { %5403 = dma.done.wait [#allocation3], 4096  }
  0x23   :  { %5404 = vsyncadd [#allocation3], 4294963200 }
  0x24   :  { %5405 = dma.done.wait [#allocation5], 8192  }
  0x25   :  { %5406 = vsyncadd [#allocation5], 4294959104  ;;  %v5411_v0 = vmov 0   ;;  %v54_v1 = vld [vmem:[%s6432_s0] sm:$0xff]  ;;  %v85_v2 = vlaneseq  ;;  %v59_v23 = vld [vmem:[#allocation4 + $0x8] sm:$0xff]  ;;  %s5412_s8 = smov 64  }
  0x26   :  { %4916 = vset.pattern.permute.xlu0 %v5411_v0  ;;  %v56_v5 = vld [vmem:[%s6433_s1] sm:$0x3]  ;;  %v61_v24 = vld [vmem:[#allocation4 + $0x18] sm:$0xff]  ;;  %v60_v27 = vld [vmem:[#allocation4 + $0x10] sm:$0xff]  ;;  %v5413_v51 = vmov 0.0   ;;  %vm138_vm0 = vcmask 261120  }
  0x27   :  { %76 = vperm.xlu0 %4916, %v54_v1   ;;  %v86_v3 = vshrl.u32 %v85_v2, 7  ;;  %v57_v6 = vld [vmem:[%s6435_s3] sm:$0x3]  ;;  %v5515_v26 = vpack.c.bf16 %v61_v24, %v59_v23  ;;  %v63_v28 = vld [vmem:[#allocation4 + $0x28] sm:$0xff]  ;;  %v65_v29 = vld [vmem:[#allocation4 + $0x38] sm:$0xff]  ;;  %215 = vmatprep.mubr.f32.mxu0 %v5413_v51  ;;  %vm147_vm1 = vcmask 523264  }
  0x28   :  { %v58_v25 = vld [vmem:[#allocation4] sm:$0xff]  ;;  %v5519_v31 = vpack.c.bf16 %v65_v29, %v63_v28  ;;  %v64_v33 = vld [vmem:[#allocation4 + $0x30] sm:$0xff]  ;;  %v67_v34 = vld [vmem:[#allocation4 + $0x48] sm:$0xff]  ;;  %521 = vmatprep.mubr.f32.mxu1 %v5413_v51  ;;  %vm969_vm2 = vcmask 1041408   ;;  %vm971_vm3 = vcmask 1043456   ;;  %vm973_vm4 = vcmask 1045504  }
  0x29   :  { %v5483_v4 = vsub.s32 0, %v86_v3  ;;  %v5498_v11 = vsub.s32 1, %v86_v3  ;;  %v5517_v30 = vpack.c.bf16 %v60_v27, %v58_v25  ;;  %v62_v32 = vld [vmem:[#allocation4 + $0x20] sm:$0xff]  ;;  %4340 = vmatprep.subr.bf16.mxu0 %v5515_v26  ;;  %v69_v35 = vld [vmem:[#allocation4 + $0x58] sm:$0xff]  ;;  %4388 = vmatprep.subr.bf16.mxu1 %v5515_v26  ;;  %v68_v39 = vld [vmem:[#allocation4 + $0x50] sm:$0xff]  ;;  %s5414_s11 = smov 32  }
  0x2a   :  { %v5524_v36 = vpack.c.bf16 %v64_v33, %v62_v32  ;;  %v5528_v37 = vpack.c.bf16 %v69_v35, %v67_v34  ;;  %v66_v38 = vld [vmem:[#allocation4 + $0x40] sm:$0xff]  ;;  %v71_v41 = vld [vmem:[#allocation4 + $0x68] sm:$0xff]  ;;  %v73_v42 = vld [vmem:[#allocation4 + $0x78] sm:$0xff]  ;;  %s5415_s14 = smov 96   ;;  %vm4053_vm5 = vcmask 785408   ;;  %vm4154_vm6 = vcmask 31744  }
  0x2b   :  { %v5492_v7 = vrot.slane %v56_v5, %v5483_v4  ;;  %v5495_v8 = vrot.slane %v57_v6, %v5483_v4  ;;  %v5505_v14 = vrot.slane %v56_v5, %v5498_v11  ;;  %v5508_v15 = vrot.slane %v57_v6, %v5498_v11  ;;  %4342 = vmatpush1.bf16.msra.mxu0 %v5517_v30  ;;  %v70_v45 = vld [vmem:[#allocation4 + $0x60] sm:$0xff]  ;;  %v72_v46 = vld [vmem:[#allocation4 + $0x70] sm:$0xff] }
  0x2c   :  { %4390 = vmatpush1.bf16.msra.mxu1 %v5517_v30  ;;  %4344 = vmatprep.subr.bf16.mxu0 %v5519_v31  ;;  %v5533_v43 = vpack.c.bf16 %v68_v39, %v66_v38  ;;  %v5537_v44 = vpack.c.bf16 %v73_v42, %v71_v41  ;;  %v5541_v47 = vpack.c.bf16 %v72_v46, %v70_v45 }
  0x2d   :  { %4392 = vmatprep.subr.bf16.mxu1 %v5519_v31 }
  0x2f   :  { %4346 = vmatpush1.bf16.msra.mxu0 %v5524_v36 }
  0x30   :  { %4394 = vmatpush1.bf16.msra.mxu1 %v5524_v36  ;;  %4348 = vmatprep.subr.bf16.mxu0 %v5528_v37 }
  0x31   :  { %4396 = vmatprep.subr.bf16.mxu1 %v5528_v37 }
  0x33   :  { %4350 = vmatpush1.bf16.msra.mxu0 %v5533_v43 }
  0x34   :  { %4398 = vmatpush1.bf16.msra.mxu1 %v5533_v43  ;;  %4352 = vmatprep.subr.bf16.mxu0 %v5537_v44 }
  0x35   :  { %4400 = vmatprep.subr.bf16.mxu1 %v5537_v44 }
  0x37   :  { %4354 = vmatpush1.bf16.msra.mxu0 %v5541_v47 }
  0x38   :  { %4402 = vmatpush1.bf16.msra.mxu1 %v5541_v47  ;;  %4356 = vmatprep.subr.bf16.mxu0 %v5515_v26 }
  0x39   :  { %4420 = vmatprep.subr.bf16.mxu1 %v5515_v26 }
  0xa6   :  { %v77_v9 = vpop.permute.xlu0 %76 }
  0xa7   :  { %v95_v10 = vmul.f32 %v5492_v7, %v77_v9  ;;  %v96_v16 = vmul.f32 %v5505_v14, %v77_v9 }
  0xa9   :  { %v5501_v12 = vadd.f32 %v5495_v8, %v95_v10  ;;  %v5512_v17 = vadd.f32 %v5508_v15, %v96_v16 }
  0xab   :  { %v4163_v13 = vmul.f32 -1.442695, %v5501_v12  ;;  %v4164_v48 = vmul.f32 -1.442695, %v5512_v17  ;;  %v143_v58 = vrot.slane %v5501_v12, 2  ;;  %v144_v60 = vrot.slane %v5512_v17, 2 }
  0xac   :  { %v251_v25 = vrot.slane %v5501_v12, 4  ;;  %v252_v28 = vrot.slane %v5512_v17, 4 }
  0xad   :  { %4927 = vpow2.f32 %v4163_v13 }
  0xae   :  { %4929 = vtanh.f32 %v5512_v17 }
  0xb7   :  { %v4928_v18 = vpop.eup %4927 }
  0xb8   :  { %v120_v19 = vadd.f32 1.0, %v4928_v18  ;;  %v4930_v20 = vpop.eup %4929 }
  0xba   :  { %4931 = vrcp.f32 %v120_v19 }
  0xc4   :  { %v4932_v21 = vpop.eup %4931 }
  0xc5   :  { %v127_v22 = vmul.f32 %v4932_v21, %v4930_v20 }
  0xc7   :  { %4933 = vtanh.f32 %v127_v22  ;;  %v140_v55 = vsel %vm138_vm0, %v127_v22, 0.0 }
  0xc8   :  { %4935 = vpow2.f32 %v4164_v48 }
  0xd1   :  { %v4934_v40 = vpop.eup %4933 }
  0xd2   :  { %130 = vrot.lane.b32.xlu0 %v4934_v40, %s5412_s8  ;;  %v4936_v49 = vpop.eup %4935 }
  0xd3   :  { %v121_v50 = vadd.f32 1.0, %v4936_v49 }
  0xd5   :  { %4937 = vrcp.f32 %v121_v50 }
  0xdf   :  { %v4938_v52 = vpop.eup %4937 }
 0x144   :  { %v131_v53 = vpop.permute.xlu0 %130 }
 0x145   :  { %v133_v54 = vmul.f32 %v4938_v52, %v131_v53 }
 0x147   :  { %135 = vrot.lane.b32.xlu1 %v133_v54, %s5412_s8 }
 0x14b   :  { %236 = vrot.lane.b32.xlu1 %v140_v55, %s5412_s8 }
 0x1b9   :  { %v136_v56 = vpop.permute.xlu1 %135 }
 0x1ba   :  { %v139_v57 = vsel %vm138_vm0, %v136_v56, 0.0  ;;  %v353_v56 = vrot.slane %v5501_v12, 6  ;;  %v55_v12 = vld [vmem:[%s6432_s0 + $0x8] sm:$0xff] }
 0x1bb   :  { %4165 = vmatmul.mubr.msk.f32.vlgmr.msra.gmra.mrb[0].mxu0 %vm147_vm1, %v139_v57 }
 0x1bc   :  { %4358 = vmatpush1.bf16.msra.mxu0 %v5517_v30  ;;  %321 = vmatprep.mubr.f32.mxu0 %v5413_v51 }
 0x1bd   :  { %4360 = vmatprep.subr.bf16.mxu0 %v5519_v31  ;;  %v237_v13 = vpop.permute.xlu1 %236 }
 0x1c0   :  { %4362 = vmatpush1.bf16.msra.mxu0 %v5524_v36 }
 0x1c1   :  { %4364 = vmatprep.subr.bf16.mxu0 %v5528_v37 }
 0x1c4   :  { %4366 = vmatpush1.bf16.msra.mxu0 %v5533_v43 }
 0x1c5   :  { %4368 = vmatprep.subr.bf16.mxu0 %v5537_v44 }
 0x1c8   :  { %4370 = vmatpush1.bf16.msra.mxu0 %v5541_v47 }
 0x1c9   :  { %4372 = vmatprep.subr.bf16.mxu0 %v5515_v26 }
 0x28e   :  { %v217_v59 = vpop.f32.mrb[0].mxu0 }
 0x28f   :  { %v218_v61 = vadd.f32 %v217_v59, %v143_v58  ;;  %v219_v62 = vpop.f32.mrb[1].mxu0  ;;  %v354_v58 = vrot.slane %v5512_v17, 6 }
 0x290   :  { %v220_v63 = vadd.f32 %v219_v62, %v144_v60 }
 0x291   :  { %v4166_v0 = vmul.f32 -1.442695, %v218_v61 }
 0x292   :  { %v4167_v9 = vmul.f32 -1.442695, %v220_v63 }
 0x293   :  { %4939 = vpow2.f32 %v4166_v0 }
 0x294   :  { %4941 = vtanh.f32 %v220_v63 }
 0x29d   :  { %v4940_v1 = vpop.eup %4939 }
 0x29e   :  { %v228_v2 = vadd.f32 1.0, %v4940_v1  ;;  %v4942_v3 = vpop.eup %4941 }
 0x2a0   :  { %4943 = vrcp.f32 %v228_v2 }
 0x2a1   :  { %4945 = vpow2.f32 %v4167_v9 }
 0x2aa   :  { %v4944_v5 = vpop.eup %4943 }
 0x2ab   :  { %v240_v6 = vmul.f32 %v4944_v5, %v4942_v3  ;;  %v4946_v10 = vpop.eup %4945  ;;  %v239_v18 = vmul.f32 %v4944_v5, %v237_v13 }
 0x2ac   :  { %v229_v16 = vadd.f32 1.0, %v4946_v10 }
 0x2ad   :  { %242 = vrot.lane.b32.xlu0 %v240_v6, %s5412_s8 }
 0x2ae   :  { %4947 = vrcp.f32 %v229_v16 }
 0x2b8   :  { %v4948_v21 = vpop.eup %4947 }
 0x31f   :  { %v243_v19 = vpop.permute.xlu0 %242 }
 0x320   :  { %v245_v20 = vadd.f32 %v243_v19, %v239_v18 }
 0x322   :  { %4949 = vtanh.f32 %v245_v20 }
 0x32c   :  { %v4950_v22 = vpop.eup %4949 }
 0x32d   :  { %v5570_v23 = vmul.f32 %v4950_v22, %v4948_v21 }
 0x32f   :  { %249 = vrot.lane.b32.xlu1 %v5570_v23, %s5412_s8 }
 0x3a1   :  { %v250_v24 = vpop.permute.xlu1 %249 }
 0x3a2   :  { %4168 = vmatmul.mubr.msk.f32.vlgmr.msra.gmra.mrb[2].mxu0 %vm147_vm1, %v250_v24 }
 0x3a3   :  { %4374 = vmatpush1.bf16.msra.mxu0 %v5517_v30  ;;  %423 = vmatprep.mubr.f32.mxu0 %v5413_v51 }
 0x3a4   :  { %4376 = vmatprep.subr.bf16.mxu0 %v5519_v31 }
 0x3a7   :  { %4378 = vmatpush1.bf16.msra.mxu0 %v5524_v36 }
 0x3a8   :  { %4380 = vmatprep.subr.bf16.mxu0 %v5528_v37 }
 0x3ab   :  { %4382 = vmatpush1.bf16.msra.mxu0 %v5533_v43 }
 0x3ac   :  { %4384 = vmatprep.subr.bf16.mxu0 %v5537_v44 }
 0x3af   :  { %4386 = vmatpush1.bf16.msra.mxu0 %v5541_v47 }
 0x3b0   :  { %4404 = vmatprep.subr.bf16.mxu0 %v5515_v26 }
 0x475   :  { %v323_v27 = vpop.f32.mrb[2].mxu0 }
 0x476   :  { %v324_v29 = vadd.f32 %v323_v27, %v251_v25  ;;  %v325_v32 = vpop.f32.mrb[3].mxu0 }
 0x477   :  { %v326_v33 = vadd.f32 %v325_v32, %v252_v28 }
 0x478   :  { %v4169_v34 = vmul.f32 -1.442695, %v324_v29 }
 0x479   :  { %v4170_v42 = vmul.f32 -1.442695, %v326_v33 }
 0x47a   :  { %4951 = vpow2.f32 %v4169_v34 }
 0x47b   :  { %4953 = vtanh.f32 %v326_v33 }
 0x484   :  { %v4952_v35 = vpop.eup %4951 }
 0x485   :  { %v334_v38 = vadd.f32 1.0, %v4952_v35  ;;  %v4954_v39 = vpop.eup %4953 }
 0x487   :  { %4955 = vrcp.f32 %v334_v38 }
 0x488   :  { %4957 = vpow2.f32 %v4170_v42 }
 0x491   :  { %v4956_v40 = vpop.eup %4955 }
 0x492   :  { %v342_v41 = vmul.f32 %v4956_v40, %v4954_v39  ;;  %v4958_v45 = vpop.eup %4957  ;;  %v341_v48 = vmul.f32 %v4956_v40, %v245_v20 }
 0x493   :  { %v335_v46 = vadd.f32 1.0, %v4958_v45 }
 0x494   :  { %344 = vrot.lane.b32.xlu0 %v342_v41, %s5412_s8 }
 0x495   :  { %4959 = vrcp.f32 %v335_v46 }
 0x49f   :  { %v4960_v52 = vpop.eup %4959 }
 0x506   :  { %v345_v49 = vpop.permute.xlu0 %344 }
 0x507   :  { %v347_v50 = vadd.f32 %v345_v49, %v341_v48 }
 0x509   :  { %4961 = vtanh.f32 %v347_v50 }
 0x513   :  { %v4962_v53 = vpop.eup %4961 }
 0x514   :  { %v349_v54 = vmul.f32 %v4962_v53, %v4960_v52 }
 0x516   :  { %351 = vrot.lane.b32.xlu1 %v349_v54, %s5412_s8  ;;  %v956_v19 = vrot.slane %v349_v54, 6 }
 0x518   :  { %v970_v22 = vsel %vm969_vm2, %v5570_v23, %v956_v19 }
 0x588   :  { %v352_v55 = vpop.permute.xlu1 %351 }
 0x589   :  { %4171 = vmatmul.mubr.msk.f32.vlgmr.msra.gmra.mrb[4].mxu0 %vm147_vm1, %v352_v55 }
 0x58a   :  { %4406 = vmatpush1.bf16.msra.mxu0 %v5517_v30  ;;  %625 = vmatprep.mubr.f32.mxu0 %v5413_v51 }
 0x58b   :  { %4408 = vmatprep.subr.bf16.mxu0 %v5519_v31 }
 0x58e   :  { %4410 = vmatpush1.bf16.msra.mxu0 %v5524_v36 }
 0x58f   :  { %4412 = vmatprep.subr.bf16.mxu0 %v5528_v37 }
 0x592   :  { %4414 = vmatpush1.bf16.msra.mxu0 %v5533_v43 }
 0x593   :  { %4416 = vmatprep.subr.bf16.mxu0 %v5537_v44 }
 0x596   :  { %4418 = vmatpush1.bf16.msra.mxu0 %v5541_v47 }
 0x597   :  { %4436 = vmatprep.subr.bf16.mxu0 %v5515_v26 }
 0x65c   :  { %v425_v57 = vpop.f32.mrb[4].mxu0 }
 0x65d   :  { %v426_v59 = vadd.f32 %v425_v57, %v353_v56  ;;  %v427_v60 = vpop.f32.mrb[5].mxu0 }
 0x65e   :  { %v428_v61 = vadd.f32 %v427_v60, %v354_v58 }
 0x65f   :  { %v4172_v62 = vmul.f32 -1.442695, %v426_v59 }
 0x660   :  { %v4173_v17 = vmul.f32 -1.442695, %v428_v61 }
 0x661   :  { %4963 = vpow2.f32 %v4172_v62 }
 0x662   :  { %4965 = vtanh.f32 %v428_v61 }
 0x66b   :  { %v4964_v63 = vpop.eup %4963 }
 0x66c   :  { %v436_v0 = vadd.f32 1.0, %v4964_v63  ;;  %v4966_v1 = vpop.eup %4965 }
 0x66e   :  { %4967 = vrcp.f32 %v436_v0 }
 0x66f   :  { %4969 = vpow2.f32 %v4173_v17 }
 0x678   :  { %v4968_v2 = vpop.eup %4967 }
 0x679   :  { %v444_v3 = vmul.f32 %v4968_v2, %v4966_v1  ;;  %v4970_v5 = vpop.eup %4969  ;;  %v443_v9 = vmul.f32 %v4968_v2, %v347_v50 }
 0x67a   :  { %v437_v6 = vadd.f32 1.0, %v4970_v5 }
 0x67b   :  { %446 = vrot.lane.b32.xlu0 %v444_v3, %s5412_s8 }
 0x67c   :  { %4971 = vrcp.f32 %v437_v6 }
 0x67f   :  { %81 = vperm.xlu0 %4916, %v55_v12  }
 0x686   :  { %v4972_v16 = vpop.eup %4971 }
 0x6ed   :  { %v447_v10 = vpop.permute.xlu0 %446 }
 0x6ee   :  { %v449_v13 = vadd.f32 %v447_v10, %v443_v9 }
 0x6f0   :  { %4973 = vtanh.f32 %v449_v13 }
 0x6fa   :  { %v4974_v18 = vpop.eup %4973 }
 0x6fb   :  { %v451_v20 = vmul.f32 %v4974_v18, %v4972_v16 }
 0x6fd   :  { %453 = vrot.lane.b32.xlu1 %v451_v20, %s5412_s8  ;;  %v958_v21 = vrot.slane %v451_v20, 4 }
 0x6fe   :  { %v82_v23 = vpop.permute.xlu0 %81 }
 0x6ff   :  { %v972_v24 = vsel %vm971_vm3, %v970_v22, %v958_v21  ;;  %v97_v27 = vmul.f32 %v5492_v7, %v82_v23  ;;  %v98_v35 = vmul.f32 %v5505_v14, %v82_v23 }
 0x701   :  { %v5620_v28 = vadd.f32 %v5495_v8, %v97_v27  ;;  %v5625_v38 = vadd.f32 %v5508_v15, %v98_v35 }
 0x703   :  { %v555_v58 = vrot.slane %v5620_v28, 2  ;;  %v556_v63 = vrot.slane %v5625_v38, 2  ;;  %v657_v22 = vrot.slane %v5620_v28, 4  ;;  %v658_v27 = vrot.slane %v5625_v38, 4 }
 0x76f   :  { %v454_v25 = vpop.permute.xlu1 %453 }
 0x770   :  { %4174 = vmatmul.mubr.msk.f32.vlgmr.msra.gmra.mrb[0].mxu1 %vm147_vm1, %v454_v25 }
 0x771   :  { %4422 = vmatpush1.bf16.msra.mxu1 %v5517_v30  ;;  %727 = vmatprep.mubr.f32.mxu1 %v5413_v51 }
 0x772   :  { %4424 = vmatprep.subr.bf16.mxu1 %v5519_v31 }
 0x775   :  { %4426 = vmatpush1.bf16.msra.mxu1 %v5524_v36 }
 0x776   :  { %4428 = vmatprep.subr.bf16.mxu1 %v5528_v37 }
 0x779   :  { %4430 = vmatpush1.bf16.msra.mxu1 %v5533_v43 }
 0x77a   :  { %4432 = vmatprep.subr.bf16.mxu1 %v5537_v44 }
 0x77d   :  { %4434 = vmatpush1.bf16.msra.mxu1 %v5541_v47 }
 0x77e   :  { %4452 = vmatprep.subr.bf16.mxu1 %v5515_v26 }
 0x843   :  { %v523_v29 = vpop.f32.mrb[0].mxu1 }
 0x844   :  { %v524_v32 = vadd.f32 %v523_v29, %v5620_v28  ;;  %v525_v33 = vpop.f32.mrb[1].mxu1 }
 0x845   :  { %v526_v39 = vadd.f32 %v525_v33, %v5625_v38 }
 0x846   :  { %v4175_v34 = vmul.f32 -1.442695, %v524_v32 }
 0x847   :  { %v4176_v45 = vmul.f32 -1.442695, %v526_v39 }
 0x848   :  { %4975 = vpow2.f32 %v4175_v34 }
 0x849   :  { %4977 = vtanh.f32 %v526_v39 }
 0x852   :  { %v4976_v26 = vpop.eup %4975 }
 0x853   :  { %v534_v40 = vadd.f32 1.0, %v4976_v26  ;;  %v4978_v7 = vpop.eup %4977 }
 0x855   :  { %4979 = vrcp.f32 %v534_v40 }
 0x856   :  { %4981 = vpow2.f32 %v4176_v45 }
 0x85f   :  { %v4980_v41 = vpop.eup %4979 }
 0x860   :  { %v542_v42 = vmul.f32 %v4980_v41, %v4978_v7  ;;  %v4982_v46 = vpop.eup %4981  ;;  %v541_v49 = vmul.f32 %v4980_v41, %v449_v13 }
 0x861   :  { %v535_v48 = vadd.f32 1.0, %v4982_v46  ;;  %v4189_v46 = vld [vmem:[%s6432_s0 + $0x10] sm:$0xff] }
 0x862   :  { %544 = vrot.lane.b32.xlu1 %v542_v42, %s5412_s8 }
 0x863   :  { %4983 = vrcp.f32 %v535_v48  ;;  %v1003_v48 = vld [vmem:[#allocation2 + $0x40] sm:$0xff] }
 0x86d   :  { %v4984_v52 = vpop.eup %4983 }
 0x8d4   :  { %v545_v14 = vpop.permute.xlu1 %544 }
 0x8d5   :  { %v547_v50 = vadd.f32 %v545_v14, %v541_v49  ;;  %v1005_v49 = vld [vmem:[#allocation2 + $0x50] sm:$0xff]  ;;  %v1008_v14 = vld [vmem:[#allocation2 + $0x68] sm:$0xff] }
 0x8d7   :  { %4985 = vtanh.f32 %v547_v50 }
 0x8e1   :  { %v4986_v53 = vpop.eup %4985 }
 0x8e2   :  { %v549_v54 = vmul.f32 %v4986_v53, %v4984_v52  ;;  %v4469_v52 = vpack.c.bf16 %v1005_v49, %v1003_v48  ;;  %v988_v48 = vld [vmem:[#allocation4 + $0x90] sm:$0xff] }
 0x8e4   :  { %551 = vrot.lane.b32.xlu0 %v549_v54, %s5412_s8  ;;  %v960_v55 = vrot.slane %v549_v54, 2  ;;  %v1007_v54 = vld [vmem:[#allocation2 + $0x60] sm:$0xff] }
 0x8e6   :  { %v5631_v56 = vsel %vm973_vm4, %v972_v24, %v960_v55  ;;  %v1009_v55 = vld [vmem:[#allocation2 + $0x70] sm:$0xff] }
 0x956   :  { %v552_v57 = vpop.permute.xlu0 %551 }
 0x957   :  { %4177 = vmatmul.mubr.msk.f32.vlgmr.msra.gmra.mrb[6].mxu0 %vm147_vm1, %v552_v57  ;;  %v4473_v57 = vpack.c.bf16 %v1009_v55, %v1007_v54  ;;  %v990_v54 = vld [vmem:[#allocation4 + $0xa0] sm:$0xff]  ;;  %v992_v55 = vld [vmem:[#allocation4 + $0xb0] sm:$0xff] }
 0x958   :  { %4438 = vmatpush1.bf16.msra.mxu0 %v5517_v30  ;;  %829 = vmatprep.mubr.f32.mxu0 %v5413_v51 }
 0x959   :  { %4440 = vmatprep.subr.bf16.mxu0 %v5519_v31 }
 0x95c   :  { %4442 = vmatpush1.bf16.msra.mxu0 %v5524_v36 }
 0x95d   :  { %4444 = vmatprep.subr.bf16.mxu0 %v5528_v37 }
 0x960   :  { %4446 = vmatpush1.bf16.msra.mxu0 %v5533_v43 }
 0x961   :  { %4448 = vmatprep.subr.bf16.mxu0 %v5537_v44 }
 0x964   :  { %4450 = vmatpush1.bf16.msra.mxu0 %v5541_v47 }
 0xa2a   :  { %v627_v59 = vpop.f32.mrb[6].mxu0 }
 0xa2b   :  { %v628_v60 = vadd.f32 %v627_v59, %v555_v58  ;;  %v629_v61 = vpop.f32.mrb[7].mxu0  ;;  %v759_v59 = vrot.slane %v5620_v28, 6 }
 0xa2c   :  { %v630_v0 = vadd.f32 %v629_v61, %v556_v63 }
 0xa2d   :  { %v4178_v62 = vmul.f32 -1.442695, %v628_v60  ;;  %v4191_v60 = vld [vmem:[%s6433_s1 + $0x2] sm:$0x3] }
 0xa2e   :  { %v4179_v5 = vmul.f32 -1.442695, %v630_v0 }
 0xa2f   :  { %4987 = vpow2.f32 %v4178_v62 }
 0xa30   :  { %4989 = vtanh.f32 %v630_v0  ;;  %v5685_v0 = vrot.slane %v4191_v60, %v5483_v4 }
 0xa39   :  { %v4988_v1 = vpop.eup %4987 }
 0xa3a   :  { %v638_v2 = vadd.f32 1.0, %v4988_v1  ;;  %v4990_v3 = vpop.eup %4989 }
 0xa3c   :  { %4991 = vrcp.f32 %v638_v2 }
 0xa3d   :  { %4993 = vpow2.f32 %v4179_v5 }
 0xa46   :  { %v4992_v12 = vpop.eup %4991 }
 0xa47   :  { %v646_v17 = vmul.f32 %v4992_v12, %v4990_v3  ;;  %v4994_v6 = vpop.eup %4993  ;;  %v645_v10 = vmul.f32 %v4992_v12, %v547_v50  ;;  %v1010_v50 = vld [vmem:[#allocation2 + $0x78] sm:$0xff]  ;;  %v4192_v3 = vld [vmem:[%s6435_s3 + $0x2] sm:$0x3] }
 0xa48   :  { %v639_v9 = vadd.f32 1.0, %v4994_v6  ;;  %v4471_v53 = vpack.c.bf16 %v1010_v50, %v1008_v14  ;;  %v5692_v28 = vrot.slane %v4192_v3, %v5483_v4  ;;  %v991_v50 = vld [vmem:[#allocation4 + $0xa8] sm:$0xff] }
 0xa49   :  { %648 = vrot.lane.b32.xlu1 %v646_v17, %s5412_s8 }
 0xa4a   :  { %4995 = vrcp.f32 %v639_v9  ;;  %v760_v9 = vrot.slane %v5625_v38, 6 }
 0xa54   :  { %v4996_v18 = vpop.eup %4995 }
 0xabb   :  { %v649_v13 = vpop.permute.xlu1 %648 }
 0xabc   :  { %v651_v16 = vadd.f32 %v649_v13, %v645_v10  ;;  %v5699_v13 = vrot.slane %v4191_v60, %v5498_v11 }
 0xabe   :  { %4997 = vtanh.f32 %v651_v16 }
 0xac8   :  { %v4998_v19 = vpop.eup %4997 }
 0xac9   :  { %v5645_v20 = vmul.f32 %v4998_v19, %v4996_v18 }
 0xacb   :  { %655 = vrot.lane.b32.xlu0 %v5645_v20, %s5412_s8 }
 0xb3d   :  { %v656_v21 = vpop.permute.xlu0 %655 }
 0xb3e   :  { %4180 = vmatmul.mubr.msk.f32.vlgmr.msra.gmra.mrb[2].mxu1 %vm147_vm1, %v656_v21 }
 0xb3f   :  { %4454 = vmatpush1.bf16.msra.mxu1 %v5517_v30  ;;  %927 = vmatprep.mubr.f32.mxu1 %v5413_v51 }
 0xb40   :  { %4456 = vmatprep.subr.bf16.mxu1 %v5519_v31 }
 0xb43   :  { %4458 = vmatpush1.bf16.msra.mxu1 %v5524_v36 }
 0xb44   :  { %4460 = vmatprep.subr.bf16.mxu1 %v5528_v37 }
 0xb47   :  { %4462 = vmatpush1.bf16.msra.mxu1 %v5533_v43 }
 0xb48   :  { %4464 = vmatprep.subr.bf16.mxu1 %v5537_v44  ;;  %v1004_v44 = vld [vmem:[#allocation2 + $0x48] sm:$0xff] }
 0xb4b   :  { %4466 = vmatpush1.bf16.msra.mxu1 %v5541_v47  ;;  %v1006_v47 = vld [vmem:[#allocation2 + $0x58] sm:$0xff] }
 0xb4c   :  { %v4467_v33 = vpack.c.bf16 %v1006_v47, %v1004_v44  ;;  %v989_v44 = vld [vmem:[#allocation4 + $0x98] sm:$0xff] }
 0xb4e   :  { %4468 = vmatprep.subr.bf16.mxu0 %v4467_v33 }
 0xc11   :  { %v729_v24 = vpop.f32.mrb[2].mxu1 }
 0xc12   :  { %v730_v25 = vadd.f32 %v729_v24, %v657_v22  ;;  %v731_v23 = vpop.f32.mrb[3].mxu1 }
 0xc13   :  { %v732_v31 = vadd.f32 %v731_v23, %v658_v27 }
 0xc14   :  { %v4181_v30 = vmul.f32 -1.442695, %v730_v25  ;;  %v5704_v25 = vrot.slane %v4192_v3, %v5498_v11 }
 0xc15   :  { %v4182_v34 = vmul.f32 -1.442695, %v732_v31 }
 0xc16   :  { %4999 = vpow2.f32 %v4181_v30 }
 0xc17   :  { %5001 = vtanh.f32 %v732_v31 }
 0xc20   :  { %v5000_v29 = vpop.eup %4999 }
 0xc21   :  { %v740_v36 = vadd.f32 1.0, %v5000_v29  ;;  %v5002_v37 = vpop.eup %5001 }
 0xc23   :  { %5003 = vrcp.f32 %v740_v36 }
 0xc24   :  { %5005 = vpow2.f32 %v4182_v34 }
 0xc2d   :  { %v5004_v43 = vpop.eup %5003 }
 0xc2e   :  { %v748_v32 = vmul.f32 %v5004_v43, %v5002_v37  ;;  %v5006_v35 = vpop.eup %5005  ;;  %v747_v26 = vmul.f32 %v5004_v43, %v651_v16 }
 0xc2f   :  { %v741_v39 = vadd.f32 1.0, %v5006_v35 }
 0xc30   :  { %750 = vrot.lane.b32.xlu1 %v748_v32, %s5412_s8  ;;  %v987_v32 = vld [vmem:[#allocation4 + $0x88] sm:$0xff] }
 0xc31   :  { %5007 = vrcp.f32 %v741_v39  ;;  %v5714_v47 = vpack.c.bf16 %v989_v44, %v987_v32 }
 0xc33   :  { %4476 = vmatprep.subr.bf16.mxu1 %v5714_v47 }
 0xc34   :  { %1038 = vrot.lane.b32.xlu1 %v5631_v56, %s5414_s11 }
 0xc3b   :  { %v5008_v41 = vpop.eup %5007 }
 0xca2   :  { %v751_v40 = vpop.permute.xlu1 %750 }
 0xca3   :  { %v5663_v7 = vadd.f32 %v751_v40, %v747_v26 }
 0xca5   :  { %5009 = vtanh.f32 %v5663_v7 }
 0xca6   :  { %v5675_v58 = vpop.permute.xlu1 %1038 }
 0xcaf   :  { %v5010_v42 = vpop.eup %5009 }
 0xcb0   :  { %v5666_v45 = vmul.f32 %v5010_v42, %v5008_v41 }
 0xcb2   :  { %757 = vrot.lane.b32.xlu0 %v5666_v45, %s5412_s8  ;;  %v962_v3 = vrot.slane %v5666_v45, 6 }
 0xcb6   :  { %1013 = vperm.xlu0 %4916, %v4189_v46   ;;  %v986_v46 = vld [vmem:[#allocation4 + $0x80] sm:$0xff] }
 0xcb7   :  { %v5724_v49 = vpack.c.bf16 %v988_v48, %v986_v46 }
 0xd24   :  { %v758_v56 = vpop.permute.xlu0 %757 }
 0xd25   :  { %4183 = vmatmul.mubr.msk.f32.vlgmr.msra.gmra.mrb[8].mxu0 %vm147_vm1, %v758_v56  ;;  %v5729_v56 = vpack.c.bf16 %v992_v55, %v990_v54 }
 0xd26   :  { %4470 = vmatpush1.bf16.msra.mxu0 %v4469_v52  ;;  %1110 = vmatprep.mubr.f32.mxu0 %v5413_v51  ;;  %v993_v52 = vld [vmem:[#allocation4 + $0xb8] sm:$0xff] }
 0xd27   :  { %4472 = vmatprep.subr.bf16.mxu0 %v4471_v53  ;;  %v5726_v53 = vpack.c.bf16 %v993_v52, %v991_v50 }
 0xd2a   :  { %4474 = vmatpush1.bf16.msra.mxu0 %v4473_v57  ;;  %v995_v57 = vld [vmem:[#allocation4 + $0xc8] sm:$0xff] }
 0xd2b   :  { %4492 = vmatprep.subr.bf16.mxu0 %v5714_v47 }
 0xd2d   :  { %4193 = vmatmul.mubr.msk.f32.vlgmr.msra.gmra.mrb[10].mxu0 %vm138_vm0, %v5675_v58 }
 0xd2e   :  { %1116 = vmatprep.mubr.f32.mxu0 %v5413_v51  ;;  %4494 = vmatpush1.bf16.msra.mxu0 %v5724_v49 }
 0xd2f   :  { %4496 = vmatprep.subr.bf16.mxu0 %v5726_v53 }
 0xd32   :  { %4498 = vmatpush1.bf16.msra.mxu0 %v5729_v56 }
 0xd35   :  { %v1014_v2 = vpop.permute.xlu0 %1013 }
 0xd36   :  { %v1032_v12 = vmul.f32 %v5685_v0, %v1014_v2  ;;  %v1033_v22 = vmul.f32 %v5699_v13, %v1014_v2 }
 0xdf8   :  { %v831_v61 = vpop.f32.mrb[8].mxu0 }
 0xdf9   :  { %v832_v62 = vadd.f32 %v831_v61, %v759_v59  ;;  %v833_v63 = vpop.f32.mrb[9].mxu0  ;;  %v997_v59 = vld [vmem:[#allocation4 + $0xd8] sm:$0xff]  ;;  %v994_v61 = vld [vmem:[#allocation4 + $0xc0] sm:$0xff] }
 0xdfa   :  { %v834_v16 = vadd.f32 %v833_v63, %v760_v9  ;;  %v5733_v60 = vpack.c.bf16 %v997_v59, %v995_v57  ;;  %v998_v9 = vld [vmem:[#allocation4 + $0xe0] sm:$0xff] }
 0xdfb   :  { %v4184_v1 = vmul.f32 -1.442695, %v832_v62  ;;  %v996_v62 = vld [vmem:[#allocation4 + $0xd0] sm:$0xff] }
 0xdfc   :  { %v4185_v34 = vmul.f32 -1.442695, %v834_v16  ;;  %v5735_v63 = vpack.c.bf16 %v996_v62, %v994_v61  ;;  %4500 = vmatprep.subr.bf16.mxu0 %v5733_v60 }
 0xdfd   :  { %5011 = vpow2.f32 %v4184_v1 }
 0xdfe   :  { %4502 = vmatpush1.bf16.msra.mxu0 %v5735_v63 }
 0xe00   :  { %v1112_v17 = vpop.f32.mrb[10].mxu0 }
 0xe01   :  { %v1113_v5 = vadd.f32 %v1112_v17, %v1032_v12  ;;  %v1114_v6 = vpop.f32.mrb[11].mxu0  ;;  %v999_v12 = vld [vmem:[#allocation4 + $0xe8] sm:$0xff]  ;;  %v1001_v17 = vld [vmem:[#allocation4 + $0xf8] sm:$0xff] }
 0xe02   :  { %v1115_v24 = vadd.f32 %v1114_v6, %v1033_v22  ;;  %v5740_v6 = vpack.c.bf16 %v1001_v17, %v999_v12 }
 0xe03   :  { %v5696_v10 = vadd.f32 %v5692_v28, %v1113_v5 }
 0xe04   :  { %v5707_v38 = vadd.f32 %v5704_v25, %v1115_v24  ;;  %4504 = vmatprep.subr.bf16.mxu0 %v5740_v6 }
 0xe05   :  { %v4195_v18 = vmul.f32 -1.442695, %v5696_v10 }
 0xe06   :  { %v4196_v35 = vmul.f32 -1.442695, %v5707_v38 }
 0xe07   :  { %v5012_v19 = vpop.eup %5011  ;;  %5013 = vpow2.f32 %v4195_v18 }
 0xe08   :  { %v842_v21 = vadd.f32 1.0, %v5012_v19  ;;  %5015 = vtanh.f32 %v834_v16  ;;  %v1000_v16 = vld [vmem:[#allocation4 + $0xf0] sm:$0xff] }
 0xe09   :  { %v5742_v18 = vpack.c.bf16 %v1000_v16, %v998_v9 }
 0xe0a   :  { %5017 = vrcp.f32 %v842_v21  ;;  %v975_v21 = vsel %vm969_vm2, %v5645_v20, %v962_v3 }
 0xe0b   :  { %5019 = vtanh.f32 %v5707_v38  ;;  %4506 = vmatpush1.bf16.msra.mxu0 %v5742_v18 }
 0xe0c   :  { %4524 = vmatprep.subr.bf16.mxu0 %v5714_v47 }
 0xe11   :  { %v5014_v23 = vpop.eup %5013 }
 0xe12   :  { %v1144_v30 = vadd.f32 1.0, %v5014_v23  ;;  %v5016_v27 = vpop.eup %5015 }
 0xe14   :  { %v5018_v31 = vpop.eup %5017  ;;  %5021 = vrcp.f32 %v1144_v30 }
 0xe15   :  { %v850_v29 = vmul.f32 %v5018_v31, %v5016_v27  ;;  %v5020_v36 = vpop.eup %5019  ;;  %v849_v40 = vmul.f32 %v5018_v31, %v5663_v7 }
 0xe17   :  { %852 = vrot.lane.b32.xlu1 %v850_v29, %s5412_s8 }
 0xe1e   :  { %v5022_v37 = vpop.eup %5021 }
 0xe1f   :  { %v5711_v43 = vmul.f32 %v5022_v37, %v5020_v36 }
 0xe21   :  { %5023 = vtanh.f32 %v5711_v43  ;;  %v1163_v30 = vsel %vm138_vm0, %v5711_v43, 0.0 }
 0xe22   :  { %5025 = vpow2.f32 %v4185_v34 }
 0xe23   :  { %5027 = vpow2.f32 %v4196_v35 }
 0xe2b   :  { %v5024_v33 = vpop.eup %5023 }
 0xe2c   :  { %1154 = vrot.lane.b32.xlu0 %v5024_v33, %s5412_s8  ;;  %v5026_v39 = vpop.eup %5025  ;;  %v1166_v33 = vrot.slane %v5696_v10, 2 }
 0xe2d   :  { %v843_v26 = vadd.f32 1.0, %v5026_v39  ;;  %v5028_v14 = vpop.eup %5027  ;;  %v1167_v39 = vrot.slane %v5707_v38, 2 }
 0xe2e   :  { %v1145_v7 = vadd.f32 1.0, %v5028_v14 }
 0xe2f   :  { %5029 = vrcp.f32 %v843_v26 }
 0xe39   :  { %v5030_v1 = vpop.eup %5029 }
 0xe89   :  { %v853_v41 = vpop.permute.xlu1 %852 }
 0xe8a   :  { %v5721_v42 = vadd.f32 %v853_v41, %v849_v40 }
 0xe8c   :  { %5031 = vtanh.f32 %v5721_v42 }
 0xe8d   :  { %5033 = vrcp.f32 %v1145_v7 }
 0xe96   :  { %v5032_v2 = vpop.eup %5031 }
 0xe97   :  { %v857_v5 = vmul.f32 %v5032_v2, %v5030_v1  ;;  %v5034_v22 = vpop.eup %5033 }
 0xe99   :  { %859 = vrot.lane.b32.xlu1 %v857_v5, %s5412_s8  ;;  %v964_v19 = vrot.slane %v857_v5, 4 }
 0xe9b   :  { %v5750_v45 = vsel %vm971_vm3, %v975_v21, %v964_v19 }
 0xe9e   :  { %v1155_v24 = vpop.permute.xlu0 %1154 }
 0xe9f   :  { %v1157_v23 = vmul.f32 %v5034_v22, %v1155_v24 }
 0xea1   :  { %1159 = vrot.lane.b32.xlu0 %v1157_v23, %s5412_s8 }
 0xea5   :  { %1258 = vrot.lane.b32.xlu0 %v1163_v30, %s5412_s8 }
 0xf0b   :  { %v860_v27 = vpop.permute.xlu1 %859 }
 0xf0c   :  { %4186 = vmatmul.mubr.msk.f32.vlgmr.msra.gmra.mrb[4].mxu1 %vm147_vm1, %v860_v27 }
 0xf0d   :  { %4478 = vmatpush1.bf16.msra.mxu1 %v5724_v49  ;;  %1237 = vmatprep.mubr.f32.mxu1 %v5413_v51 }
 0xf0e   :  { %4480 = vmatprep.subr.bf16.mxu1 %v5726_v53 }
 0xf11   :  { %4482 = vmatpush1.bf16.msra.mxu1 %v5729_v56 }
 0xf12   :  { %4484 = vmatprep.subr.bf16.mxu1 %v5733_v60 }
 0xf13   :  { %v1160_v20 = vpop.permute.xlu0 %1159 }
 0xf14   :  { %v1162_v31 = vsel %vm138_vm0, %v1160_v20, 0.0 }
 0xf15   :  { %4486 = vmatpush1.bf16.msra.mxu1 %v5735_v63 }
 0xf16   :  { %4488 = vmatprep.subr.bf16.mxu1 %v5740_v6 }
 0xf17   :  { %v1259_v5 = vpop.permute.xlu0 %1258 }
 0xf19   :  { %4490 = vmatpush1.bf16.msra.mxu1 %v5742_v18 }
 0xf1a   :  { %4508 = vmatprep.subr.bf16.mxu1 %v5714_v47 }
 0xf1c   :  { %4197 = vmatmul.mubr.msk.f32.vlgmr.msra.gmra.mrb[6].mxu1 %vm147_vm1, %v1162_v31 }
 0xf1d   :  { %4510 = vmatpush1.bf16.msra.mxu1 %v5724_v49  ;;  %1445 = vmatprep.mubr.f32.mxu1 %v5413_v51 }
 0xf1e   :  { %4512 = vmatprep.subr.bf16.mxu1 %v5726_v53 }
 0xf21   :  { %4514 = vmatpush1.bf16.msra.mxu1 %v5729_v56 }
 0xf22   :  { %4516 = vmatprep.subr.bf16.mxu1 %v5733_v60 }
 0xf25   :  { %4518 = vmatpush1.bf16.msra.mxu1 %v5735_v63 }
 0xf26   :  { %4520 = vmatprep.subr.bf16.mxu1 %v5740_v6 }
 0xf29   :  { %4522 = vmatpush1.bf16.msra.mxu1 %v5742_v18 }
 0xf2a   :  { %4540 = vmatprep.subr.bf16.mxu1 %v5714_v47 }
 0xfdf   :  { %v929_v29 = vpop.f32.mrb[4].mxu1 }
 0xfe0   :  { %v930_v36 = vadd.f32 %v929_v29, %v5495_v8  ;;  %v931_v37 = vpop.f32.mrb[5].mxu1 }
 0xfe1   :  { %v932_v32 = vadd.f32 %v931_v37, %v5508_v15 }
 0xfe2   :  { %v4187_v43 = vmul.f32 -1.442695, %v930_v36  ;;  %v1273_v36 = vrot.slane %v5696_v10, 4 }
 0xfe3   :  { %v4188_v7 = vmul.f32 -1.442695, %v932_v32 }
 0xfe4   :  { %5035 = vpow2.f32 %v4187_v43  ;;  %v1274_v43 = vrot.slane %v5707_v38, 4 }
 0xfe5   :  { %5037 = vtanh.f32 %v932_v32 }
 0xfee   :  { %v5036_v44 = vpop.eup %5035 }
 0xfef   :  { %v940_v34 = vadd.f32 1.0, %v5036_v44  ;;  %v1239_v35 = vpop.f32.mrb[6].mxu1  ;;  %v5038_v8 = vpop.eup %5037 }
 0xff0   :  { %v1240_v26 = vadd.f32 %v1239_v35, %v1166_v33  ;;  %v1241_v40 = vpop.f32.mrb[7].mxu1 }
 0xff1   :  { %5039 = vrcp.f32 %v940_v34  ;;  %v1242_v41 = vadd.f32 %v1241_v40, %v1167_v39 }
 0xff2   :  { %v4198_v46 = vmul.f32 -1.442695, %v1240_v26 }
 0xff3   :  { %v4199_v59 = vmul.f32 -1.442695, %v1242_v41 }
 0xff4   :  { %5041 = vpow2.f32 %v4198_v46 }
 0xff5   :  { %5043 = vtanh.f32 %v1242_v41 }
 0xffb   :  { %v5040_v48 = vpop.eup %5039 }
 0xffc   :  { %v948_v14 = vmul.f32 %v5040_v48, %v5038_v8  ;;  %v947_v62 = vmul.f32 %v5040_v48, %v5721_v42 }
 0xffe   :  { %v5042_v50 = vpop.eup %5041  ;;  %950 = vrot.lane.b32.xlu1 %v948_v14, %s5412_s8 }
 0xfff   :  { %v1250_v15 = vadd.f32 1.0, %v5042_v50  ;;  %v5044_v52 = vpop.eup %5043 }
0x1001   :  { %5045 = vrcp.f32 %v1250_v15 }
0x1002   :  { %5047 = vpow2.f32 %v4188_v7 }
0x1003   :  { %5049 = vpow2.f32 %v4199_v59 }
0x100b   :  { %v5046_v54 = vpop.eup %5045 }
0x100c   :  { %v1262_v55 = vmul.f32 %v5046_v54, %v5044_v52  ;;  %v5048_v57 = vpop.eup %5047  ;;  %v1261_v19 = vmul.f32 %v5046_v54, %v1259_v5 }
0x100d   :  { %v941_v61 = vadd.f32 1.0, %v5048_v57  ;;  %v5050_v3 = vpop.eup %5049  ;;  %v1375_v57 = vrot.slane %v5696_v10, 6  ;;  %v4190_v10 = vld [vmem:[%s6432_s0 + $0x18] sm:$0xff] }
0x100e   :  { %1264 = vrot.lane.b32.xlu1 %v1262_v55, %s5412_s8  ;;  %v1251_v9 = vadd.f32 1.0, %v5050_v3 }
0x100f   :  { %5051 = vrcp.f32 %v941_v61  ;;  %v1376_v61 = vrot.slane %v5707_v38, 6 }
0x1019   :  { %v5052_v12 = vpop.eup %5051 }
0x1070   :  { %v951_v1 = vpop.permute.xlu1 %950 }
0x1071   :  { %v953_v2 = vadd.f32 %v951_v1, %v947_v62 }
0x1073   :  { %5053 = vtanh.f32 %v953_v2 }
0x1074   :  { %5055 = vrcp.f32 %v1251_v9 }
0x107d   :  { %v5054_v17 = vpop.eup %5053 }
0x107e   :  { %v955_v16 = vmul.f32 %v5054_v17, %v5052_v12  ;;  %v5056_v42 = vpop.eup %5055 }
0x1080   :  { %v1265_v21 = vpop.permute.xlu1 %1264  ;;  %v967_v22 = vrot.slane %v955_v16, 2 }
0x1081   :  { %v1267_v24 = vadd.f32 %v1265_v21, %v1261_v19 }
0x1082   :  { %v977_v23 = vsel %vm973_vm4, %v5750_v45, %v967_v22 }
0x1083   :  { %5057 = vtanh.f32 %v1267_v24  ;;  %1040 = vrot.lane.b32.xlu0 %v977_v23, %s5414_s11 }
0x108d   :  { %v5058_v30 = vpop.eup %5057 }
0x108e   :  { %v5788_v27 = vmul.f32 %v5058_v30, %v5056_v42 }
0x1090   :  { %1271 = vrot.lane.b32.xlu1 %v5788_v27, %s5412_s8 }
0x10f5   :  { %v5792_v20 = vpop.permute.xlu0 %1040 }
0x10f6   :  { %4194 = vmatmul.mubr.msk.f32.gmra.mrb[12].mxu0 %vm138_vm0, %v5792_v20 }
0x10f7   :  { %1343 = vmatprep.mubr.f32.mxu0 %v5413_v51 }
0x1102   :  { %v1272_v31 = vpop.permute.xlu1 %1271 }
0x1103   :  { %4200 = vmatmul.mubr.msk.f32.vlgmr.msra.gmra.mrb[14].mxu0 %vm147_vm1, %v1272_v31 }
0x1104   :  { %4526 = vmatpush1.bf16.msra.mxu0 %v5724_v49  ;;  %1543 = vmatprep.mubr.f32.mxu0 %v5413_v51 }
0x1105   :  { %4528 = vmatprep.subr.bf16.mxu0 %v5726_v53 }
0x1108   :  { %4530 = vmatpush1.bf16.msra.mxu0 %v5729_v56 }
0x1109   :  { %4532 = vmatprep.subr.bf16.mxu0 %v5733_v60 }
0x110c   :  { %4534 = vmatpush1.bf16.msra.mxu0 %v5735_v63 }
0x110d   :  { %4536 = vmatprep.subr.bf16.mxu0 %v5740_v6 }
0x1110   :  { %4538 = vmatpush1.bf16.msra.mxu0 %v5742_v18 }
0x1111   :  { %4556 = vmatprep.subr.bf16.mxu0 %v5714_v47 }
0x11c9   :  { %v5807_v45 = vpop.f32.mrb[12].mxu0 }
0x11ca   :  { %v5809_v29 = vpop.f32.mrb[13].mxu0 }
0x11d6   :  { %v1345_v37 = vpop.f32.mrb[14].mxu0 }
0x11d7   :  { %v1346_v32 = vadd.f32 %v1345_v37, %v1273_v36  ;;  %v1347_v44 = vpop.f32.mrb[15].mxu0 }
0x11d8   :  { %v1348_v33 = vadd.f32 %v1347_v44, %v1274_v43 }
0x11d9   :  { %v4201_v34 = vmul.f32 -1.442695, %v1346_v32 }
0x11da   :  { %v4202_v46 = vmul.f32 -1.442695, %v1348_v33 }
0x11db   :  { %5059 = vpow2.f32 %v4201_v34 }
0x11dc   :  { %5061 = vtanh.f32 %v1348_v33 }
0x11e5   :  { %v5060_v35 = vpop.eup %5059 }
0x11e6   :  { %v1356_v39 = vadd.f32 1.0, %v5060_v35  ;;  %v5062_v26 = vpop.eup %5061 }
0x11e8   :  { %5063 = vrcp.f32 %v1356_v39 }
0x11e9   :  { %5065 = vpow2.f32 %v4202_v46 }
0x11f2   :  { %v5064_v40 = vpop.eup %5063 }
0x11f3   :  { %v1364_v41 = vmul.f32 %v5064_v40, %v5062_v26  ;;  %v5066_v8 = vpop.eup %5065  ;;  %v1363_v14 = vmul.f32 %v5064_v40, %v1267_v24 }
0x11f4   :  { %v1357_v48 = vadd.f32 1.0, %v5066_v8 }
0x11f5   :  { %1366 = vrot.lane.b32.xlu0 %v1364_v41, %s5412_s8 }
0x11f6   :  { %5067 = vrcp.f32 %v1357_v48 }
0x1200   :  { %v5068_v52 = vpop.eup %5067 }
0x1267   :  { %v1367_v50 = vpop.permute.xlu0 %1366 }
0x1268   :  { %v1369_v15 = vadd.f32 %v1367_v50, %v1363_v14 }
0x126a   :  { %5069 = vtanh.f32 %v1369_v15 }
0x1274   :  { %v5070_v54 = vpop.eup %5069 }
0x1275   :  { %v1371_v55 = vmul.f32 %v5070_v54, %v5068_v52 }
0x1277   :  { %1373 = vrot.lane.b32.xlu1 %v1371_v55, %s5412_s8  ;;  %v1978_v31 = vrot.slane %v1371_v55, 6 }
0x1279   :  { %v1991_v43 = vsel %vm969_vm2, %v5788_v27, %v1978_v31 }
0x12e9   :  { %v1374_v7 = vpop.permute.xlu1 %1373 }
0x12ea   :  { %4203 = vmatmul.mubr.msk.f32.vlgmr.msra.gmra.mrb[8].mxu1 %vm147_vm1, %v1374_v7 }
0x12eb   :  { %4542 = vmatpush1.bf16.msra.mxu1 %v5724_v49  ;;  %1647 = vmatprep.mubr.f32.mxu1 %v5413_v51 }
0x12ec   :  { %4544 = vmatprep.subr.bf16.mxu1 %v5726_v53 }
0x12ef   :  { %4546 = vmatpush1.bf16.msra.mxu1 %v5729_v56 }
0x12f0   :  { %4548 = vmatprep.subr.bf16.mxu1 %v5733_v60 }
0x12f3   :  { %4550 = vmatpush1.bf16.msra.mxu1 %v5735_v63 }
0x12f4   :  { %4552 = vmatprep.subr.bf16.mxu1 %v5740_v6 }
0x12f7   :  { %4554 = vmatpush1.bf16.msra.mxu1 %v5742_v18 }
0x12f8   :  { %4572 = vmatprep.subr.bf16.mxu1 %v5714_v47 }
0x13bd   :  { %v1447_v59 = vpop.f32.mrb[8].mxu1 }
0x13be   :  { %v1448_v62 = vadd.f32 %v1447_v59, %v1375_v57  ;;  %v1449_v1 = vpop.f32.mrb[9].mxu1 }
0x13bf   :  { %v1450_v2 = vadd.f32 %v1449_v1, %v1376_v61 }
0x13c0   :  { %v4204_v3 = vmul.f32 -1.442695, %v1448_v62 }
0x13c1   :  { %v4205_v38 = vmul.f32 -1.442695, %v1450_v2 }
0x13c2   :  { %5071 = vpow2.f32 %v4204_v3 }
0x13c3   :  { %5073 = vtanh.f32 %v1450_v2 }
0x13cc   :  { %v5072_v12 = vpop.eup %5071 }
0x13cd   :  { %v1458_v17 = vadd.f32 1.0, %v5072_v12  ;;  %v5074_v5 = vpop.eup %5073 }
0x13cf   :  { %5075 = vrcp.f32 %v1458_v17 }
0x13d0   :  { %5077 = vpow2.f32 %v4205_v38 }
0x13d9   :  { %v5076_v9 = vpop.eup %5075 }
0x13da   :  { %v1466_v16 = vmul.f32 %v5076_v9, %v5074_v5  ;;  %v5078_v19 = vpop.eup %5077  ;;  %v1465_v22 = vmul.f32 %v5076_v9, %v1369_v15 }
0x13db   :  { %v1459_v21 = vadd.f32 1.0, %v5078_v19 }
0x13dc   :  { %1468 = vrot.lane.b32.xlu0 %v1466_v16, %s5412_s8 }
0x13dd   :  { %5079 = vrcp.f32 %v1459_v21 }
0x13e0   :  { %1018 = vperm.xlu0 %4916, %v4190_v10  }
0x13e7   :  { %v5080_v42 = vpop.eup %5079 }
0x144e   :  { %v1469_v24 = vpop.permute.xlu0 %1468 }
0x144f   :  { %v1471_v23 = vadd.f32 %v1469_v24, %v1465_v22 }
0x1451   :  { %5081 = vtanh.f32 %v1471_v23 }
0x145b   :  { %v5082_v30 = vpop.eup %5081 }
0x145c   :  { %v1473_v36 = vmul.f32 %v5082_v30, %v5080_v42 }
0x145e   :  { %1475 = vrot.lane.b32.xlu1 %v1473_v36, %s5412_s8  ;;  %v1980_v37 = vrot.slane %v1473_v36, 4 }
0x145f   :  { %v1019_v27 = vpop.permute.xlu0 %1018 }
0x1460   :  { %v1992_v32 = vsel %vm971_vm3, %v1991_v43, %v1980_v37  ;;  %v1034_v33 = vmul.f32 %v5685_v0, %v1019_v27  ;;  %v1035_v41 = vmul.f32 %v5699_v13, %v1019_v27 }
0x1462   :  { %v1119_v34 = vadd.f32 %v5807_v45, %v1034_v33  ;;  %v1121_v8 = vadd.f32 %v5809_v29, %v1035_v41 }
0x1464   :  { %v5848_v35 = vadd.f32 %v5692_v28, %v1119_v34 }
0x1466   :  { %v1577_v3 = vrot.slane %v5848_v35, 2  ;;  %v1679_v33 = vrot.slane %v5848_v35, 4 }
0x14d0   :  { %v1476_v44 = vpop.permute.xlu1 %1475 }
0x14d1   :  { %4206 = vmatmul.mubr.msk.f32.vlgmr.msra.gmra.mrb[16].mxu0 %vm147_vm1, %v1476_v44 }
0x14d2   :  { %4558 = vmatpush1.bf16.msra.mxu0 %v5724_v49  ;;  %1749 = vmatprep.mubr.f32.mxu0 %v5413_v51 }
0x14d3   :  { %4560 = vmatprep.subr.bf16.mxu0 %v5726_v53 }
0x14d6   :  { %4562 = vmatpush1.bf16.msra.mxu0 %v5729_v56 }
0x14d7   :  { %4564 = vmatprep.subr.bf16.mxu0 %v5733_v60 }
0x14da   :  { %4566 = vmatpush1.bf16.msra.mxu0 %v5735_v63 }
0x14db   :  { %4568 = vmatprep.subr.bf16.mxu0 %v5740_v6 }
0x14de   :  { %4570 = vmatpush1.bf16.msra.mxu0 %v5742_v18 }
0x14df   :  { %4588 = vmatprep.subr.bf16.mxu0 %v5714_v47  ;;  %v5854_v47 = vadd.f32 %v5704_v25, %v1121_v8 }
0x14e1   :  { %v1578_v16 = vrot.slane %v5854_v47, 2 }
0x15a4   :  { %v1545_v39 = vpop.f32.mrb[16].mxu0 }
0x15a5   :  { %v1546_v26 = vadd.f32 %v1545_v39, %v5848_v35  ;;  %v1547_v40 = vpop.f32.mrb[17].mxu0 }
0x15a6   :  { %v1548_v0 = vadd.f32 %v1547_v40, %v5854_v47  ;;  %v1680_v40 = vrot.slane %v5854_v47, 4 }
0x15a7   :  { %v4207_v46 = vmul.f32 -1.442695, %v1546_v26 }
0x15a8   :  { %v4208_v52 = vmul.f32 -1.442695, %v1548_v0 }
0x15a9   :  { %5083 = vpow2.f32 %v4207_v46 }
0x15aa   :  { %5085 = vtanh.f32 %v1548_v0 }
0x15b3   :  { %v5084_v48 = vpop.eup %5083 }
0x15b4   :  { %v1556_v45 = vadd.f32 1.0, %v5084_v48  ;;  %v5086_v14 = vpop.eup %5085 }
0x15b6   :  { %5087 = vrcp.f32 %v1556_v45 }
0x15b7   :  { %5089 = vpow2.f32 %v4208_v52 }
0x15c0   :  { %v5088_v50 = vpop.eup %5087 }
0x15c1   :  { %v1564_v15 = vmul.f32 %v5088_v50, %v5086_v14  ;;  %v5090_v13 = vpop.eup %5089  ;;  %v1563_v55 = vmul.f32 %v5088_v50, %v1471_v23 }
0x15c2   :  { %v1557_v54 = vadd.f32 1.0, %v5090_v13 }
0x15c3   :  { %1566 = vrot.lane.b32.xlu1 %v1564_v15, %s5412_s8 }
0x15c4   :  { %5091 = vrcp.f32 %v1557_v54 }
0x15ce   :  { %v5092_v57 = vpop.eup %5091 }
0x1635   :  { %v1567_v29 = vpop.permute.xlu1 %1566 }
0x1636   :  { %v1569_v7 = vadd.f32 %v1567_v29, %v1563_v55  ;;  %v4221_v55 = vld [vmem:[%s6432_s0 + $0x20] sm:$0xff] }
0x1637   :  { %v2022_v29 = vld [vmem:[#allocation2 + $0x80] sm:$0xff] }
0x1638   :  { %5093 = vtanh.f32 %v1569_v7 }
0x1642   :  { %v5094_v59 = vpop.eup %5093 }
0x1643   :  { %v1571_v61 = vmul.f32 %v5094_v59, %v5092_v57  ;;  %v2027_v57 = vld [vmem:[#allocation2 + $0xa8] sm:$0xff]  ;;  %v2029_v59 = vld [vmem:[#allocation2 + $0xb8] sm:$0xff] }
0x1645   :  { %1573 = vrot.lane.b32.xlu0 %v1571_v61, %s5412_s8  ;;  %v1982_v62 = vrot.slane %v1571_v61, 2 }
0x1647   :  { %v5860_v1 = vsel %vm973_vm4, %v1992_v32, %v1982_v62  ;;  %v4607_v62 = vpack.c.bf16 %v2029_v59, %v2027_v57  ;;  %v2005_v57 = vld [vmem:[#allocation4 + $0x100] sm:$0xff]  ;;  %v2007_v59 = vld [vmem:[#allocation4 + $0x110] sm:$0xff] }
0x16b7   :  { %v1574_v2 = vpop.permute.xlu0 %1573 }
0x16b8   :  { %4209 = vmatmul.mubr.msk.f32.vlgmr.msra.gmra.mrb[10].mxu1 %vm147_vm1, %v1574_v2  ;;  %v2026_v2 = vld [vmem:[#allocation2 + $0xa0] sm:$0xff] }
0x16b9   :  { %4574 = vmatpush1.bf16.msra.mxu1 %v5724_v49  ;;  %1851 = vmatprep.mubr.f32.mxu1 %v5413_v51 }
0x16ba   :  { %4576 = vmatprep.subr.bf16.mxu1 %v5726_v53 }
0x16bd   :  { %4578 = vmatpush1.bf16.msra.mxu1 %v5729_v56 }
0x16be   :  { %4580 = vmatprep.subr.bf16.mxu1 %v5733_v60 }
0x16c1   :  { %4582 = vmatpush1.bf16.msra.mxu1 %v5735_v63 }
0x16c2   :  { %4584 = vmatprep.subr.bf16.mxu1 %v5740_v6 }
0x16c5   :  { %4586 = vmatpush1.bf16.msra.mxu1 %v5742_v18 }
0x178b   :  { %v1649_v12 = vpop.f32.mrb[10].mxu1 }
0x178c   :  { %v1650_v17 = vadd.f32 %v1649_v12, %v1577_v3  ;;  %v1651_v5 = vpop.f32.mrb[11].mxu1  ;;  %v2028_v3 = vld [vmem:[#allocation2 + $0xb0] sm:$0xff] }
0x178d   :  { %v1652_v10 = vadd.f32 %v1651_v5, %v1578_v16  ;;  %v4223_v16 = vld [vmem:[%s6433_s1 + $0x4] sm:$0x3] }
0x178e   :  { %v4210_v9 = vmul.f32 -1.442695, %v1650_v17  ;;  %v4609_v17 = vpack.c.bf16 %v2028_v3, %v2026_v2  ;;  %v2010_v2 = vld [vmem:[#allocation4 + $0x128] sm:$0xff]  ;;  %v2012_v3 = vld [vmem:[#allocation4 + $0x138] sm:$0xff] }
0x178f   :  { %v4211_v23 = vmul.f32 -1.442695, %v1652_v10 }
0x1790   :  { %5095 = vpow2.f32 %v4210_v9  ;;  %v1781_v9 = vrot.slane %v5848_v35, 6 }
0x1791   :  { %5097 = vtanh.f32 %v1652_v10 }
0x179a   :  { %v5096_v38 = vpop.eup %5095 }
0x179b   :  { %v1660_v19 = vadd.f32 1.0, %v5096_v38  ;;  %v5098_v21 = vpop.eup %5097 }
0x179d   :  { %5099 = vrcp.f32 %v1660_v19 }
0x179e   :  { %5101 = vpow2.f32 %v4211_v23  ;;  %v4224_v23 = vld [vmem:[%s6435_s3 + $0x4] sm:$0x3] }
0x179f   :  { %v5918_v35 = vrot.slane %v4224_v23, %v5483_v4 }
0x17a7   :  { %v5100_v22 = vpop.eup %5099 }
0x17a8   :  { %v1668_v24 = vmul.f32 %v5100_v22, %v5098_v21  ;;  %v5102_v42 = vpop.eup %5101  ;;  %v1667_v31 = vmul.f32 %v5100_v22, %v1569_v7  ;;  %v2024_v7 = vld [vmem:[#allocation2 + $0x90] sm:$0xff]  ;;  %v5911_v21 = vrot.slane %v4223_v16, %v5483_v4 }
0x17a9   :  { %v1661_v30 = vadd.f32 1.0, %v5102_v42  ;;  %v4605_v61 = vpack.c.bf16 %v2024_v7, %v2022_v29 }
0x17aa   :  { %1670 = vrot.lane.b32.xlu1 %v1668_v24, %s5412_s8 }
0x17ab   :  { %5103 = vrcp.f32 %v1661_v30 }
0x17b5   :  { %v5104_v43 = vpop.eup %5103 }
0x181c   :  { %v1671_v36 = vpop.permute.xlu1 %1670 }
0x181d   :  { %v1673_v37 = vadd.f32 %v1671_v36, %v1667_v31 }
0x181f   :  { %5105 = vtanh.f32 %v1673_v37 }
0x1829   :  { %v5106_v32 = vpop.eup %5105 }
0x182a   :  { %v5874_v44 = vmul.f32 %v5106_v32, %v5104_v43  ;;  %v5925_v32 = vrot.slane %v4223_v16, %v5498_v11  ;;  %v2014_v16 = vld [vmem:[#allocation4 + $0x148] sm:$0xff] }
0x182c   :  { %1677 = vrot.lane.b32.xlu0 %v5874_v44, %s5412_s8 }
0x189e   :  { %v1678_v27 = vpop.permute.xlu0 %1677 }
0x189f   :  { %4212 = vmatmul.mubr.msk.f32.vlgmr.msra.gmra.mrb[18].mxu0 %vm147_vm1, %v1678_v27 }
0x18a0   :  { %4590 = vmatpush1.bf16.msra.mxu0 %v5724_v49  ;;  %1949 = vmatprep.mubr.f32.mxu0 %v5413_v51 }
0x18a1   :  { %4592 = vmatprep.subr.bf16.mxu0 %v5726_v53 }
0x18a4   :  { %4594 = vmatpush1.bf16.msra.mxu0 %v5729_v56 }
0x18a5   :  { %4596 = vmatprep.subr.bf16.mxu0 %v5733_v60 }
0x18a8   :  { %4598 = vmatpush1.bf16.msra.mxu0 %v5735_v63 }
0x18a9   :  { %4600 = vmatprep.subr.bf16.mxu0 %v5740_v6  ;;  %v2023_v6 = vld [vmem:[#allocation2 + $0x88] sm:$0xff] }
0x18ac   :  { %4602 = vmatpush1.bf16.msra.mxu0 %v5742_v18  ;;  %v2025_v18 = vld [vmem:[#allocation2 + $0x98] sm:$0xff] }
0x18ad   :  { %v4603_v8 = vpack.c.bf16 %v2025_v18, %v2023_v6 }
0x18af   :  { %4604 = vmatprep.subr.bf16.mxu1 %v4603_v8  ;;  %v2006_v8 = vld [vmem:[#allocation4 + $0x108] sm:$0xff] }
0x1972   :  { %v1751_v34 = vpop.f32.mrb[18].mxu0 }
0x1973   :  { %v1752_v39 = vadd.f32 %v1751_v34, %v1679_v33  ;;  %v1753_v26 = vpop.f32.mrb[19].mxu0 }
0x1974   :  { %v1754_v53 = vadd.f32 %v1753_v26, %v1680_v40  ;;  %v5930_v40 = vrot.slane %v4224_v23, %v5498_v11 }
0x1975   :  { %v4213_v49 = vmul.f32 -1.442695, %v1752_v39 }
0x1976   :  { %v4214_v0 = vmul.f32 -1.442695, %v1754_v53 }
0x1977   :  { %5107 = vpow2.f32 %v4213_v49 }
0x1978   :  { %5109 = vtanh.f32 %v1754_v53 }
0x1981   :  { %v5108_v41 = vpop.eup %5107 }
0x1982   :  { %v1762_v56 = vadd.f32 1.0, %v5108_v41  ;;  %v5110_v60 = vpop.eup %5109 }
0x1984   :  { %5111 = vrcp.f32 %v1762_v56 }
0x1985   :  { %5113 = vpow2.f32 %v4214_v0  ;;  %v2008_v0 = vld [vmem:[#allocation4 + $0x118] sm:$0xff] }
0x198e   :  { %v5112_v63 = vpop.eup %5111 }
0x198f   :  { %v1770_v46 = vmul.f32 %v5112_v63, %v5110_v60  ;;  %v5114_v48 = vpop.eup %5113  ;;  %v1769_v14 = vmul.f32 %v5112_v63, %v1673_v37  ;;  %v1782_v37 = vrot.slane %v5854_v47, 6 }
0x1990   :  { %v1763_v45 = vadd.f32 1.0, %v5114_v48  ;;  %v5940_v48 = vpack.c.bf16 %v2008_v0, %v2006_v8 }
0x1991   :  { %1772 = vrot.lane.b32.xlu1 %v1770_v46, %s5412_s8 }
0x1992   :  { %5115 = vrcp.f32 %v1763_v45  ;;  %4612 = vmatprep.subr.bf16.mxu0 %v5940_v48 }
0x1995   :  { %2057 = vrot.lane.b32.xlu1 %v5860_v1, %s5414_s11 }
0x199c   :  { %v5116_v52 = vpop.eup %5115 }
0x1a03   :  { %v1773_v50 = vpop.permute.xlu1 %1772 }
0x1a04   :  { %v5892_v15 = vadd.f32 %v1773_v50, %v1769_v14 }
0x1a06   :  { %5117 = vtanh.f32 %v5892_v15 }
0x1a07   :  { %v2058_v5 = vpop.permute.xlu1 %2057 }
0x1a10   :  { %v5118_v13 = vpop.eup %5117 }
0x1a11   :  { %v5895_v54 = vmul.f32 %v5118_v13, %v5116_v52 }
0x1a13   :  { %1779 = vrot.lane.b32.xlu0 %v5895_v54, %s5412_s8 }
0x1a17   :  { %2032 = vperm.xlu0 %4916, %v4221_v55  }
0x1a85   :  { %v1780_v12 = vpop.permute.xlu0 %1779 }
0x1a86   :  { %4215 = vmatmul.mubr.msk.f32.vlgmr.msra.gmra.mrb[12].mxu1 %vm147_vm1, %v1780_v12  ;;  %v5953_v12 = vpack.c.bf16 %v2012_v3, %v2010_v2 }
0x1a87   :  { %4606 = vmatpush1.bf16.msra.mxu1 %v4605_v61  ;;  %2129 = vmatprep.mubr.f32.mxu1 %v5413_v51  ;;  %v5949_v61 = vpack.c.bf16 %v2007_v59, %v2005_v57 }
0x1a88   :  { %4608 = vmatprep.subr.bf16.mxu1 %v4607_v62 }
0x1a8b   :  { %4610 = vmatpush1.bf16.msra.mxu1 %v4609_v17  ;;  %v2009_v17 = vld [vmem:[#allocation4 + $0x120] sm:$0xff] }
0x1a8c   :  { %4628 = vmatprep.subr.bf16.mxu1 %v5940_v48 }
0x1a8e   :  { %4225 = vmatmul.mubr.msk.f32.vlgmr.msra.gmra.mrb[14].mxu1 %vm138_vm0, %v2058_v5  ;;  %v2011_v5 = vld [vmem:[#allocation4 + $0x130] sm:$0xff] }
0x1a8f   :  { %2135 = vmatprep.mubr.f32.mxu1 %v5413_v51  ;;  %4630 = vmatpush1.bf16.msra.mxu1 %v5949_v61 }
0x1a90   :  { %4632 = vmatprep.subr.bf16.mxu1 %v5953_v12 }
0x1a96   :  { %v2033_v24 = vpop.permute.xlu0 %2032 }
0x1a97   :  { %v2051_v42 = vmul.f32 %v5911_v21, %v2033_v24  ;;  %v2052_v26 = vmul.f32 %v5925_v32, %v2033_v24 }
0x1b59   :  { %v1853_v10 = vpop.f32.mrb[12].mxu1 }
0x1b5a   :  { %v1854_v38 = vadd.f32 %v1853_v10, %v1781_v9  ;;  %v1855_v19 = vpop.f32.mrb[13].mxu1  ;;  %v2016_v10 = vld [vmem:[#allocation4 + $0x158] sm:$0xff] }
0x1b5b   :  { %v1856_v27 = vadd.f32 %v1855_v19, %v1782_v37  ;;  %v2013_v19 = vld [vmem:[#allocation4 + $0x140] sm:$0xff] }
0x1b5c   :  { %v4216_v22 = vmul.f32 -1.442695, %v1854_v38  ;;  %v5959_v38 = vpack.c.bf16 %v2016_v10, %v2014_v16 }
0x1b5d   :  { %v4217_v14 = vmul.f32 -1.442695, %v1856_v27 }
0x1b5e   :  { %5119 = vpow2.f32 %v4216_v22  ;;  %v2015_v22 = vld [vmem:[#allocation4 + $0x150] sm:$0xff] }
0x1b5f   :  { %v5961_v24 = vpack.c.bf16 %v2015_v22, %v2013_v19 }
0x1b61   :  { %v2131_v30 = vpop.f32.mrb[14].mxu1 }
0x1b62   :  { %v2132_v31 = vadd.f32 %v2131_v30, %v2051_v42  ;;  %v2133_v36 = vpop.f32.mrb[15].mxu1  ;;  %v2018_v42 = vld [vmem:[#allocation4 + $0x168] sm:$0xff]  ;;  %v2020_v30 = vld [vmem:[#allocation4 + $0x178] sm:$0xff] }
0x1b63   :  { %v2134_v49 = vadd.f32 %v2133_v36, %v2052_v26  ;;  %v1984_v36 = vrot.slane %v5895_v54, 6  ;;  %v5966_v37 = vpack.c.bf16 %v2020_v30, %v2018_v42 }
0x1b64   :  { %v5922_v43 = vadd.f32 %v5918_v35, %v2132_v31 }
0x1b65   :  { %v5933_v47 = vadd.f32 %v5930_v40, %v2134_v49  ;;  %v1994_v49 = vsel %vm969_vm2, %v5874_v44, %v1984_v36 }
0x1b66   :  { %v4227_v33 = vmul.f32 -1.442695, %v5922_v43 }
0x1b67   :  { %v4228_v50 = vmul.f32 -1.442695, %v5933_v47 }
0x1b68   :  { %v5120_v34 = vpop.eup %5119  ;;  %5121 = vpow2.f32 %v4227_v33  ;;  %v2019_v33 = vld [vmem:[#allocation4 + $0x170] sm:$0xff] }
0x1b69   :  { %v1864_v39 = vadd.f32 1.0, %v5120_v34  ;;  %5123 = vtanh.f32 %v1856_v27  ;;  %v2017_v27 = vld [vmem:[#allocation4 + $0x160] sm:$0xff] }
0x1b6b   :  { %5125 = vrcp.f32 %v1864_v39  ;;  %v5968_v39 = vpack.c.bf16 %v2019_v33, %v2017_v27 }
0x1b6c   :  { %5127 = vtanh.f32 %v5933_v47 }
0x1b72   :  { %v5122_v53 = vpop.eup %5121 }
0x1b73   :  { %v2163_v41 = vadd.f32 1.0, %v5122_v53  ;;  %v5124_v56 = vpop.eup %5123 }
0x1b75   :  { %v5126_v60 = vpop.eup %5125  ;;  %5129 = vrcp.f32 %v2163_v41 }
0x1b76   :  { %v1872_v63 = vmul.f32 %v5126_v60, %v5124_v56  ;;  %v5128_v46 = vpop.eup %5127  ;;  %v1871_v55 = vmul.f32 %v5126_v60, %v5892_v15  ;;  %v5955_v15 = vpack.c.bf16 %v2011_v5, %v2009_v17 }
0x1b78   :  { %1874 = vrot.lane.b32.xlu1 %v1872_v63, %s5412_s8  ;;  %4634 = vmatpush1.bf16.msra.mxu1 %v5955_v15 }
0x1b79   :  { %4636 = vmatprep.subr.bf16.mxu1 %v5959_v38 }
0x1b7c   :  { %4638 = vmatpush1.bf16.msra.mxu1 %v5961_v24 }
0x1b7d   :  { %4640 = vmatprep.subr.bf16.mxu1 %v5966_v37 }
0x1b7f   :  { %v5130_v6 = vpop.eup %5129 }
0x1b80   :  { %v5937_v18 = vmul.f32 %v5130_v6, %v5128_v46  ;;  %4642 = vmatpush1.bf16.msra.mxu1 %v5968_v39 }
0x1b81   :  { %4660 = vmatprep.subr.bf16.mxu1 %v5940_v48 }
0x1b82   :  { %5131 = vtanh.f32 %v5937_v18  ;;  %v2182_v60 = vsel %vm138_vm0, %v5937_v18, 0.0 }
0x1b83   :  { %5133 = vpow2.f32 %v4217_v14 }
0x1b84   :  { %5135 = vpow2.f32 %v4228_v50  ;;  %v2185_v50 = vrot.slane %v5922_v43, 2 }
0x1b8c   :  { %v5132_v45 = vpop.eup %5131 }
0x1b8d   :  { %2173 = vrot.lane.b32.xlu0 %v5132_v45, %s5412_s8  ;;  %v5134_v52 = vpop.eup %5133 }
0x1b8e   :  { %v1865_v13 = vadd.f32 1.0, %v5134_v52  ;;  %v5136_v62 = vpop.eup %5135 }
0x1b8f   :  { %v2164_v9 = vadd.f32 1.0, %v5136_v62 }
0x1b90   :  { %5137 = vrcp.f32 %v1865_v13 }
0x1b9a   :  { %v5138_v23 = vpop.eup %5137 }
0x1bea   :  { %v1875_v29 = vpop.permute.xlu1 %1874 }
0x1beb   :  { %v5947_v7 = vadd.f32 %v1875_v29, %v1871_v55  ;;  %v2186_v55 = vrot.slane %v5933_v47, 2 }
0x1bed   :  { %5139 = vtanh.f32 %v5947_v7 }
0x1bee   :  { %5141 = vrcp.f32 %v2164_v9 }
0x1bf7   :  { %v5140_v31 = vpop.eup %5139 }
0x1bf8   :  { %v1879_v34 = vmul.f32 %v5140_v31, %v5138_v23  ;;  %v5142_v53 = vpop.eup %5141 }
0x1bfa   :  { %1881 = vrot.lane.b32.xlu1 %v1879_v34, %s5412_s8  ;;  %v1986_v26 = vrot.slane %v1879_v34, 4 }
0x1bfc   :  { %v5977_v54 = vsel %vm971_vm3, %v1994_v49, %v1986_v26 }
0x1bff   :  { %v2174_v41 = vpop.permute.xlu0 %2173 }
0x1c00   :  { %v2176_v56 = vmul.f32 %v5142_v53, %v2174_v41 }
0x1c02   :  { %2178 = vrot.lane.b32.xlu0 %v2176_v56, %s5412_s8 }
0x1c06   :  { %2277 = vrot.lane.b32.xlu0 %v2182_v60, %s5412_s8 }
0x1c6c   :  { %v1882_v63 = vpop.permute.xlu1 %1881 }
0x1c6d   :  { %4218 = vmatmul.mubr.msk.f32.vlgmr.msra.gmra.mrb[20].mxu0 %vm147_vm1, %v1882_v63 }
0x1c6e   :  { %4614 = vmatpush1.bf16.msra.mxu0 %v5949_v61  ;;  %2256 = vmatprep.mubr.f32.mxu0 %v5413_v51 }
0x1c6f   :  { %4616 = vmatprep.subr.bf16.mxu0 %v5953_v12 }
0x1c72   :  { %4618 = vmatpush1.bf16.msra.mxu0 %v5955_v15 }
0x1c73   :  { %4620 = vmatprep.subr.bf16.mxu0 %v5959_v38 }
0x1c74   :  { %v2179_v44 = vpop.permute.xlu0 %2178 }
0x1c75   :  { %v2181_v46 = vsel %vm138_vm0, %v2179_v44, 0.0 }
0x1c76   :  { %4622 = vmatpush1.bf16.msra.mxu0 %v5961_v24 }
0x1c77   :  { %4624 = vmatprep.subr.bf16.mxu0 %v5966_v37 }
0x1c78   :  { %v2278_v34 = vpop.permute.xlu0 %2277 }
0x1c7a   :  { %4626 = vmatpush1.bf16.msra.mxu0 %v5968_v39 }
0x1c7b   :  { %4644 = vmatprep.subr.bf16.mxu0 %v5940_v48 }
0x1c7d   :  { %4229 = vmatmul.mubr.msk.f32.vlgmr.msra.gmra.mrb[22].mxu0 %vm147_vm1, %v2181_v46 }
0x1c7e   :  { %4646 = vmatpush1.bf16.msra.mxu0 %v5949_v61  ;;  %2464 = vmatprep.mubr.f32.mxu0 %v5413_v51 }
0x1c7f   :  { %4648 = vmatprep.subr.bf16.mxu0 %v5953_v12 }
0x1c82   :  { %4650 = vmatpush1.bf16.msra.mxu0 %v5955_v15 }
0x1c83   :  { %4652 = vmatprep.subr.bf16.mxu0 %v5959_v38 }
0x1c86   :  { %4654 = vmatpush1.bf16.msra.mxu0 %v5961_v24 }
0x1c87   :  { %4656 = vmatprep.subr.bf16.mxu0 %v5966_v37 }
0x1c8a   :  { %4658 = vmatpush1.bf16.msra.mxu0 %v5968_v39 }
0x1c8b   :  { %4676 = vmatprep.subr.bf16.mxu0 %v5940_v48 }
0x1d40   :  { %v1951_v6 = vpop.f32.mrb[20].mxu0 }
0x1d41   :  { %v1952_v18 = vadd.f32 %v1951_v6, %v5692_v28  ;;  %v1953_v8 = vpop.f32.mrb[21].mxu0 }
0x1d42   :  { %v1954_v45 = vadd.f32 %v1953_v8, %v5704_v25 }
0x1d43   :  { %v4219_v0 = vmul.f32 -1.442695, %v1952_v18 }
0x1d44   :  { %v4220_v10 = vmul.f32 -1.442695, %v1954_v45 }
0x1d45   :  { %5143 = vpow2.f32 %v4219_v0  ;;  %v2292_v0 = vrot.slane %v5922_v43, 4 }
0x1d46   :  { %5145 = vtanh.f32 %v1954_v45 }
0x1d4f   :  { %v5144_v14 = vpop.eup %5143 }
0x1d50   :  { %v1962_v52 = vadd.f32 1.0, %v5144_v14  ;;  %v2258_v13 = vpop.f32.mrb[22].mxu0  ;;  %v5146_v28 = vpop.eup %5145  ;;  %v2293_v14 = vrot.slane %v5933_v47, 4 }
0x1d51   :  { %v2259_v29 = vadd.f32 %v2258_v13, %v2185_v50  ;;  %v2260_v57 = vpop.f32.mrb[23].mxu0 }
0x1d52   :  { %5147 = vrcp.f32 %v1962_v52  ;;  %v2261_v59 = vadd.f32 %v2260_v57, %v2186_v55 }
0x1d53   :  { %v4230_v62 = vmul.f32 -1.442695, %v2259_v29 }
0x1d54   :  { %v4231_v22 = vmul.f32 -1.442695, %v2261_v59 }
0x1d55   :  { %5149 = vpow2.f32 %v4230_v62 }
0x1d56   :  { %5151 = vtanh.f32 %v2261_v59 }
0x1d5c   :  { %v5148_v2 = vpop.eup %5147 }
0x1d5d   :  { %v1970_v3 = vmul.f32 %v5148_v2, %v5146_v28  ;;  %v1969_v42 = vmul.f32 %v5148_v2, %v5947_v7 }
0x1d5f   :  { %v5150_v17 = vpop.eup %5149  ;;  %1972 = vrot.lane.b32.xlu1 %v1970_v3, %s5412_s8 }
0x1d60   :  { %v2269_v25 = vadd.f32 1.0, %v5150_v17  ;;  %v5152_v5 = vpop.eup %5151 }
0x1d62   :  { %5153 = vrcp.f32 %v2269_v25 }
0x1d63   :  { %5155 = vpow2.f32 %v4220_v10 }
0x1d64   :  { %5157 = vpow2.f32 %v4231_v22 }
0x1d6c   :  { %v5154_v9 = vpop.eup %5153 }
0x1d6d   :  { %v2281_v16 = vmul.f32 %v5154_v9, %v5152_v5  ;;  %v5156_v19 = vpop.eup %5155  ;;  %v2280_v53 = vmul.f32 %v5154_v9, %v2278_v34 }
0x1d6e   :  { %v1963_v23 = vadd.f32 1.0, %v5156_v19  ;;  %v5158_v36 = vpop.eup %5157 }
0x1d6f   :  { %2283 = vrot.lane.b32.xlu1 %v2281_v16, %s5412_s8  ;;  %v2270_v26 = vadd.f32 1.0, %v5158_v36 }
0x1d70   :  { %5159 = vrcp.f32 %v1963_v23  ;;  %v2394_v23 = vrot.slane %v5922_v43, 6  ;;  %v4222_v43 = vld [vmem:[%s6432_s0 + $0x28] sm:$0xff] }
0x1d7a   :  { %v5160_v27 = vpop.eup %5159 }
0x1dd1   :  { %v1973_v30 = vpop.permute.xlu1 %1972 }
0x1dd2   :  { %v1975_v31 = vadd.f32 %v1973_v30, %v1969_v42  ;;  %v2395_v30 = vrot.slane %v5933_v47, 6 }
0x1dd4   :  { %5161 = vtanh.f32 %v1975_v31 }
0x1dd5   :  { %5163 = vrcp.f32 %v2270_v26 }
0x1dde   :  { %v5162_v33 = vpop.eup %5161 }
0x1ddf   :  { %v1977_v49 = vmul.f32 %v5162_v33, %v5160_v27  ;;  %v5164_v7 = vpop.eup %5163 }
0x1de1   :  { %v2284_v41 = vpop.permute.xlu1 %2283  ;;  %v1989_v56 = vrot.slane %v1977_v49, 2 }
0x1de2   :  { %v2286_v60 = vadd.f32 %v2284_v41, %v2280_v53 }
0x1de3   :  { %v6013_v63 = vsel %vm973_vm4, %v5977_v54, %v1989_v56 }
0x1de4   :  { %5165 = vtanh.f32 %v2286_v60  ;;  %2059 = vrot.lane.b32.xlu0 %v6013_v63, %s5414_s11 }
0x1dee   :  { %v5166_v44 = vpop.eup %5165 }
0x1def   :  { %v6017_v46 = vmul.f32 %v5166_v44, %v5164_v7 }
0x1df1   :  { %2290 = vrot.lane.b32.xlu1 %v6017_v46, %s5412_s8 }
0x1e56   :  { %v2060_v6 = vpop.permute.xlu0 %2059 }
0x1e57   :  { %4226 = vmatmul.mubr.msk.f32.gmra.mrb[16].mxu1 %vm138_vm0, %v2060_v6 }
0x1e58   :  { %2362 = vmatprep.mubr.f32.mxu1 %v5413_v51 }
0x1e63   :  { %v2291_v18 = vpop.permute.xlu1 %2290 }
0x1e64   :  { %4232 = vmatmul.mubr.msk.f32.vlgmr.msra.gmra.mrb[18].mxu1 %vm147_vm1, %v2291_v18 }
0x1e65   :  { %4662 = vmatpush1.bf16.msra.mxu1 %v5949_v61  ;;  %2562 = vmatprep.mubr.f32.mxu1 %v5413_v51 }
0x1e66   :  { %4664 = vmatprep.subr.bf16.mxu1 %v5953_v12 }
0x1e69   :  { %4666 = vmatpush1.bf16.msra.mxu1 %v5955_v15 }
0x1e6a   :  { %4668 = vmatprep.subr.bf16.mxu1 %v5959_v38 }
0x1e6d   :  { %4670 = vmatpush1.bf16.msra.mxu1 %v5961_v24 }
0x1e6e   :  { %4672 = vmatprep.subr.bf16.mxu1 %v5966_v37 }
0x1e71   :  { %4674 = vmatpush1.bf16.msra.mxu1 %v5968_v39 }
0x1e72   :  { %4692 = vmatprep.subr.bf16.mxu1 %v5940_v48 }
0x1f2a   :  { %v6033_v54 = vpop.f32.mrb[16].mxu1 }
0x1f2b   :  { %v6035_v8 = vpop.f32.mrb[17].mxu1 }
0x1f37   :  { %v2364_v45 = vpop.f32.mrb[18].mxu1 }
0x1f38   :  { %v2365_v50 = vadd.f32 %v2364_v45, %v2292_v0  ;;  %v2366_v52 = vpop.f32.mrb[19].mxu1 }
0x1f39   :  { %v2367_v13 = vadd.f32 %v2366_v52, %v2293_v14 }
0x1f3a   :  { %v4233_v55 = vmul.f32 -1.442695, %v2365_v50 }
0x1f3b   :  { %v4234_v2 = vmul.f32 -1.442695, %v2367_v13 }
0x1f3c   :  { %5167 = vpow2.f32 %v4233_v55 }
0x1f3d   :  { %5169 = vtanh.f32 %v2367_v13 }
0x1f46   :  { %v5168_v29 = vpop.eup %5167 }
0x1f47   :  { %v2375_v57 = vadd.f32 1.0, %v5168_v29  ;;  %v5170_v59 = vpop.eup %5169 }
0x1f49   :  { %5171 = vrcp.f32 %v2375_v57 }
0x1f4a   :  { %5173 = vpow2.f32 %v4234_v2 }
0x1f53   :  { %v5172_v62 = vpop.eup %5171 }
0x1f54   :  { %v2383_v28 = vmul.f32 %v5172_v62, %v5170_v59  ;;  %v5174_v3 = vpop.eup %5173  ;;  %v2382_v25 = vmul.f32 %v5172_v62, %v2286_v60 }
0x1f55   :  { %v2376_v17 = vadd.f32 1.0, %v5174_v3 }
0x1f56   :  { %2385 = vrot.lane.b32.xlu0 %v2383_v28, %s5412_s8 }
0x1f57   :  { %5175 = vrcp.f32 %v2376_v17 }
0x1f61   :  { %v5176_v16 = vpop.eup %5175 }
0x1fc8   :  { %v2386_v5 = vpop.permute.xlu0 %2385 }
0x1fc9   :  { %v2388_v9 = vadd.f32 %v2386_v5, %v2382_v25 }
0x1fcb   :  { %5177 = vtanh.f32 %v2388_v9 }
0x1fd5   :  { %v5178_v10 = vpop.eup %5177 }
0x1fd6   :  { %v2390_v19 = vmul.f32 %v5178_v10, %v5176_v16 }
0x1fd8   :  { %2392 = vrot.lane.b32.xlu1 %v2390_v19, %s5412_s8  ;;  %v2997_v45 = vrot.slane %v2390_v19, 6 }
0x1fda   :  { %v3010_v52 = vsel %vm969_vm2, %v6017_v46, %v2997_v45 }
0x204a   :  { %v2393_v22 = vpop.permute.xlu1 %2392 }
0x204b   :  { %4235 = vmatmul.mubr.msk.f32.vlgmr.msra.gmra.mrb[24].mxu0 %vm147_vm1, %v2393_v22 }
0x204c   :  { %4678 = vmatpush1.bf16.msra.mxu0 %v5949_v61  ;;  %2666 = vmatprep.mubr.f32.mxu0 %v5413_v51 }
0x204d   :  { %4680 = vmatprep.subr.bf16.mxu0 %v5953_v12 }
0x2050   :  { %4682 = vmatpush1.bf16.msra.mxu0 %v5955_v15 }
0x2051   :  { %4684 = vmatprep.subr.bf16.mxu0 %v5959_v38 }
0x2054   :  { %4686 = vmatpush1.bf16.msra.mxu0 %v5961_v24 }
0x2055   :  { %4688 = vmatprep.subr.bf16.mxu0 %v5966_v37 }
0x2058   :  { %4690 = vmatpush1.bf16.msra.mxu0 %v5968_v39 }
0x2059   :  { %4708 = vmatprep.subr.bf16.mxu0 %v5940_v48 }
0x211e   :  { %v2466_v42 = vpop.f32.mrb[24].mxu0 }
0x211f   :  { %v2467_v31 = vadd.f32 %v2466_v42, %v2394_v23  ;;  %v2468_v36 = vpop.f32.mrb[25].mxu0 }
0x2120   :  { %v2469_v27 = vadd.f32 %v2468_v36, %v2395_v30 }
0x2121   :  { %v4236_v33 = vmul.f32 -1.442695, %v2467_v31 }
0x2122   :  { %v4237_v47 = vmul.f32 -1.442695, %v2469_v27 }
0x2123   :  { %5179 = vpow2.f32 %v4236_v33 }
0x2124   :  { %5181 = vtanh.f32 %v2469_v27 }
0x212d   :  { %v5180_v34 = vpop.eup %5179 }
0x212e   :  { %v2477_v26 = vadd.f32 1.0, %v5180_v34  ;;  %v5182_v49 = vpop.eup %5181 }
0x2130   :  { %5183 = vrcp.f32 %v2477_v26 }
0x2131   :  { %5185 = vpow2.f32 %v4237_v47 }
0x213a   :  { %v5184_v53 = vpop.eup %5183 }
0x213b   :  { %v2485_v41 = vmul.f32 %v5184_v53, %v5182_v49  ;;  %v5186_v56 = vpop.eup %5185  ;;  %v2484_v7 = vmul.f32 %v5184_v53, %v2388_v9 }
0x213c   :  { %v2478_v60 = vadd.f32 1.0, %v5186_v56 }
0x213d   :  { %2487 = vrot.lane.b32.xlu0 %v2485_v41, %s5412_s8 }
0x213e   :  { %5187 = vrcp.f32 %v2478_v60 }
0x2141   :  { %2037 = vperm.xlu0 %4916, %v4222_v43  }
0x2148   :  { %v5188_v18 = vpop.eup %5187 }
0x21af   :  { %v2488_v44 = vpop.permute.xlu0 %2487 }
0x21b0   :  { %v2490_v6 = vadd.f32 %v2488_v44, %v2484_v7 }
0x21b2   :  { %5189 = vtanh.f32 %v2490_v6 }
0x21bc   :  { %v5190_v0 = vpop.eup %5189 }
0x21bd   :  { %v2492_v14 = vmul.f32 %v5190_v0, %v5188_v18 }
0x21bf   :  { %2494 = vrot.lane.b32.xlu1 %v2492_v14, %s5412_s8  ;;  %v2999_v50 = vrot.slane %v2492_v14, 4 }
0x21c0   :  { %v2038_v46 = vpop.permute.xlu0 %2037 }
0x21c1   :  { %v3011_v13 = vsel %vm971_vm3, %v3010_v52, %v2999_v50  ;;  %v2053_v29 = vmul.f32 %v5911_v21, %v2038_v46  ;;  %v2054_v3 = vmul.f32 %v5925_v32, %v2038_v46 }
0x21c3   :  { %v2138_v57 = vadd.f32 %v6033_v54, %v2053_v29  ;;  %v2140_v25 = vadd.f32 %v6035_v8, %v2054_v3 }
0x21c5   :  { %v6074_v59 = vadd.f32 %v5918_v35, %v2138_v57 }
0x21c7   :  { %v2596_v26 = vrot.slane %v6074_v59, 2 }
0x2231   :  { %v2495_v55 = vpop.permute.xlu1 %2494 }
0x2232   :  { %4238 = vmatmul.mubr.msk.f32.vlgmr.msra.gmra.mrb[20].mxu1 %vm147_vm1, %v2495_v55 }
0x2233   :  { %4694 = vmatpush1.bf16.msra.mxu1 %v5949_v61  ;;  %2768 = vmatprep.mubr.f32.mxu1 %v5413_v51 }
0x2234   :  { %4696 = vmatprep.subr.bf16.mxu1 %v5953_v12 }
0x2237   :  { %4698 = vmatpush1.bf16.msra.mxu1 %v5955_v15 }
0x2238   :  { %4700 = vmatprep.subr.bf16.mxu1 %v5959_v38 }
0x223b   :  { %4702 = vmatpush1.bf16.msra.mxu1 %v5961_v24 }
0x223c   :  { %4704 = vmatprep.subr.bf16.mxu1 %v5966_v37 }
0x223f   :  { %4706 = vmatpush1.bf16.msra.mxu1 %v5968_v39 }
0x2240   :  { %4724 = vmatprep.subr.bf16.mxu1 %v5940_v48  ;;  %v6080_v48 = vadd.f32 %v5930_v40, %v2140_v25 }
0x2242   :  { %v2597_v47 = vrot.slane %v6080_v48, 2 }
0x2305   :  { %v2564_v62 = vpop.f32.mrb[20].mxu1 }
0x2306   :  { %v2565_v28 = vadd.f32 %v2564_v62, %v6074_v59  ;;  %v2566_v2 = vpop.f32.mrb[21].mxu1  ;;  %v2698_v62 = vrot.slane %v6074_v59, 4 }
0x2307   :  { %v2567_v21 = vadd.f32 %v2566_v2, %v6080_v48 }
0x2308   :  { %v4239_v17 = vmul.f32 -1.442695, %v2565_v28 }
0x2309   :  { %v4240_v19 = vmul.f32 -1.442695, %v2567_v21 }
0x230a   :  { %5191 = vpow2.f32 %v4239_v17  ;;  %v2699_v17 = vrot.slane %v6080_v48, 4 }
0x230b   :  { %5193 = vtanh.f32 %v2567_v21 }
0x2314   :  { %v5192_v5 = vpop.eup %5191 }
0x2315   :  { %v2575_v54 = vadd.f32 1.0, %v5192_v5  ;;  %v5194_v9 = vpop.eup %5193 }
0x2317   :  { %5195 = vrcp.f32 %v2575_v54 }
0x2318   :  { %5197 = vpow2.f32 %v4240_v19 }
0x2321   :  { %v5196_v16 = vpop.eup %5195 }
0x2322   :  { %v2583_v10 = vmul.f32 %v5196_v16, %v5194_v9  ;;  %v5198_v32 = vpop.eup %5197  ;;  %v2582_v23 = vmul.f32 %v5196_v16, %v2490_v6 }
0x2323   :  { %v2576_v22 = vadd.f32 1.0, %v5198_v32 }
0x2324   :  { %2585 = vrot.lane.b32.xlu1 %v2583_v10, %s5412_s8 }
0x2325   :  { %5199 = vrcp.f32 %v2576_v22 }
0x232f   :  { %v5200_v30 = vpop.eup %5199 }
0x2396   :  { %v2586_v8 = vpop.permute.xlu1 %2585 }
0x2397   :  { %v2588_v42 = vadd.f32 %v2586_v8, %v2582_v23 }
0x2399   :  { %5201 = vtanh.f32 %v2588_v42 }
0x23a3   :  { %v5202_v31 = vpop.eup %5201 }
0x23a4   :  { %v2590_v36 = vmul.f32 %v5202_v31, %v5200_v30  ;;  %v3041_v30 = vld [vmem:[#allocation2 + $0xc0] sm:$0xff]  ;;  %v3043_v31 = vld [vmem:[#allocation2 + $0xd0] sm:$0xff] }
0x23a6   :  { %2592 = vrot.lane.b32.xlu0 %v2590_v36, %s5412_s8  ;;  %v3001_v27 = vrot.slane %v2590_v36, 2  ;;  %v3046_v36 = vld [vmem:[#allocation2 + $0xe8] sm:$0xff] }
0x23a8   :  { %v6086_v33 = vsel %vm973_vm4, %v3011_v13, %v3001_v27  ;;  %v3048_v27 = vld [vmem:[#allocation2 + $0xf8] sm:$0xff] }
0x2418   :  { %v2593_v34 = vpop.permute.xlu0 %2592 }
0x2419   :  { %4241 = vmatmul.mubr.msk.f32.vlgmr.msra.gmra.mrb[26].mxu0 %vm147_vm1, %v2593_v34  ;;  %v4741_v34 = vpack.c.bf16 %v3043_v31, %v3041_v30 }
0x241a   :  { %4710 = vmatpush1.bf16.msra.mxu0 %v5949_v61  ;;  %2870 = vmatprep.mubr.f32.mxu0 %v5413_v51 }
0x241b   :  { %4712 = vmatprep.subr.bf16.mxu0 %v5953_v12 }
0x241e   :  { %4714 = vmatpush1.bf16.msra.mxu0 %v5955_v15 }
0x241f   :  { %4716 = vmatprep.subr.bf16.mxu0 %v5959_v38 }
0x2422   :  { %4718 = vmatpush1.bf16.msra.mxu0 %v5961_v24 }
0x2423   :  { %4720 = vmatprep.subr.bf16.mxu0 %v5966_v37 }
0x2426   :  { %4722 = vmatpush1.bf16.msra.mxu0 %v5968_v39 }
0x24ec   :  { %v2668_v49 = vpop.f32.mrb[26].mxu0 }
0x24ed   :  { %v2669_v53 = vadd.f32 %v2668_v49, %v2596_v26  ;;  %v2670_v41 = vpop.f32.mrb[27].mxu0  ;;  %v4743_v26 = vpack.c.bf16 %v3048_v27, %v3046_v36  ;;  %v3045_v49 = vld [vmem:[#allocation2 + $0xe0] sm:$0xff]  ;;  %v3026_v27 = vld [vmem:[#allocation4 + $0x190] sm:$0xff] }
0x24ee   :  { %v2671_v56 = vadd.f32 %v2670_v41, %v2597_v47  ;;  %v3024_v36 = vld [vmem:[#allocation4 + $0x180] sm:$0xff] }
0x24ef   :  { %v4242_v43 = vmul.f32 -1.442695, %v2669_v53  ;;  %v3047_v53 = vld [vmem:[#allocation2 + $0xf0] sm:$0xff] }
0x24f0   :  { %v4243_v0 = vmul.f32 -1.442695, %v2671_v56 }
0x24f1   :  { %5203 = vpow2.f32 %v4242_v43  ;;  %v4745_v43 = vpack.c.bf16 %v3047_v53, %v3045_v49  ;;  %v3029_v49 = vld [vmem:[#allocation4 + $0x1a8] sm:$0xff]  ;;  %v3031_v53 = vld [vmem:[#allocation4 + $0x1b8] sm:$0xff] }
0x24f2   :  { %5205 = vtanh.f32 %v2671_v56  ;;  %v2800_v56 = vrot.slane %v6074_v59, 6 }
0x24fb   :  { %v5204_v60 = vpop.eup %5203 }
0x24fc   :  { %v2679_v7 = vadd.f32 1.0, %v5204_v60  ;;  %v5206_v44 = vpop.eup %5205  ;;  %v4255_v60 = vld [vmem:[%s6433_s1 + $0x6] sm:$0x3] }
0x24fe   :  { %5207 = vrcp.f32 %v2679_v7 }
0x24ff   :  { %5209 = vpow2.f32 %v4243_v0 }
0x2508   :  { %v5208_v6 = vpop.eup %5207 }
0x2509   :  { %v2687_v18 = vmul.f32 %v5208_v6, %v5206_v44  ;;  %v5210_v45 = vpop.eup %5209  ;;  %v2686_v50 = vmul.f32 %v5208_v6, %v2588_v42  ;;  %v4253_v42 = vld [vmem:[%s6432_s0 + $0x30] sm:$0xff] }
0x250a   :  { %v2680_v14 = vadd.f32 1.0, %v5210_v45 }
0x250b   :  { %2689 = vrot.lane.b32.xlu1 %v2687_v18, %s5412_s8  ;;  %v6137_v18 = vrot.slane %v4255_v60, %v5483_v4 }
0x250c   :  { %5211 = vrcp.f32 %v2680_v14  ;;  %v4256_v14 = vld [vmem:[%s6435_s3 + $0x6] sm:$0x3] }
0x250d   :  { %v6144_v59 = vrot.slane %v4256_v14, %v5483_v4 }
0x2516   :  { %v5212_v55 = vpop.eup %5211 }
0x257d   :  { %v2690_v52 = vpop.permute.xlu1 %2689 }
0x257e   :  { %v2692_v13 = vadd.f32 %v2690_v52, %v2686_v50 }
0x2580   :  { %5213 = vtanh.f32 %v2692_v13 }
0x258a   :  { %v5214_v46 = vpop.eup %5213 }
0x258b   :  { %v6100_v29 = vmul.f32 %v5214_v46, %v5212_v55  ;;  %v2801_v46 = vrot.slane %v6080_v48, 6 }
0x258d   :  { %2696 = vrot.lane.b32.xlu0 %v6100_v29, %s5412_s8 }
0x25ff   :  { %v2697_v57 = vpop.permute.xlu0 %2696 }
0x2600   :  { %4244 = vmatmul.mubr.msk.f32.vlgmr.msra.gmra.mrb[22].mxu1 %vm147_vm1, %v2697_v57 }
0x2601   :  { %4726 = vmatpush1.bf16.msra.mxu1 %v5949_v61  ;;  %2968 = vmatprep.mubr.f32.mxu1 %v5413_v51 }
0x2602   :  { %4728 = vmatprep.subr.bf16.mxu1 %v5953_v12 }
0x2605   :  { %4730 = vmatpush1.bf16.msra.mxu1 %v5955_v15 }
0x2606   :  { %4732 = vmatprep.subr.bf16.mxu1 %v5959_v38 }
0x2609   :  { %4734 = vmatpush1.bf16.msra.mxu1 %v5961_v24 }
0x260a   :  { %4736 = vmatprep.subr.bf16.mxu1 %v5966_v37  ;;  %v3042_v37 = vld [vmem:[#allocation2 + $0xc8] sm:$0xff] }
0x260d   :  { %4738 = vmatpush1.bf16.msra.mxu1 %v5968_v39  ;;  %v3044_v39 = vld [vmem:[#allocation2 + $0xd8] sm:$0xff] }
0x260e   :  { %v4739_v5 = vpack.c.bf16 %v3044_v39, %v3042_v37 }
0x2610   :  { %4740 = vmatprep.subr.bf16.mxu0 %v4739_v5 }
0x26d3   :  { %v2770_v28 = vpop.f32.mrb[22].mxu1 }
0x26d4   :  { %v2771_v2 = vadd.f32 %v2770_v28, %v2698_v62  ;;  %v2772_v3 = vpop.f32.mrb[23].mxu1  ;;  %v6151_v62 = vrot.slane %v4255_v60, %v5498_v11  ;;  %v3033_v60 = vld [vmem:[#allocation4 + $0x1c8] sm:$0xff] }
0x26d5   :  { %v2773_v12 = vadd.f32 %v2772_v3, %v2699_v17 }
0x26d6   :  { %v4245_v61 = vmul.f32 -1.442695, %v2771_v2 }
0x26d7   :  { %v4246_v54 = vmul.f32 -1.442695, %v2773_v12 }
0x26d8   :  { %5215 = vpow2.f32 %v4245_v61 }
0x26d9   :  { %5217 = vtanh.f32 %v2773_v12  ;;  %v6156_v12 = vrot.slane %v4256_v14, %v5498_v11  ;;  %v3025_v11 = vld [vmem:[#allocation4 + $0x188] sm:$0xff] }
0x26e2   :  { %v5216_v25 = vpop.eup %5215 }
0x26e3   :  { %v2781_v15 = vadd.f32 1.0, %v5216_v25  ;;  %v5218_v38 = vpop.eup %5217 }
0x26e5   :  { %5219 = vrcp.f32 %v2781_v15 }
0x26e6   :  { %5221 = vpow2.f32 %v4246_v54  ;;  %v3027_v54 = vld [vmem:[#allocation4 + $0x198] sm:$0xff] }
0x26ef   :  { %v5220_v24 = vpop.eup %5219 }
0x26f0   :  { %v2789_v21 = vmul.f32 %v5220_v24, %v5218_v38  ;;  %v5222_v9 = vpop.eup %5221  ;;  %v2788_v10 = vmul.f32 %v5220_v24, %v2692_v13 }
0x26f1   :  { %v2782_v16 = vadd.f32 1.0, %v5222_v9  ;;  %v6166_v9 = vpack.c.bf16 %v3027_v54, %v3025_v11 }
0x26f2   :  { %2791 = vrot.lane.b32.xlu1 %v2789_v21, %s5412_s8 }
0x26f3   :  { %5223 = vrcp.f32 %v2782_v16  ;;  %4748 = vmatprep.subr.bf16.mxu1 %v6166_v9 }
0x26f6   :  { %3076 = vrot.lane.b32.xlu1 %v6086_v33, %s5414_s11 }
0x26fd   :  { %v5224_v22 = vpop.eup %5223 }
0x2764   :  { %v2792_v19 = vpop.permute.xlu1 %2791 }
0x2765   :  { %v6118_v32 = vadd.f32 %v2792_v19, %v2788_v10 }
0x2767   :  { %5225 = vtanh.f32 %v6118_v32 }
0x2768   :  { %v3077_v47 = vpop.permute.xlu1 %3076 }
0x2771   :  { %v5226_v23 = vpop.eup %5225 }
0x2772   :  { %v6121_v8 = vmul.f32 %v5226_v23, %v5224_v22 }
0x2774   :  { %2798 = vrot.lane.b32.xlu0 %v6121_v8, %s5412_s8 }
0x2778   :  { %3051 = vperm.xlu0 %4916, %v4253_v42  }
0x27e6   :  { %v2799_v41 = vpop.permute.xlu0 %2798 }
0x27e7   :  { %4247 = vmatmul.mubr.msk.f32.vlgmr.msra.gmra.mrb[28].mxu0 %vm147_vm1, %v2799_v41  ;;  %v6179_v41 = vpack.c.bf16 %v3031_v53, %v3029_v49 }
0x27e8   :  { %4742 = vmatpush1.bf16.msra.mxu0 %v4741_v34  ;;  %3148 = vmatprep.mubr.f32.mxu0 %v5413_v51  ;;  %v6175_v34 = vpack.c.bf16 %v3026_v27, %v3024_v36 }
0x27e9   :  { %4744 = vmatprep.subr.bf16.mxu0 %v4743_v26 }
0x27ec   :  { %4746 = vmatpush1.bf16.msra.mxu0 %v4745_v43  ;;  %v3028_v43 = vld [vmem:[#allocation4 + $0x1a0] sm:$0xff] }
0x27ed   :  { %4764 = vmatprep.subr.bf16.mxu0 %v6166_v9 }
0x27ef   :  { %4257 = vmatmul.mubr.msk.f32.vlgmr.msra.gmra.mrb[30].mxu0 %vm138_vm0, %v3077_v47  ;;  %v3030_v47 = vld [vmem:[#allocation4 + $0x1b0] sm:$0xff] }
0x27f0   :  { %3154 = vmatprep.mubr.f32.mxu0 %v5413_v51  ;;  %4766 = vmatpush1.bf16.msra.mxu0 %v6175_v34 }
0x27f1   :  { %4768 = vmatprep.subr.bf16.mxu0 %v6179_v41 }
0x27f7   :  { %v3052_v45 = vpop.permute.xlu0 %3051 }
0x27f8   :  { %v3070_v50 = vmul.f32 %v6137_v18, %v3052_v45  ;;  %v3071_v4 = vmul.f32 %v6151_v62, %v3052_v45 }
0x28ba   :  { %v2872_v7 = vpop.f32.mrb[28].mxu0 }
0x28bb   :  { %v2873_v44 = vadd.f32 %v2872_v7, %v2800_v56  ;;  %v2874_v6 = vpop.f32.mrb[29].mxu0  ;;  %v3035_v7 = vld [vmem:[#allocation4 + $0x1d8] sm:$0xff] }
0x28bc   :  { %v2875_v28 = vadd.f32 %v2874_v6, %v2801_v46  ;;  %v3032_v6 = vld [vmem:[#allocation4 + $0x1c0] sm:$0xff] }
0x28bd   :  { %v4248_v0 = vmul.f32 -1.442695, %v2873_v44  ;;  %v6185_v44 = vpack.c.bf16 %v3035_v7, %v3033_v60 }
0x28be   :  { %v4249_v10 = vmul.f32 -1.442695, %v2875_v28 }
0x28bf   :  { %5227 = vpow2.f32 %v4248_v0  ;;  %v3034_v0 = vld [vmem:[#allocation4 + $0x1d0] sm:$0xff] }
0x28c0   :  { %v6187_v45 = vpack.c.bf16 %v3034_v0, %v3032_v6 }
0x28c2   :  { %v3150_v52 = vpop.f32.mrb[30].mxu0 }
0x28c3   :  { %v3151_v13 = vadd.f32 %v3150_v52, %v3070_v50  ;;  %v3152_v55 = vpop.f32.mrb[31].mxu0  ;;  %v3037_v50 = vld [vmem:[#allocation4 + $0x1e8] sm:$0xff]  ;;  %v3039_v52 = vld [vmem:[#allocation4 + $0x1f8] sm:$0xff] }
0x28c4   :  { %v3153_v17 = vadd.f32 %v3152_v55, %v3071_v4  ;;  %v3003_v55 = vrot.slane %v6121_v8, 6  ;;  %v6192_v46 = vpack.c.bf16 %v3039_v52, %v3037_v50 }
0x28c5   :  { %v6148_v57 = vadd.f32 %v6144_v59, %v3151_v13 }
0x28c6   :  { %v6159_v48 = vadd.f32 %v6156_v12, %v3153_v17  ;;  %v3013_v17 = vsel %vm969_vm2, %v6100_v29, %v3003_v55 }
0x28c7   :  { %v4259_v2 = vmul.f32 -1.442695, %v6148_v57 }
0x28c8   :  { %v4260_v19 = vmul.f32 -1.442695, %v6159_v48 }
0x28c9   :  { %v5228_v3 = vpop.eup %5227  ;;  %5229 = vpow2.f32 %v4259_v2  ;;  %v3038_v2 = vld [vmem:[#allocation4 + $0x1f0] sm:$0xff] }
0x28ca   :  { %v2883_v61 = vadd.f32 1.0, %v5228_v3  ;;  %5231 = vtanh.f32 %v2875_v28  ;;  %v3036_v28 = vld [vmem:[#allocation4 + $0x1e0] sm:$0xff] }
0x28cc   :  { %5233 = vrcp.f32 %v2883_v61  ;;  %v6194_v61 = vpack.c.bf16 %v3038_v2, %v3036_v28 }
0x28cd   :  { %5235 = vtanh.f32 %v6159_v48 }
0x28d3   :  { %v5230_v25 = vpop.eup %5229 }
0x28d4   :  { %v3182_v15 = vadd.f32 1.0, %v5230_v25  ;;  %v5232_v38 = vpop.eup %5231 }
0x28d6   :  { %v5234_v24 = vpop.eup %5233  ;;  %5237 = vrcp.f32 %v3182_v15 }
0x28d7   :  { %v2891_v21 = vmul.f32 %v5234_v24, %v5232_v38  ;;  %v5236_v37 = vpop.eup %5235  ;;  %v2890_v42 = vmul.f32 %v5234_v24, %v6118_v32  ;;  %v6181_v32 = vpack.c.bf16 %v3030_v47, %v3028_v43 }
0x28d9   :  { %2893 = vrot.lane.b32.xlu1 %v2891_v21, %s5412_s8  ;;  %4770 = vmatpush1.bf16.msra.mxu0 %v6181_v32 }
0x28da   :  { %4772 = vmatprep.subr.bf16.mxu0 %v6185_v44 }
0x28dd   :  { %4774 = vmatpush1.bf16.msra.mxu0 %v6187_v45 }
0x28de   :  { %4776 = vmatprep.subr.bf16.mxu0 %v6192_v46 }
0x28e0   :  { %v5238_v39 = vpop.eup %5237 }
0x28e1   :  { %v6163_v5 = vmul.f32 %v5238_v39, %v5236_v37  ;;  %4778 = vmatpush1.bf16.msra.mxu0 %v6194_v61 }
0x28e2   :  { %4796 = vmatprep.subr.bf16.mxu0 %v6166_v9 }
0x28e3   :  { %5239 = vtanh.f32 %v6163_v5  ;;  %v3201_v24 = vsel %vm138_vm0, %v6163_v5, 0.0 }
0x28e4   :  { %5241 = vpow2.f32 %v4249_v10 }
0x28e5   :  { %5243 = vpow2.f32 %v4260_v19  ;;  %v3204_v19 = vrot.slane %v6148_v57, 2 }
0x28ed   :  { %v5240_v16 = vpop.eup %5239 }
0x28ee   :  { %3192 = vrot.lane.b32.xlu0 %v5240_v16, %s5412_s8  ;;  %v5242_v22 = vpop.eup %5241 }
0x28ef   :  { %v2884_v23 = vadd.f32 1.0, %v5242_v22  ;;  %v5244_v26 = vpop.eup %5243 }
0x28f0   :  { %v3183_v56 = vadd.f32 1.0, %v5244_v26 }
0x28f1   :  { %5245 = vrcp.f32 %v2884_v23 }
0x28fb   :  { %v5246_v14 = vpop.eup %5245 }
0x294b   :  { %v2894_v30 = vpop.permute.xlu1 %2893 }
0x294c   :  { %v6173_v31 = vadd.f32 %v2894_v30, %v2890_v42  ;;  %v3205_v42 = vrot.slane %v6159_v48, 2 }
0x294e   :  { %5247 = vtanh.f32 %v6173_v31 }
0x294f   :  { %5249 = vrcp.f32 %v3183_v56 }
0x2958   :  { %v5248_v13 = vpop.eup %5247 }
0x2959   :  { %v2898_v3 = vmul.f32 %v5248_v13, %v5246_v14  ;;  %v5250_v25 = vpop.eup %5249 }
0x295b   :  { %2900 = vrot.lane.b32.xlu1 %v2898_v3, %s5412_s8  ;;  %v3005_v4 = vrot.slane %v2898_v3, 4 }
0x295d   :  { %v6203_v8 = vsel %vm971_vm3, %v3013_v17, %v3005_v4 }
0x2960   :  { %v3193_v15 = vpop.permute.xlu0 %3192 }
0x2961   :  { %v3195_v38 = vmul.f32 %v5250_v25, %v3193_v15 }
0x2963   :  { %3197 = vrot.lane.b32.xlu0 %v3195_v38, %s5412_s8 }
0x2967   :  { %3296 = vrot.lane.b32.xlu0 %v3201_v24, %s5412_s8 }
0x29cd   :  { %v2901_v21 = vpop.permute.xlu1 %2900 }
0x29ce   :  { %4250 = vmatmul.mubr.msk.f32.vlgmr.msra.gmra.mrb[24].mxu1 %vm147_vm1, %v2901_v21 }
0x29cf   :  { %4750 = vmatpush1.bf16.msra.mxu1 %v6175_v34  ;;  %3275 = vmatprep.mubr.f32.mxu1 %v5413_v51 }
0x29d0   :  { %4752 = vmatprep.subr.bf16.mxu1 %v6179_v41 }
0x29d3   :  { %4754 = vmatpush1.bf16.msra.mxu1 %v6181_v32 }
0x29d4   :  { %4756 = vmatprep.subr.bf16.mxu1 %v6185_v44 }
0x29d5   :  { %v3198_v29 = vpop.permute.xlu0 %3197 }
0x29d6   :  { %v3200_v37 = vsel %vm138_vm0, %v3198_v29, 0.0 }
0x29d7   :  { %4758 = vmatpush1.bf16.msra.mxu1 %v6187_v45 }
0x29d8   :  { %4760 = vmatprep.subr.bf16.mxu1 %v6192_v46 }
0x29d9   :  { %v3297_v3 = vpop.permute.xlu0 %3296 }
0x29db   :  { %4762 = vmatpush1.bf16.msra.mxu1 %v6194_v61 }
0x29dc   :  { %4780 = vmatprep.subr.bf16.mxu1 %v6166_v9 }
0x29de   :  { %4261 = vmatmul.mubr.msk.f32.vlgmr.msra.gmra.mrb[26].mxu1 %vm147_vm1, %v3200_v37 }
0x29df   :  { %4782 = vmatpush1.bf16.msra.mxu1 %v6175_v34  ;;  %3483 = vmatprep.mubr.f32.mxu1 %v5413_v51 }
0x29e0   :  { %4784 = vmatprep.subr.bf16.mxu1 %v6179_v41 }
0x29e3   :  { %4786 = vmatpush1.bf16.msra.mxu1 %v6181_v32 }
0x29e4   :  { %4788 = vmatprep.subr.bf16.mxu1 %v6185_v44 }
0x29e7   :  { %4790 = vmatpush1.bf16.msra.mxu1 %v6187_v45 }
0x29e8   :  { %4792 = vmatprep.subr.bf16.mxu1 %v6192_v46 }
0x29eb   :  { %4794 = vmatpush1.bf16.msra.mxu1 %v6194_v61 }
0x29ec   :  { %4812 = vmatprep.subr.bf16.mxu1 %v6166_v9 }
0x2aa1   :  { %v2970_v39 = vpop.f32.mrb[24].mxu1 }
0x2aa2   :  { %v2971_v5 = vadd.f32 %v2970_v39, %v5918_v35  ;;  %v2972_v11 = vpop.f32.mrb[25].mxu1 }
0x2aa3   :  { %v2973_v16 = vadd.f32 %v2972_v11, %v5930_v40 }
0x2aa4   :  { %v4251_v54 = vmul.f32 -1.442695, %v2971_v5 }
0x2aa5   :  { %v4252_v7 = vmul.f32 -1.442695, %v2973_v16 }
0x2aa6   :  { %5251 = vpow2.f32 %v4251_v54  ;;  %v3311_v54 = vrot.slane %v6148_v57, 4 }
0x2aa7   :  { %5253 = vtanh.f32 %v2973_v16 }
0x2ab0   :  { %v5252_v10 = vpop.eup %5251 }
0x2ab1   :  { %v2981_v22 = vadd.f32 1.0, %v5252_v10  ;;  %v3277_v23 = vpop.f32.mrb[26].mxu1  ;;  %v5254_v35 = vpop.eup %5253  ;;  %v3312_v10 = vrot.slane %v6159_v48, 4 }
0x2ab2   :  { %v3278_v30 = vadd.f32 %v3277_v23, %v3204_v19  ;;  %v3279_v36 = vpop.f32.mrb[27].mxu1 }
0x2ab3   :  { %5255 = vrcp.f32 %v2981_v22  ;;  %v3280_v27 = vadd.f32 %v3279_v36, %v3205_v42 }
0x2ab4   :  { %v4262_v26 = vmul.f32 -1.442695, %v3278_v30 }
0x2ab5   :  { %v4263_v0 = vmul.f32 -1.442695, %v3280_v27 }
0x2ab6   :  { %5257 = vpow2.f32 %v4262_v26 }
0x2ab7   :  { %5259 = vtanh.f32 %v3280_v27 }
0x2abd   :  { %v5256_v49 = vpop.eup %5255 }
0x2abe   :  { %v2989_v53 = vmul.f32 %v5256_v49, %v5254_v35  ;;  %v2988_v50 = vmul.f32 %v5256_v49, %v6173_v31 }
0x2ac0   :  { %v5258_v43 = vpop.eup %5257  ;;  %2991 = vrot.lane.b32.xlu1 %v2989_v53, %s5412_s8 }
0x2ac1   :  { %v3288_v40 = vadd.f32 1.0, %v5258_v43  ;;  %v5260_v47 = vpop.eup %5259 }
0x2ac3   :  { %5261 = vrcp.f32 %v3288_v40 }
0x2ac4   :  { %5263 = vpow2.f32 %v4252_v7 }
0x2ac5   :  { %5265 = vpow2.f32 %v4263_v0 }
0x2acd   :  { %v5262_v56 = vpop.eup %5261 }
0x2ace   :  { %v3300_v60 = vmul.f32 %v5262_v56, %v5260_v47  ;;  %v5264_v6 = vpop.eup %5263  ;;  %v3299_v25 = vmul.f32 %v5262_v56, %v3297_v3 }
0x2acf   :  { %v2982_v14 = vadd.f32 1.0, %v5264_v6  ;;  %v5266_v55 = vpop.eup %5265 }
0x2ad0   :  { %3302 = vrot.lane.b32.xlu1 %v3300_v60, %s5412_s8  ;;  %v3289_v4 = vadd.f32 1.0, %v5266_v55 }
0x2ad1   :  { %5267 = vrcp.f32 %v2982_v14  ;;  %v3413_v14 = vrot.slane %v6148_v57, 6  ;;  %v4254_v57 = vld [vmem:[%s6432_s0 + $0x38] sm:$0xff] }
0x2adb   :  { %v5268_v28 = vpop.eup %5267 }
0x2b32   :  { %v2992_v52 = vpop.permute.xlu1 %2991 }
0x2b33   :  { %v2994_v13 = vadd.f32 %v2992_v52, %v2988_v50  ;;  %v3414_v52 = vrot.slane %v6159_v48, 6 }
0x2b35   :  { %5269 = vtanh.f32 %v2994_v13 }
0x2b36   :  { %5271 = vrcp.f32 %v3289_v4 }
0x2b3f   :  { %v5270_v2 = vpop.eup %5269 }
0x2b40   :  { %v2996_v17 = vmul.f32 %v5270_v2, %v5268_v28  ;;  %v5272_v31 = vpop.eup %5271 }
0x2b42   :  { %v3303_v15 = vpop.permute.xlu1 %3302  ;;  %v3008_v38 = vrot.slane %v2996_v17, 2 }
0x2b43   :  { %v3305_v24 = vadd.f32 %v3303_v15, %v3299_v25 }
0x2b44   :  { %v6239_v21 = vsel %vm973_vm4, %v6203_v8, %v3008_v38 }
0x2b45   :  { %5273 = vtanh.f32 %v3305_v24  ;;  %3078 = vrot.lane.b32.xlu0 %v6239_v21, %s5414_s11 }
0x2b4f   :  { %v5274_v29 = vpop.eup %5273 }
0x2b50   :  { %v6243_v37 = vmul.f32 %v5274_v29, %v5272_v31 }
0x2b52   :  { %3309 = vrot.lane.b32.xlu1 %v6243_v37, %s5412_s8 }
0x2bb7   :  { %v3079_v39 = vpop.permute.xlu0 %3078 }
0x2bb8   :  { %4258 = vmatmul.mubr.msk.f32.gmra.mrb[32].mxu0 %vm138_vm0, %v3079_v39 }
0x2bb9   :  { %3381 = vmatprep.mubr.f32.mxu0 %v5413_v51 }
0x2bc4   :  { %v3310_v5 = vpop.permute.xlu1 %3309 }
0x2bc5   :  { %4264 = vmatmul.mubr.msk.f32.vlgmr.msra.gmra.mrb[34].mxu0 %vm147_vm1, %v3310_v5 }
0x2bc6   :  { %4798 = vmatpush1.bf16.msra.mxu0 %v6175_v34  ;;  %3581 = vmatprep.mubr.f32.mxu0 %v5413_v51 }
0x2bc7   :  { %4800 = vmatprep.subr.bf16.mxu0 %v6179_v41 }
0x2bca   :  { %4802 = vmatpush1.bf16.msra.mxu0 %v6181_v32 }
0x2bcb   :  { %4804 = vmatprep.subr.bf16.mxu0 %v6185_v44 }
0x2bce   :  { %4806 = vmatpush1.bf16.msra.mxu0 %v6187_v45 }
0x2bcf   :  { %4808 = vmatprep.subr.bf16.mxu0 %v6192_v46 }
0x2bd2   :  { %4810 = vmatpush1.bf16.msra.mxu0 %v6194_v61 }
0x2bd3   :  { %4828 = vmatprep.subr.bf16.mxu0 %v6166_v9 }
0x2c8b   :  { %v6259_v8 = vpop.f32.mrb[32].mxu0 }
0x2c8c   :  { %v6261_v11 = vpop.f32.mrb[33].mxu0 }
0x2c98   :  { %v3383_v16 = vpop.f32.mrb[34].mxu0 }
0x2c99   :  { %v3384_v19 = vadd.f32 %v3383_v16, %v3311_v54  ;;  %v3385_v22 = vpop.f32.mrb[35].mxu0 }
0x2c9a   :  { %v3386_v23 = vadd.f32 %v3385_v22, %v3312_v10 }
0x2c9b   :  { %v4265_v42 = vmul.f32 -1.442695, %v3384_v19 }
0x2c9c   :  { %v4266_v49 = vmul.f32 -1.442695, %v3386_v23 }
0x2c9d   :  { %5275 = vpow2.f32 %v4265_v42 }
0x2c9e   :  { %5277 = vtanh.f32 %v3386_v23 }
0x2ca7   :  { %v5276_v30 = vpop.eup %5275 }
0x2ca8   :  { %v3394_v36 = vadd.f32 1.0, %v5276_v30  ;;  %v5278_v27 = vpop.eup %5277 }
0x2caa   :  { %5279 = vrcp.f32 %v3394_v36 }
0x2cab   :  { %5281 = vpow2.f32 %v4266_v49 }
0x2cb4   :  { %v5280_v26 = vpop.eup %5279 }
0x2cb5   :  { %v3402_v35 = vmul.f32 %v5280_v26, %v5278_v27  ;;  %v5282_v53 = vpop.eup %5281  ;;  %v3401_v40 = vmul.f32 %v5280_v26, %v3305_v24 }
0x2cb6   :  { %v3395_v43 = vadd.f32 1.0, %v5282_v53 }
0x2cb7   :  { %3404 = vrot.lane.b32.xlu0 %v3402_v35, %s5412_s8 }
0x2cb8   :  { %5283 = vrcp.f32 %v3395_v43 }
0x2cc2   :  { %v5284_v60 = vpop.eup %5283 }
0x2d29   :  { %v3405_v47 = vpop.permute.xlu0 %3404 }
0x2d2a   :  { %v3407_v56 = vadd.f32 %v3405_v47, %v3401_v40 }
0x2d2c   :  { %5285 = vtanh.f32 %v3407_v56 }
0x2d36   :  { %v5286_v7 = vpop.eup %5285 }
0x2d37   :  { %v3409_v6 = vmul.f32 %v5286_v7, %v5284_v60 }
0x2d39   :  { %3411 = vrot.lane.b32.xlu1 %v3409_v6, %s5412_s8  ;;  %v4016_v16 = vrot.slane %v3409_v6, 6 }
0x2d3b   :  { %v4029_v22 = vsel %vm969_vm2, %v6243_v37, %v4016_v16 }
0x2dab   :  { %v3412_v0 = vpop.permute.xlu1 %3411 }
0x2dac   :  { %4267 = vmatmul.mubr.msk.f32.vlgmr.msra.gmra.mrb[28].mxu1 %vm147_vm1, %v3412_v0 }
0x2dad   :  { %4814 = vmatpush1.bf16.msra.mxu1 %v6175_v34  ;;  %3685 = vmatprep.mubr.f32.mxu1 %v5413_v51 }
0x2dae   :  { %4816 = vmatprep.subr.bf16.mxu1 %v6179_v41 }
0x2db1   :  { %4818 = vmatpush1.bf16.msra.mxu1 %v6181_v32 }
0x2db2   :  { %4820 = vmatprep.subr.bf16.mxu1 %v6185_v44 }
0x2db5   :  { %4822 = vmatpush1.bf16.msra.mxu1 %v6187_v45 }
0x2db6   :  { %4824 = vmatprep.subr.bf16.mxu1 %v6192_v46 }
0x2db9   :  { %4826 = vmatpush1.bf16.msra.mxu1 %v6194_v61 }
0x2dba   :  { %4844 = vmatprep.subr.bf16.mxu1 %v6166_v9 }
0x2e7f   :  { %v3485_v50 = vpop.f32.mrb[28].mxu1 }
0x2e80   :  { %v3486_v13 = vadd.f32 %v3485_v50, %v3413_v14  ;;  %v3487_v55 = vpop.f32.mrb[29].mxu1 }
0x2e81   :  { %v3488_v28 = vadd.f32 %v3487_v55, %v3414_v52 }
0x2e82   :  { %v4268_v2 = vmul.f32 -1.442695, %v3486_v13 }
0x2e83   :  { %v4269_v48 = vmul.f32 -1.442695, %v3488_v28 }
0x2e84   :  { %5287 = vpow2.f32 %v4268_v2 }
0x2e85   :  { %5289 = vtanh.f32 %v3488_v28 }
0x2e8e   :  { %v5288_v3 = vpop.eup %5287 }
0x2e8f   :  { %v3496_v4 = vadd.f32 1.0, %v5288_v3  ;;  %v5290_v17 = vpop.eup %5289 }
0x2e91   :  { %5291 = vrcp.f32 %v3496_v4 }
0x2e92   :  { %5293 = vpow2.f32 %v4269_v48 }
0x2e9b   :  { %v5292_v25 = vpop.eup %5291 }
0x2e9c   :  { %v3504_v15 = vmul.f32 %v5292_v25, %v5290_v17  ;;  %v5294_v38 = vpop.eup %5293  ;;  %v3503_v31 = vmul.f32 %v5292_v25, %v3407_v56 }
0x2e9d   :  { %v3497_v24 = vadd.f32 1.0, %v5294_v38 }
0x2e9e   :  { %3506 = vrot.lane.b32.xlu0 %v3504_v15, %s5412_s8 }
0x2e9f   :  { %5295 = vrcp.f32 %v3497_v24 }
0x2ea2   :  { %3056 = vperm.xlu0 %4916, %v4254_v57  }
0x2ea9   :  { %v5296_v5 = vpop.eup %5295 }
0x2f10   :  { %v3507_v29 = vpop.permute.xlu0 %3506 }
0x2f11   :  { %v3509_v39 = vadd.f32 %v3507_v29, %v3503_v31 }
0x2f13   :  { %5297 = vtanh.f32 %v3509_v39 }
0x2f1d   :  { %v5298_v54 = vpop.eup %5297 }
0x2f1e   :  { %v3511_v10 = vmul.f32 %v5298_v54, %v5296_v5 }
0x2f20   :  { %3513 = vrot.lane.b32.xlu1 %v3511_v10, %s5412_s8  ;;  %v4018_v19 = vrot.slane %v3511_v10, 4 }
0x2f21   :  { %v3057_v37 = vpop.permute.xlu0 %3056 }
0x2f22   :  { %v4030_v23 = vsel %vm971_vm3, %v4029_v22, %v4018_v19  ;;  %v3072_v30 = vmul.f32 %v6137_v18, %v3057_v37  ;;  %v3073_v53 = vmul.f32 %v6151_v62, %v3057_v37 }
0x2f24   :  { %v3157_v36 = vadd.f32 %v6259_v8, %v3072_v30  ;;  %v3159_v40 = vadd.f32 %v6261_v11, %v3073_v53 }
0x2f26   :  { %v6300_v27 = vadd.f32 %v6144_v59, %v3157_v36 }
0x2f28   :  { %v3615_v4 = vrot.slane %v6300_v27, 2 }
0x2f92   :  { %v3514_v42 = vpop.permute.xlu1 %3513 }
0x2f93   :  { %4270 = vmatmul.mubr.msk.f32.vlgmr.msra.gmra.mrb[36].mxu0 %vm147_vm1, %v3514_v42 }
0x2f94   :  { %4830 = vmatpush1.bf16.msra.mxu0 %v6175_v34  ;;  %3787 = vmatprep.mubr.f32.mxu0 %v5413_v51 }
0x2f95   :  { %4832 = vmatprep.subr.bf16.mxu0 %v6179_v41 }
0x2f98   :  { %4834 = vmatpush1.bf16.msra.mxu0 %v6181_v32 }
0x2f99   :  { %4836 = vmatprep.subr.bf16.mxu0 %v6185_v44 }
0x2f9c   :  { %4838 = vmatpush1.bf16.msra.mxu0 %v6187_v45 }
0x2f9d   :  { %4840 = vmatprep.subr.bf16.mxu0 %v6192_v46 }
0x2fa0   :  { %4842 = vmatpush1.bf16.msra.mxu0 %v6194_v61 }
0x2fa1   :  { %4860 = vmatprep.subr.bf16.mxu0 %v6166_v9  ;;  %v6306_v9 = vadd.f32 %v6156_v12, %v3159_v40 }
0x2fa3   :  { %v3616_v48 = vrot.slane %v6306_v9, 2 }
0x3066   :  { %v3583_v26 = vpop.f32.mrb[36].mxu0 }
0x3067   :  { %v3584_v35 = vadd.f32 %v3583_v26, %v6300_v27  ;;  %v3585_v49 = vpop.f32.mrb[37].mxu0  ;;  %v3717_v26 = vrot.slane %v6300_v27, 4 }
0x3068   :  { %v3586_v18 = vadd.f32 %v3585_v49, %v6306_v9 }
0x3069   :  { %v4271_v43 = vmul.f32 -1.442695, %v3584_v35 }
0x306a   :  { %v4272_v6 = vmul.f32 -1.442695, %v3586_v18 }
0x306b   :  { %5299 = vpow2.f32 %v4271_v43 }
0x306c   :  { %5301 = vtanh.f32 %v3586_v18 }
0x3075   :  { %v5300_v47 = vpop.eup %5299 }
0x3076   :  { %v3594_v8 = vadd.f32 1.0, %v5300_v47  ;;  %v5302_v56 = vpop.eup %5301 }
0x3078   :  { %5303 = vrcp.f32 %v3594_v8 }
0x3079   :  { %5305 = vpow2.f32 %v4272_v6 }
0x3082   :  { %v5304_v60 = vpop.eup %5303 }
0x3083   :  { %v3602_v7 = vmul.f32 %v5304_v60, %v5302_v56  ;;  %v5306_v62 = vpop.eup %5305  ;;  %v3601_v14 = vmul.f32 %v5304_v60, %v3509_v39 }
0x3084   :  { %v3595_v0 = vadd.f32 1.0, %v5306_v62 }
0x3085   :  { %3604 = vrot.lane.b32.xlu1 %v3602_v7, %s5412_s8 }
0x3086   :  { %5307 = vrcp.f32 %v3595_v0  ;;  %v3819_v0 = vrot.slane %v6300_v27, 6 }
0x3090   :  { %v5308_v52 = vpop.eup %5307 }
0x30f7   :  { %v3605_v11 = vpop.permute.xlu1 %3604 }
0x30f8   :  { %v3607_v50 = vadd.f32 %v3605_v11, %v3601_v14 }
0x30fa   :  { %5309 = vtanh.f32 %v3607_v50 }
0x3104   :  { %v5310_v13 = vpop.eup %5309 }
0x3105   :  { %v3609_v55 = vmul.f32 %v5310_v13, %v5308_v52  ;;  %v3820_v13 = vrot.slane %v6306_v9, 6 }
0x3107   :  { %3611 = vrot.lane.b32.xlu0 %v3609_v55, %s5412_s8  ;;  %v4020_v28 = vrot.slane %v3609_v55, 2 }
0x3109   :  { %v6312_v2 = vsel %vm973_vm4, %v4030_v23, %v4020_v28 }
0x3179   :  { %v3612_v3 = vpop.permute.xlu0 %3611 }
0x317a   :  { %4273 = vmatmul.mubr.msk.f32.vlgmr.msra.gmra.mrb[30].mxu1 %vm147_vm1, %v3612_v3 }
0x317b   :  { %4846 = vmatpush1.bf16.msra.mxu1 %v6175_v34  ;;  %3889 = vmatprep.mubr.f32.mxu1 %v5413_v51 }
0x317c   :  { %4848 = vmatprep.subr.bf16.mxu1 %v6179_v41 }
0x317f   :  { %4850 = vmatpush1.bf16.msra.mxu1 %v6181_v32 }
0x3180   :  { %4852 = vmatprep.subr.bf16.mxu1 %v6185_v44 }
0x3183   :  { %4854 = vmatpush1.bf16.msra.mxu1 %v6187_v45 }
0x3184   :  { %4856 = vmatprep.subr.bf16.mxu1 %v6192_v46 }
0x3187   :  { %4858 = vmatpush1.bf16.msra.mxu1 %v6194_v61 }
0x324d   :  { %v3687_v17 = vpop.f32.mrb[30].mxu1 }
0x324e   :  { %v3688_v25 = vadd.f32 %v3687_v17, %v3615_v4  ;;  %v3689_v15 = vpop.f32.mrb[31].mxu1 }
0x324f   :  { %v3690_v38 = vadd.f32 %v3689_v15, %v3616_v48 }
0x3250   :  { %v4274_v57 = vmul.f32 -1.442695, %v3688_v25 }
0x3251   :  { %v4275_v54 = vmul.f32 -1.442695, %v3690_v38 }
0x3252   :  { %5311 = vpow2.f32 %v4274_v57 }
0x3253   :  { %5313 = vtanh.f32 %v3690_v38 }
0x325c   :  { %v5312_v24 = vpop.eup %5311 }
0x325d   :  { %v3698_v31 = vadd.f32 1.0, %v5312_v24  ;;  %v5314_v29 = vpop.eup %5313 }
0x325f   :  { %5315 = vrcp.f32 %v3698_v31 }
0x3260   :  { %5317 = vpow2.f32 %v4275_v54 }
0x3269   :  { %v5316_v39 = vpop.eup %5315 }
0x326a   :  { %v3706_v5 = vmul.f32 %v5316_v39, %v5314_v29  ;;  %v5318_v16 = vpop.eup %5317  ;;  %v3705_v19 = vmul.f32 %v5316_v39, %v3607_v50 }
0x326b   :  { %v3699_v10 = vadd.f32 1.0, %v5318_v16  ;;  %v4917_v16 = vpack.i.bf16 %v6013_v63, %v5860_v1  ;;  %v4058_v1 = vld [vmem:[%s6437_s5 + $0x10] sm:$0xff] }
0x326c   :  { %3708 = vrot.lane.b32.xlu1 %v3706_v5, %s5412_s8 }
0x326d   :  { %5319 = vrcp.f32 %v3699_v10 }
0x3277   :  { %v5320_v42 = vpop.eup %5319 }
0x32de   :  { %v3709_v22 = vpop.permute.xlu1 %3708 }
0x32df   :  { %v3711_v23 = vadd.f32 %v3709_v22, %v3705_v19  ;;  %v4056_v22 = vld [vmem:[%s6437_s5] sm:$0xff] }
0x32e1   :  { %5321 = vtanh.f32 %v3711_v23 }
0x32eb   :  { %v5322_v37 = vpop.eup %5321 }
0x32ec   :  { %v6326_v30 = vmul.f32 %v5322_v37, %v5320_v42  ;;  %v4059_v42 = vld [vmem:[%s6437_s5 + $0x18] sm:$0xff] }
0x32ed   :  { %v4879_v37 = vpack.c.bf16 %v4059_v42, %v4058_v1 }
0x32ee   :  { %3715 = vrot.lane.b32.xlu0 %v6326_v30, %s5412_s8 }
0x3360   :  { %v3716_v36 = vpop.permute.xlu0 %3715 }
0x3361   :  { %4276 = vmatmul.mubr.msk.f32.vlgmr.msra.gmra.mrb[38].mxu0 %vm147_vm1, %v3716_v36  ;;  %v4061_v36 = vld [vmem:[%s6437_s5 + $0x28] sm:$0xff] }
0x3362   :  { %4862 = vmatpush1.bf16.msra.mxu0 %v6175_v34  ;;  %3987 = vmatprep.mubr.f32.mxu0 %v5413_v51  ;;  %v3718_v51 = vrot.slane %v6306_v9, 4 }
0x3363   :  { %4864 = vmatprep.subr.bf16.mxu0 %v6179_v41 }
0x3366   :  { %4866 = vmatpush1.bf16.msra.mxu0 %v6181_v32 }
0x3367   :  { %4868 = vmatprep.subr.bf16.mxu0 %v6185_v44 }
0x336a   :  { %4870 = vmatpush1.bf16.msra.mxu0 %v6187_v45 }
0x336b   :  { %4872 = vmatprep.subr.bf16.mxu0 %v6192_v46 }
0x336e   :  { %4874 = vmatpush1.bf16.msra.mxu0 %v6194_v61 }
0x3434   :  { %v3789_v35 = vpop.f32.mrb[38].mxu0 }
0x3435   :  { %v3790_v49 = vadd.f32 %v3789_v35, %v3717_v26  ;;  %v3791_v53 = vpop.f32.mrb[39].mxu0  ;;  %v4062_v35 = vld [vmem:[%s6437_s5 + $0x30] sm:$0xff] }
0x3436   :  { %v3792_v41 = vadd.f32 %v3791_v53, %v3718_v51 }
0x3437   :  { %v4277_v34 = vmul.f32 -1.442695, %v3790_v49  ;;  %v4063_v49 = vld [vmem:[%s6437_s5 + $0x38] sm:$0xff] }
0x3438   :  { %v4278_v46 = vmul.f32 -1.442695, %v3792_v41  ;;  %v4887_v53 = vpack.c.bf16 %v4063_v49, %v4062_v35 }
0x3439   :  { %5323 = vpow2.f32 %v4277_v34 }
0x343a   :  { %5325 = vtanh.f32 %v3792_v41 }
0x3443   :  { %v5324_v43 = vpop.eup %5323 }
0x3444   :  { %v3800_v32 = vadd.f32 1.0, %v5324_v43  ;;  %v5326_v44 = vpop.eup %5325 }
0x3446   :  { %5327 = vrcp.f32 %v3800_v32 }
0x3447   :  { %5329 = vpow2.f32 %v4278_v46  ;;  %v4065_v46 = vld [vmem:[%s6437_s5 + $0x48] sm:$0xff] }
0x3450   :  { %v5328_v45 = vpop.eup %5327 }
0x3451   :  { %v3808_v40 = vmul.f32 %v5328_v45, %v5326_v44  ;;  %v5330_v61 = vpop.eup %5329  ;;  %v3807_v47 = vmul.f32 %v5328_v45, %v3711_v23  ;;  %v4057_v23 = vld [vmem:[%s6437_s5 + $0x8] sm:$0xff] }
0x3452   :  { %v3801_v18 = vadd.f32 1.0, %v5330_v61  ;;  %v4875_v63 = vpack.c.bf16 %v4057_v23, %v4056_v22 }
0x3453   :  { %3810 = vrot.lane.b32.xlu1 %v3808_v40, %s5412_s8  ;;  %v4064_v40 = vld [vmem:[%s6437_s5 + $0x40] sm:$0xff] }
0x3454   :  { %5331 = vrcp.f32 %v3801_v18  ;;  %4876 = vmatprep.subr.bf16.mxu1 %v4875_v63  ;;  %v4891_v61 = vpack.c.bf16 %v4065_v46, %v4064_v40 }
0x345e   :  { %v5332_v60 = vpop.eup %5331 }
0x34c5   :  { %v3811_v8 = vpop.permute.xlu1 %3810 }
0x34c6   :  { %v3813_v56 = vadd.f32 %v3811_v8, %v3807_v47  ;;  %v4068_v47 = vld [vmem:[%s6437_s5 + $0x60] sm:$0xff]  ;;  %v4069_v8 = vld [vmem:[%s6437_s5 + $0x68] sm:$0xff] }
0x34c8   :  { %5333 = vtanh.f32 %v3813_v56 }
0x34d2   :  { %v5334_v7 = vpop.eup %5333 }
0x34d3   :  { %v3815_v6 = vmul.f32 %v5334_v7, %v5332_v60  ;;  %v4899_v7 = vpack.c.bf16 %v4069_v8, %v4068_v47 }
0x34d5   :  { %3817 = vrot.lane.b32.xlu0 %v3815_v6, %s5412_s8  ;;  %v4022_v29 = vrot.slane %v3815_v6, 6  ;;  %v4071_v6 = vld [vmem:[%s6437_s5 + $0x78] sm:$0xff] }
0x34d7   :  { %v4032_v54 = vsel %vm969_vm2, %v6326_v30, %v4022_v29  ;;  %v4060_v30 = vld [vmem:[%s6437_s5 + $0x20] sm:$0xff] }
0x34d8   :  { %v4883_v26 = vpack.c.bf16 %v4061_v36, %v4060_v30 }
0x3547   :  { %v3818_v62 = vpop.permute.xlu0 %3817 }
0x3548   :  { %4279 = vmatmul.mubr.msk.f32.vlgmr.msra.gmra.mrb[32].mxu1 %vm147_vm1, %v3818_v62 }
0x3549   :  { %4878 = vmatpush3.bf16.msra.mxu1 %v4875_v63 }
0x354a   :  { %4880 = vmatprep.subr.bf16.mxu1 %v4879_v37 }
0x354d   :  { %4882 = vmatpush3.bf16.msra.mxu1 %v4879_v37 }
0x354e   :  { %4884 = vmatprep.subr.bf16.mxu1 %v4883_v26 }
0x3551   :  { %4886 = vmatpush3.bf16.msra.mxu1 %v4883_v26 }
0x3552   :  { %4888 = vmatprep.subr.bf16.mxu1 %v4887_v53 }
0x3555   :  { %4890 = vmatpush3.bf16.msra.mxu1 %v4887_v53 }
0x3556   :  { %4892 = vmatprep.subr.bf16.mxu1 %v4891_v61 }
0x3559   :  { %4894 = vmatpush3.bf16.msra.mxu1 %v4891_v61 }
0x361b   :  { %v3891_v14 = vpop.f32.mrb[32].mxu1 }
0x361c   :  { %v3892_v11 = vadd.f32 %v3891_v14, %v3819_v0  ;;  %v3893_v50 = vpop.f32.mrb[33].mxu1 }
0x361d   :  { %v3894_v55 = vadd.f32 %v3893_v50, %v3820_v13 }
0x361e   :  { %v4280_v52 = vmul.f32 -1.442695, %v3892_v11  ;;  %v4922_v11 = vpack.i.bf16 %v6239_v21, %v6086_v33 }
0x361f   :  { %v4281_v15 = vmul.f32 -1.442695, %v3894_v55 }
0x3620   :  { %5335 = vpow2.f32 %v4280_v52 }
0x3621   :  { %5337 = vtanh.f32 %v3894_v55 }
0x362a   :  { %v5336_v28 = vpop.eup %5335 }
0x362b   :  { %v3902_v3 = vadd.f32 1.0, %v5336_v28  ;;  %v5338_v4 = vpop.eup %5337 }
0x362d   :  { %5339 = vrcp.f32 %v3902_v3 }
0x362e   :  { %5341 = vpow2.f32 %v4281_v15 }
0x3637   :  { %v5340_v17 = vpop.eup %5339 }
0x3638   :  { %v3910_v25 = vmul.f32 %v5340_v17, %v5338_v4  ;;  %v5342_v27 = vpop.eup %5341  ;;  %v3909_v48 = vmul.f32 %v5340_v17, %v3813_v56  ;;  %v4070_v56 = vld [vmem:[%s6437_s5 + $0x70] sm:$0xff] }
0x3639   :  { %v3903_v57 = vadd.f32 1.0, %v5342_v27  ;;  %v4903_v0 = vpack.c.bf16 %v4071_v6, %v4070_v56 }
0x363a   :  { %3912 = vrot.lane.b32.xlu1 %v3910_v25, %s5412_s8 }
0x363b   :  { %5343 = vrcp.f32 %v3903_v57 }
0x3645   :  { %v5344_v9 = vpop.eup %5343 }
0x36ac   :  { %v3913_v38 = vpop.permute.xlu1 %3912 }
0x36ad   :  { %v6347_v24 = vadd.f32 %v3913_v38, %v3909_v48 }
0x36af   :  { %5345 = vtanh.f32 %v6347_v24 }
0x36b9   :  { %v5346_v31 = vpop.eup %5345 }
0x36ba   :  { %v3917_v39 = vmul.f32 %v5346_v31, %v5344_v9 }
0x36bc   :  { %3919 = vrot.lane.b32.xlu0 %v3917_v39, %s5412_s8  ;;  %v4024_v5 = vrot.slane %v3917_v39, 4 }
0x36be   :  { %v6356_v10 = vsel %vm971_vm3, %v4032_v54, %v4024_v5 }
0x36c0   :  { %4918 = vrot.lane.b32.xlu0 %v4917_v16, %s5412_s8 }
0x372e   :  { %v3920_v19 = vpop.permute.xlu0 %3919 }
0x372f   :  { %4282 = vmatmul.mubr.msk.f32.vlgmr.msra.gmra.mrb[40].mxu0 %vm147_vm1, %v3920_v19 }
0x3732   :  { %v4919_v55 = vpop.permute.xlu0 %4918 }
0x3733   :  { %v4920_v17 = vunpack.i.l.bf16 %v4919_v55  ;;  %v4921_v38 = vunpack.i.h.bf16 %v4919_v55 }
0x3735   :  { %v4049_v33 = vsel %vm138_vm0, %v5675_v58, %v4920_v17  ;;  %v4050_v29 = vsel %vm138_vm0, %v5792_v20, %v4921_v38 }
0x3802   :  { %v3989_v34 = vpop.f32.mrb[40].mxu0 }
0x3803   :  { %v3990_v51 = vadd.f32 %v3989_v34, %v6144_v59  ;;  %v3991_v41 = vpop.f32.mrb[41].mxu0  ;;  %v4066_v59 = vld [vmem:[%s6437_s5 + $0x50] sm:$0xff] }
0x3804   :  { %v3992_v32 = vadd.f32 %v3991_v41, %v6156_v12  ;;  %v4067_v12 = vld [vmem:[%s6437_s5 + $0x58] sm:$0xff] }
0x3805   :  { %v4283_v43 = vmul.f32 -1.442695, %v3990_v51  ;;  %v4895_v18 = vpack.c.bf16 %v4067_v12, %v4066_v59 }
0x3806   :  { %v4284_v50 = vmul.f32 -1.442695, %v3992_v32 }
0x3807   :  { %5347 = vpow2.f32 %v4283_v43  ;;  %4896 = vmatprep.subr.bf16.mxu1 %v4895_v18 }
0x3808   :  { %5349 = vtanh.f32 %v3992_v32  ;;  %4898 = vmatpush3.bf16.msra.mxu1 %v4895_v18 }
0x3809   :  { %4900 = vmatprep.subr.bf16.mxu1 %v4899_v7 }
0x380c   :  { %4902 = vmatpush3.bf16.msra.mxu1 %v4899_v7 }
0x380d   :  { %4904 = vmatprep.subr.bf16.mxu1 %v4903_v0 }
0x3810   :  { %4906 = vmatpush3.bf16.msra.mxu1 %v4903_v0 }
0x3811   :  { %v5348_v44 = vpop.eup %5347 }
0x3812   :  { %v4000_v45 = vadd.f32 1.0, %v5348_v44  ;;  %v5350_v60 = vpop.eup %5349 }
0x3814   :  { %5351 = vrcp.f32 %v4000_v45 }
0x3815   :  { %5353 = vpow2.f32 %v4284_v50 }
0x381e   :  { %v5352_v62 = vpop.eup %5351 }
0x381f   :  { %v4008_v14 = vmul.f32 %v5352_v62, %v5350_v60  ;;  %v5354_v52 = vpop.eup %5353  ;;  %v4007_v28 = vmul.f32 %v5352_v62, %v6347_v24 }
0x3820   :  { %v4001_v13 = vadd.f32 1.0, %v5354_v52 }
0x3821   :  { %4010 = vrot.lane.b32.xlu1 %v4008_v14, %s5412_s8 }
0x3822   :  { %5355 = vrcp.f32 %v4001_v13 }
0x3825   :  { %4923 = vrot.lane.b32.xlu1 %v4922_v11, %s5415_s14 }
0x382c   :  { %v5356_v57 = vpop.eup %5355 }
0x3893   :  { %v4011_v3 = vpop.permute.xlu1 %4010 }
0x3894   :  { %v4013_v4 = vadd.f32 %v4011_v3, %v4007_v28 }
0x3896   :  { %5357 = vtanh.f32 %v4013_v4 }
0x3897   :  { %v4924_v25 = vpop.permute.xlu1 %4923 }
0x3898   :  { %v4925_v15 = vunpack.i.l.bf16 %v4924_v25  ;;  %v4926_v24 = vunpack.i.h.bf16 %v4924_v25 }
0x389a   :  { %v4051_v21 = vsel %vm147_vm1, %v4049_v33, %v4925_v15  ;;  %v4052_v39 = vsel %vm147_vm1, %v4050_v29, %v4926_v24 }
0x389b   :  { %v4054_v27 = vsel %vm4053_vm5, %v4051_v21, %v6312_v2  ;;  %v4285_v2 = vld [vmem:[%s6438_s6] ss:$0 sm:$0xff] }
0x389c   :  { %4336 = vmatprep.mubr.f32.mxu1 %v4054_v27 }
0x38a0   :  { %v5358_v48 = vpop.eup %5357 }
0x38a1   :  { %v4015_v9 = vmul.f32 %v5358_v48, %v5356_v57 }
0x38a3   :  { %v4027_v31 = vrot.slane %v4015_v9, 2 }
0x38a5   :  { %v4034_v5 = vsel %vm973_vm4, %v6356_v10, %v4027_v31 }
0x38a6   :  { %v4055_v58 = vsel %vm4053_vm5, %v4052_v39, %v4034_v5 }
0x38a7   :  { %4337 = vmatmul.mubr.f32.vlgmr.msra.gmra.mrb[34].mxu1 %v4055_v58 }
0x397a   :  { %v4338_v54 = vpop.f32.mrb[34].mxu1 }
0x397b   :  { %v4151_v16 = vadd.f32 %v4338_v54, %v4285_v2  ;;  %v4145_v19 = vpop.f32.mrb[35].mxu1 }
0x397c   :  { %v4146_v22 = vadd.f32 %v4285_v2, %v4145_v19 }
0x397d   :  { %4156 = vst.msk [vmem:[%s6439_s7 + $0x8] sm:$0xff] %vm4154_vm6, %v4151_v16 }
0x397e   :  { %4155 = vst.msk [vmem:[%s6439_s7] sm:$0xff] %vm4154_vm6, %v4146_v22 }
0x397f   :  { %4161 = vsyncpa [#allocation3], 1 }
0x3980   :  { %4162 = vsyncpa [#allocation5], 1 }

</bundles_post_ra>
